<compile_context>
chip_gen: v6e
topology: v6e:2x2x1
jax: 0.10.0
libtpu: 0.0.40
codegen_flags: <defaults>
</compile_context>

<pallas_src>
import functools
import math

import jax
import jax.numpy as jnp
from jax.experimental import pallas as pl
from jax.experimental.pallas import tpu as pltpu


def _layer_norm(x, gamma, beta, eps):
    mean = jnp.mean(x, axis=-1, keepdims=True)
    var = jnp.mean(jnp.square(x - mean), axis=-1, keepdims=True)
    inv = jax.lax.rsqrt(var + eps)
    return gamma * ((x - mean) * inv) + beta


def _transformer_block_kernel(
    x_ref, wq_ref, wk_ref, wv_ref, wo_ref, bo_ref,
    w1_ref, b1_ref, w2_ref, b2_ref,
    g1_ref, be1_ref, g2_ref, be2_ref,
    o_ref, *, heads, tq, causal_mask, eps,
):
    S, E = x_ref.shape                       # x block: full sequence for this batch
    hd = E // heads
    scale = 1.0 / math.sqrt(hd)
    mxd = x_ref.dtype                        # MXU operand dtype (bf16-ready)

    qi = pl.program_id(1)
    q_start = qi * tq
    if tq % 8 == 0:
        q_start = pl.multiple_of(q_start, 8)

    x_all = x_ref[...]                       # (S, E)  stored dtype
    xq = x_ref[pl.ds(q_start, tq), :]        # (tq, E) query rows of this tile

    # --- Q / K / V projections (MXU in stored dtype, f32 accumulation) ---
    q = jnp.dot(xq, wq_ref[...], preferred_element_type=jnp.float32).astype(mxd)
    k = jnp.dot(x_all, wk_ref[...], preferred_element_type=jnp.float32).astype(mxd)
    v = jnp.dot(x_all, wv_ref[...], preferred_element_type=jnp.float32).astype(mxd)

    # --- batched-heads attention: single layout change, large MXU tiles ---
    q3 = q.reshape(tq, heads, hd).transpose(1, 0, 2)   # (h, tq, hd)
    k3 = k.reshape(S, heads, hd).transpose(1, 0, 2)    # (h, S,  hd)
    v3 = v.reshape(S, heads, hd).transpose(1, 0, 2)    # (h, S,  hd)

    s = jnp.einsum("hqd,hkd->hqk", q3, k3,
                   preferred_element_type=jnp.float32) * scale   # (h, tq, S) f32

    if causal_mask:
        row = q_start + jax.lax.broadcasted_iota(jnp.int32, (tq, S), 0)
        col = jax.lax.broadcasted_iota(jnp.int32, (tq, S), 1)
        s = jnp.where((col > row)[None, :, :], jnp.float32(-1e30), s)

    # max-stabilized softmax; reciprocal on the EUP instead of a VPU divide
    s = s - jnp.max(s, axis=-1, keepdims=True)
    p = jnp.exp(s)
    p = p * pl.reciprocal(jnp.sum(p, axis=-1, keepdims=True), approx=True)

    ctx = jnp.einsum("hqk,hkd->hqd", p.astype(mxd), v3,
                     preferred_element_type=jnp.float32)          # (h, tq, hd)
    ctx = ctx.transpose(1, 0, 2).reshape(tq, E)                   # (tq, E) f32

    attn = jnp.dot(ctx.astype(mxd), wo_ref[...],
                   preferred_element_type=jnp.float32)
    attn = attn + bo_ref[...].astype(jnp.float32)

    # --- residual + LayerNorm 1 (f32 elementwise) ---
    h1 = _layer_norm(xq.astype(jnp.float32) + attn,
                     g1_ref[...].astype(jnp.float32),
                     be1_ref[...].astype(jnp.float32), eps)

    # --- feed-forward: Linear -> ReLU -> Linear ---
    ff = jnp.dot(h1.astype(mxd), w1_ref[...],
                 preferred_element_type=jnp.float32)
    ff = jnp.maximum(ff + b1_ref[...].astype(jnp.float32), 0.0)
    ff = jnp.dot(ff.astype(mxd), w2_ref[...],
                 preferred_element_type=jnp.float32)
    ff = ff + b2_ref[...].astype(jnp.float32)

    # --- residual + LayerNorm 2 ---
    out = _layer_norm(h1 + ff,
                      g2_ref[...].astype(jnp.float32),
                      be2_ref[...].astype(jnp.float32), eps)

    o_ref[...] = out.astype(o_ref.dtype)


def _vmem_limit_bytes():
    """Generation-aware VMEM limit (leave ~20% headroom)."""
    cap = None
    try:
        cap = getattr(pltpu.get_tpu_info(), "vmem_capacity_bytes", None)
    except Exception:
        cap = None
    if not cap:
        return 64 * 1024 * 1024
    return int(cap * 0.8)


def _pick_q_tile(S, target=256):
    if S <= target:
        return S
    for t in range(target, 0, -8):
        if t % 8 == 0 and S % t == 0:
            return t
    return S


def _build_call(B, S, E, ffd, tq, out_dtype, *, heads, mask, eps,
                single_buffer_weights):
    nq = S // tq
    kernel = functools.partial(_transformer_block_kernel, heads=heads, tq=tq,
                               causal_mask=mask, eps=eps)

    wkwargs = {}
    if single_buffer_weights and hasattr(pl, "Buffered"):
        # Constant index map -> fetched once; single buffer halves weight VMEM.
        wkwargs = {"pipeline_mode": pl.Buffered(1)}

    def wspec(shape):
        return pl.BlockSpec(shape, lambda b, qi: (0,) * len(shape), **wkwargs)

    grid_spec = pltpu.PrefetchScalarGridSpec(
        num_scalar_prefetch=0,
        grid=(B, nq),
        in_specs=[
            pl.BlockSpec((None, S, E), lambda b, qi: (b, 0, 0)),   # x (per batch)
            wspec((E, E)),      # wq
            wspec((E, E)),      # wk
            wspec((E, E)),      # wv
            wspec((E, E)),      # wo
            wspec((1, E)),      # bo
            wspec((E, ffd)),    # w1
            wspec((1, ffd)),    # b1
            wspec((ffd, E)),    # w2
            wspec((1, E)),      # b2
            wspec((1, E)),      # gamma1
            wspec((1, E)),      # beta1
            wspec((1, E)),      # gamma2
            wspec((1, E)),      # beta2
        ],
        out_specs=pl.BlockSpec((None, tq, E), lambda b, qi: (b, qi, 0)),
    )

    return pl.pallas_call(
        kernel,
        out_shape=jax.ShapeDtypeStruct((B, S, E), out_dtype),
        grid_spec=grid_spec,
        compiler_params=pltpu.CompilerParams(
            dimension_semantics=("parallel", "parallel"),
            vmem_limit_bytes=_vmem_limit_bytes(),
        ),
    )


def transformer_block(x, params, *, heads, mask=False, eps=1e-5, q_tile=None):
    """x: (B, S, E).  params: dict of JAX arrays (weights in (in, out) layout)."""
    B, S, E = x.shape
    ffd = params["w1"].shape[1]
    assert E % heads == 0, "emb must be divisible by heads"
    tq = q_tile if q_tile is not None else _pick_q_tile(S)
    assert S % tq == 0, "sequence length must be divisible by the query tile"

    def row(v):   # (N,) -> (1, N): keep every kernel operand >= 2-D / lane-major
        return v.reshape(1, -1)

    args = (x,
            params["wq"], params["wk"], params["wv"], params["wo"], row(params["bo"]),
            params["w1"], row(params["b1"]), params["w2"], row(params["b2"]),
            row(params["gamma1"]), row(params["beta1"]),
            row(params["gamma2"]), row(params["beta2"]))

    try:
        call = _build_call(B, S, E, ffd, tq, x.dtype, heads=heads, mask=mask,
                           eps=eps, single_buffer_weights=True)
        return jax.block_until_ready(call(*args))
    except Exception:
        # pipeline_mode=pl.Buffered(1) unsupported on this jax build: fall back
        # to default double-buffered weight blocks (correctness identical).
        call = _build_call(B, S, E, ffd, tq, x.dtype, heads=heads, mask=mask,
                           eps=eps, single_buffer_weights=False)
        return call(*args)


def _reference(x, params, *, heads, mask=False, eps=1e-5):
    """Pure-JAX reference mirroring the PyTorch TransformerBlock forward."""
    B, S, E = x.shape
    hd = E // heads

    def split(t):
        return t.reshape(B, S, heads, hd).transpose(0, 2, 1, 3)

    q = split(x @ params["wq"])
    k = split(x @ params["wk"])
    v = split(x @ params["wv"])
    dots = jnp.einsum("bhqd,bhkd->bhqk", q, k) / math.sqrt(hd)
    if mask:
        m = jnp.triu(jnp.ones((S, S), dtype=bool), k=1)
        dots = jnp.where(m, -jnp.inf, dots)
    attn = jax.nn.softmax(dots, axis=-1)
    out = jnp.einsum("bhqk,bhkd->bhqd", attn, v)
    out = out.transpose(0, 2, 1, 3).reshape(B, S, E)
    out = out @ params["wo"] + params["bo"]

    def ln(t, g, b):
        mean = t.mean(axis=-1, keepdims=True)
        var = ((t - mean) ** 2).mean(axis=-1, keepdims=True)
        return g * (t - mean) / jnp.sqrt(var + eps) + b

    h = ln(x + out, params["gamma1"], params["beta1"])
    ff = jnp.maximum(h @ params["w1"] + params["b1"], 0.0) @ params["w2"] + params["b2"]
    return ln(h + ff, params["gamma2"], params["beta2"])


def _make_params(key, E, FF):
    ks = jax.random.split(key, 9)
    sc = 0.08
    return {
        "wq": sc * jax.random.normal(ks[0], (E, E), jnp.float32),
        "wk": sc * jax.random.normal(ks[1], (E, E), jnp.float32),
        "wv": sc * jax.random.normal(ks[2], (E, E), jnp.float32),
        "wo": sc * jax.random.normal(ks[3], (E, E), jnp.float32),
        "bo": sc * jax.random.normal(ks[4], (E,), jnp.float32),
        "w1": sc * jax.random.normal(ks[5], (E, FF), jnp.float32),
        "b1": sc * jax.random.normal(ks[6], (FF,), jnp.float32),
        "w2": sc * jax.random.normal(ks[7], (FF, E), jnp.float32),
        "b2": sc * jax.random.normal(ks[8], (E,), jnp.float32),
        "gamma1": jnp.ones((E,), jnp.float32),
        "beta1": jnp.zeros((E,), jnp.float32),
        "gamma2": jnp.ones((E,), jnp.float32),
        "beta2": jnp.zeros((E,), jnp.float32),
    }


if __name__ == "__main__":
    key = jax.random.PRNGKey(0)
    k1, k2, k3, k4 = jax.random.split(key, 4)

    # --- test 1: single query tile (tq == S), 8 heads, no mask ---
    B, S, E, H, FF = 2, 8, 32, 8, 64
    params = _make_params(k1, E, FF)
    x = jax.random.normal(k2, (B, S, E), jnp.float32)
    out = jax.block_until_ready(transformer_block(x, params, heads=H, mask=False))
    with jax.default_matmul_precision("float32"):
        ref = _reference(x, params, heads=H, mask=False)
    assert out.shape == (B, S, E)
    err1 = float(jnp.max(jnp.abs(out - ref)))
    assert jnp.allclose(out, ref, atol=3e-3, rtol=3e-3), (
        f"test1 mismatch vs reference, max|diff|={err1}")

    # --- test 2: causal mask + query tiling (grid (B, 2)), 4 heads ---
    B, S, E, H, FF = 2, 16, 32, 4, 64
    params = _make_params(k3, E, FF)
    x = jax.random.normal(k4, (B, S, E), jnp.float32)
    out = jax.block_until_ready(
        transformer_block(x, params, heads=H, mask=True, q_tile=8))
    with jax.default_matmul_precision("float32"):
        ref = _reference(x, params, heads=H, mask=True)
    assert out.shape == (B, S, E)
    err2 = float(jnp.max(jnp.abs(out - ref)))
    assert jnp.allclose(out, ref, atol=3e-3, rtol=3e-3), (
        f"test2 mismatch vs reference, max|diff|={err2}")

    print("KERNEL_OK")
</pallas_src>

<mosaic_0001>
module attributes {stable_mosaic.version = 11 : i64} {
  func.func @_transformer_block_kernel(%arg0: i32, %arg1: i32, %arg2: memref<1x8x32xf32, #tpu.memory_space<vmem>>, %arg3: memref<32x32xf32, #tpu.memory_space<vmem>>, %arg4: memref<32x32xf32, #tpu.memory_space<vmem>>, %arg5: memref<32x32xf32, #tpu.memory_space<vmem>>, %arg6: memref<32x32xf32, #tpu.memory_space<vmem>>, %arg7: memref<1x32xf32, #tpu.memory_space<vmem>>, %arg8: memref<32x64xf32, #tpu.memory_space<vmem>>, %arg9: memref<1x64xf32, #tpu.memory_space<vmem>>, %arg10: memref<64x32xf32, #tpu.memory_space<vmem>>, %arg11: memref<1x32xf32, #tpu.memory_space<vmem>>, %arg12: memref<1x32xf32, #tpu.memory_space<vmem>>, %arg13: memref<1x32xf32, #tpu.memory_space<vmem>>, %arg14: memref<1x32xf32, #tpu.memory_space<vmem>>, %arg15: memref<1x32xf32, #tpu.memory_space<vmem>>, %arg16: memref<1x8x32xf32, #tpu.memory_space<vmem>>) attributes {dimension_semantics = [#tpu.dimension_semantics<parallel>, #tpu.dimension_semantics<parallel>], iteration_bounds = array<i64: 2, 1>, scalar_prefetch = 0 : i64, scratch_operands = 0 : i64, tpu.core_type = #tpu.core_type<tc>, window_params = [{transform_indices = @transform_0, window_bounds = array<i64: 1, 8, 32>}, {pipeline_mode = #tpu.pipeline_mode<synchronous>, transform_indices = @transform_1, window_bounds = array<i64: 32, 32>}, {pipeline_mode = #tpu.pipeline_mode<synchronous>, transform_indices = @transform_2, window_bounds = array<i64: 32, 32>}, {pipeline_mode = #tpu.pipeline_mode<synchronous>, transform_indices = @transform_3, window_bounds = array<i64: 32, 32>}, {pipeline_mode = #tpu.pipeline_mode<synchronous>, transform_indices = @transform_4, window_bounds = array<i64: 32, 32>}, {pipeline_mode = #tpu.pipeline_mode<synchronous>, transform_indices = @transform_5, window_bounds = array<i64: 1, 32>}, {pipeline_mode = #tpu.pipeline_mode<synchronous>, transform_indices = @transform_6, window_bounds = array<i64: 32, 64>}, {pipeline_mode = #tpu.pipeline_mode<synchronous>, transform_indices = @transform_7, window_bounds = array<i64: 1, 64>}, {pipeline_mode = #tpu.pipeline_mode<synchronous>, transform_indices = @transform_8, window_bounds = array<i64: 64, 32>}, {pipeline_mode = #tpu.pipeline_mode<synchronous>, transform_indices = @transform_9, window_bounds = array<i64: 1, 32>}, {pipeline_mode = #tpu.pipeline_mode<synchronous>, transform_indices = @transform_10, window_bounds = array<i64: 1, 32>}, {pipeline_mode = #tpu.pipeline_mode<synchronous>, transform_indices = @transform_11, window_bounds = array<i64: 1, 32>}, {pipeline_mode = #tpu.pipeline_mode<synchronous>, transform_indices = @transform_12, window_bounds = array<i64: 1, 32>}, {pipeline_mode = #tpu.pipeline_mode<synchronous>, transform_indices = @transform_13, window_bounds = array<i64: 1, 32>}, {transform_indices = @transform_14, window_bounds = array<i64: 1, 8, 32>}]} {
    %c8_i32 = arith.constant 8 : i32
    %0 = arith.muli %arg1, %c8_i32 : i32
    %1 = tpu.assume_multiple %0, 8 : i32
    %c0 = arith.constant 0 : index
    %c0_0 = arith.constant 0 : index
    %c0_1 = arith.constant 0 : index
    %2 = vector.load %arg2[%c0, %c0_0, %c0_1] : memref<1x8x32xf32, #tpu.memory_space<vmem>>, vector<1x8x32xf32>
    %3 = vector.shape_cast %2 : vector<1x8x32xf32> to vector<8x32xf32>
    %c0_2 = arith.constant 0 : index
    %4 = arith.index_cast %1 : i32 to index
    %c0_3 = arith.constant 0 : index
    %5 = vector.load %arg2[%c0_2, %4, %c0_3] : memref<1x8x32xf32, #tpu.memory_space<vmem>>, vector<1x8x32xf32>
    %6 = vector.shape_cast %5 : vector<1x8x32xf32> to vector<8x32xf32>
    %c0_4 = arith.constant 0 : index
    %c0_5 = arith.constant 0 : index
    %7 = vector.load %arg3[%c0_4, %c0_5] : memref<32x32xf32, #tpu.memory_space<vmem>>, vector<32x32xf32>
    %cst = arith.constant dense<0.000000e+00> : vector<8x32xf32>
    %8 = tpu.matmul %6, %7, %cst {dimension_numbers = #tpu.dot_dimension_numbers<[1], [0], [0], [1], [0, 0, 1, 1], [], []>} : vector<8x32xf32>, vector<32x32xf32>, vector<8x32xf32> -> vector<8x32xf32>
    %c0_6 = arith.constant 0 : index
    %c0_7 = arith.constant 0 : index
    %9 = vector.load %arg4[%c0_6, %c0_7] : memref<32x32xf32, #tpu.memory_space<vmem>>, vector<32x32xf32>
    %cst_8 = arith.constant dense<0.000000e+00> : vector<8x32xf32>
    %10 = tpu.matmul %3, %9, %cst_8 {dimension_numbers = #tpu.dot_dimension_numbers<[1], [0], [0], [1], [0, 0, 1, 1], [], []>} : vector<8x32xf32>, vector<32x32xf32>, vector<8x32xf32> -> vector<8x32xf32>
    %c0_9 = arith.constant 0 : index
    %c0_10 = arith.constant 0 : index
    %11 = vector.load %arg5[%c0_9, %c0_10] : memref<32x32xf32, #tpu.memory_space<vmem>>, vector<32x32xf32>
    %cst_11 = arith.constant dense<0.000000e+00> : vector<8x32xf32>
    %12 = tpu.matmul %3, %11, %cst_11 {dimension_numbers = #tpu.dot_dimension_numbers<[1], [0], [0], [1], [0, 0, 1, 1], [], []>} : vector<8x32xf32>, vector<32x32xf32>, vector<8x32xf32> -> vector<8x32xf32>
    %13 = vector.shape_cast %8 : vector<8x32xf32> to vector<8x8x4xf32>
    %14 = tpu.transpose %13, [1, 0, 2] : vector<8x8x4xf32> -> vector<8x8x4xf32>
    %15 = vector.shape_cast %10 : vector<8x32xf32> to vector<8x8x4xf32>
    %16 = tpu.transpose %15, [1, 0, 2] : vector<8x8x4xf32> -> vector<8x8x4xf32>
    %17 = vector.shape_cast %12 : vector<8x32xf32> to vector<8x8x4xf32>
    %18 = tpu.transpose %17, [1, 0, 2] : vector<8x8x4xf32> -> vector<8x8x4xf32>
    "tpu.trace_start"() <{level = 10 : i32, message = "hqd,hkd->hqk"}> : () -> ()
    %cst_12 = arith.constant dense<0.000000e+00> : vector<8x8x8xf32>
    %19 = tpu.matmul %14, %16, %cst_12 {dimension_numbers = #tpu.dot_dimension_numbers<[2], [2], [1], [1], [0, 0, 0, 1, 1, 1], [0], [0]>} : vector<8x8x4xf32>, vector<8x8x4xf32>, vector<8x8x8xf32> -> vector<8x8x8xf32>
    "tpu.trace_stop"() : () -> ()
    %cst_13 = arith.constant 5.000000e-01 : f32
    %20 = vector.broadcast %cst_13 : f32 to vector<8x8x8xf32>
    %21 = arith.mulf %19, %20 : vector<8x8x8xf32>
    %cst_14 = arith.constant dense<0xFF800000> : vector<8x8xf32>
    %22 = vector.multi_reduction <maximumf>, %21, %cst_14 [2] : vector<8x8x8xf32> to vector<8x8xf32>
    %23 = vector.shape_cast %22 : vector<8x8xf32> to vector<8x8x1xf32>
    %24 = vector.broadcast %23 : vector<8x8x1xf32> to vector<8x8x8xf32>
    %25 = arith.subf %21, %24 : vector<8x8x8xf32>
    %26 = math.exp %25 : vector<8x8x8xf32>
    %cst_15 = arith.constant dense<0.000000e+00> : vector<8x8xf32>
    %27 = vector.multi_reduction <add>, %26, %cst_15 [2] : vector<8x8x8xf32> to vector<8x8xf32>
    %28 = vector.shape_cast %27 : vector<8x8xf32> to vector<8x8x1xf32>
    %29 = tpu.reciprocal %28 {approx = true} : vector<8x8x1xf32> -> vector<8x8x1xf32>
    %30 = vector.broadcast %29 : vector<8x8x1xf32> to vector<8x8x8xf32>
    %31 = arith.mulf %26, %30 : vector<8x8x8xf32>
    "tpu.trace_start"() <{level = 10 : i32, message = "hqk,hkd->hqd"}> : () -> ()
    %cst_16 = arith.constant dense<0.000000e+00> : vector<8x8x4xf32>
    %32 = tpu.matmul %31, %18, %cst_16 {dimension_numbers = #tpu.dot_dimension_numbers<[2], [1], [1], [2], [0, 0, 0, 1, 1, 2], [0], [0]>} : vector<8x8x8xf32>, vector<8x8x4xf32>, vector<8x8x4xf32> -> vector<8x8x4xf32>
    "tpu.trace_stop"() : () -> ()
    %33 = tpu.transpose %32, [1, 0, 2] : vector<8x8x4xf32> -> vector<8x8x4xf32>
    %34 = vector.shape_cast %33 : vector<8x8x4xf32> to vector<8x32xf32>
    %c0_17 = arith.constant 0 : index
    %c0_18 = arith.constant 0 : index
    %35 = vector.load %arg6[%c0_17, %c0_18] : memref<32x32xf32, #tpu.memory_space<vmem>>, vector<32x32xf32>
    %cst_19 = arith.constant dense<0.000000e+00> : vector<8x32xf32>
    %36 = tpu.matmul %34, %35, %cst_19 {dimension_numbers = #tpu.dot_dimension_numbers<[1], [0], [0], [1], [0, 0, 1, 1], [], []>} : vector<8x32xf32>, vector<32x32xf32>, vector<8x32xf32> -> vector<8x32xf32>
    %c0_20 = arith.constant 0 : index
    %c0_21 = arith.constant 0 : index
    %37 = vector.load %arg7[%c0_20, %c0_21] : memref<1x32xf32, #tpu.memory_space<vmem>>, vector<1x32xf32>
    %38 = vector.broadcast %37 : vector<1x32xf32> to vector<8x32xf32>
    %39 = arith.addf %36, %38 : vector<8x32xf32>
    %40 = arith.addf %6, %39 : vector<8x32xf32>
    %c0_22 = arith.constant 0 : index
    %c0_23 = arith.constant 0 : index
    %41 = vector.load %arg12[%c0_22, %c0_23] : memref<1x32xf32, #tpu.memory_space<vmem>>, vector<1x32xf32>
    %c0_24 = arith.constant 0 : index
    %c0_25 = arith.constant 0 : index
    %42 = vector.load %arg13[%c0_24, %c0_25] : memref<1x32xf32, #tpu.memory_space<vmem>>, vector<1x32xf32>
    %cst_26 = arith.constant dense<0.000000e+00> : vector<8xf32>
    %43 = vector.multi_reduction <add>, %40, %cst_26 [1] : vector<8x32xf32> to vector<8xf32>
    %44 = vector.shape_cast %43 : vector<8xf32> to vector<8x1xf32>
    %cst_27 = arith.constant 3.200000e+01 : f32
    %45 = vector.broadcast %cst_27 : f32 to vector<8x1xf32>
    %46 = arith.divf %44, %45 : vector<8x1xf32>
    %47 = vector.broadcast %46 : vector<8x1xf32> to vector<8x32xf32>
    %48 = arith.subf %40, %47 : vector<8x32xf32>
    %49 = arith.mulf %48, %48 : vector<8x32xf32>
    %cst_28 = arith.constant dense<0.000000e+00> : vector<8xf32>
    %50 = vector.multi_reduction <add>, %49, %cst_28 [1] : vector<8x32xf32> to vector<8xf32>
    %51 = vector.shape_cast %50 : vector<8xf32> to vector<8x1xf32>
    %cst_29 = arith.constant 3.200000e+01 : f32
    %52 = vector.broadcast %cst_29 : f32 to vector<8x1xf32>
    %53 = arith.divf %51, %52 : vector<8x1xf32>
    %cst_30 = arith.constant 9.99999974E-6 : f32
    %54 = vector.broadcast %cst_30 : f32 to vector<8x1xf32>
    %55 = arith.addf %53, %54 : vector<8x1xf32>
    %56 = math.rsqrt %55 : vector<8x1xf32>
    %57 = vector.broadcast %46 : vector<8x1xf32> to vector<8x32xf32>
    %58 = arith.subf %40, %57 : vector<8x32xf32>
    %59 = vector.broadcast %56 : vector<8x1xf32> to vector<8x32xf32>
    %60 = arith.mulf %58, %59 : vector<8x32xf32>
    %61 = vector.broadcast %41 : vector<1x32xf32> to vector<8x32xf32>
    %62 = arith.mulf %61, %60 : vector<8x32xf32>
    %63 = vector.broadcast %42 : vector<1x32xf32> to vector<8x32xf32>
    %64 = arith.addf %62, %63 : vector<8x32xf32>
    %c0_31 = arith.constant 0 : index
    %c0_32 = arith.constant 0 : index
    %65 = vector.load %arg8[%c0_31, %c0_32] : memref<32x64xf32, #tpu.memory_space<vmem>>, vector<32x64xf32>
    %cst_33 = arith.constant dense<0.000000e+00> : vector<8x64xf32>
    %66 = tpu.matmul %64, %65, %cst_33 {dimension_numbers = #tpu.dot_dimension_numbers<[1], [0], [0], [1], [0, 0, 1, 1], [], []>} : vector<8x32xf32>, vector<32x64xf32>, vector<8x64xf32> -> vector<8x64xf32>
    %c0_34 = arith.constant 0 : index
    %c0_35 = arith.constant 0 : index
    %67 = vector.load %arg9[%c0_34, %c0_35] : memref<1x64xf32, #tpu.memory_space<vmem>>, vector<1x64xf32>
    %68 = vector.broadcast %67 : vector<1x64xf32> to vector<8x64xf32>
    %69 = arith.addf %66, %68 : vector<8x64xf32>
    %cst_36 = arith.constant 0.000000e+00 : f32
    %70 = vector.broadcast %cst_36 : f32 to vector<8x64xf32>
    %71 = arith.maximumf %69, %70 : vector<8x64xf32>
    %c0_37 = arith.constant 0 : index
    %c0_38 = arith.constant 0 : index
    %72 = vector.load %arg10[%c0_37, %c0_38] : memref<64x32xf32, #tpu.memory_space<vmem>>, vector<64x32xf32>
    %cst_39 = arith.constant dense<0.000000e+00> : vector<8x32xf32>
    %73 = tpu.matmul %71, %72, %cst_39 {dimension_numbers = #tpu.dot_dimension_numbers<[1], [0], [0], [1], [0, 0, 1, 1], [], []>} : vector<8x64xf32>, vector<64x32xf32>, vector<8x32xf32> -> vector<8x32xf32>
    %c0_40 = arith.constant 0 : index
    %c0_41 = arith.constant 0 : index
    %74 = vector.load %arg11[%c0_40, %c0_41] : memref<1x32xf32, #tpu.memory_space<vmem>>, vector<1x32xf32>
    %75 = vector.broadcast %74 : vector<1x32xf32> to vector<8x32xf32>
    %76 = arith.addf %73, %75 : vector<8x32xf32>
    %77 = arith.addf %64, %76 : vector<8x32xf32>
    %c0_42 = arith.constant 0 : index
    %c0_43 = arith.constant 0 : index
    %78 = vector.load %arg14[%c0_42, %c0_43] : memref<1x32xf32, #tpu.memory_space<vmem>>, vector<1x32xf32>
    %c0_44 = arith.constant 0 : index
    %c0_45 = arith.constant 0 : index
    %79 = vector.load %arg15[%c0_44, %c0_45] : memref<1x32xf32, #tpu.memory_space<vmem>>, vector<1x32xf32>
    %cst_46 = arith.constant dense<0.000000e+00> : vector<8xf32>
    %80 = vector.multi_reduction <add>, %77, %cst_46 [1] : vector<8x32xf32> to vector<8xf32>
    %81 = vector.shape_cast %80 : vector<8xf32> to vector<8x1xf32>
    %cst_47 = arith.constant 3.200000e+01 : f32
    %82 = vector.broadcast %cst_47 : f32 to vector<8x1xf32>
    %83 = arith.divf %81, %82 : vector<8x1xf32>
    %84 = vector.broadcast %83 : vector<8x1xf32> to vector<8x32xf32>
    %85 = arith.subf %77, %84 : vector<8x32xf32>
    %86 = arith.mulf %85, %85 : vector<8x32xf32>
    %cst_48 = arith.constant dense<0.000000e+00> : vector<8xf32>
    %87 = vector.multi_reduction <add>, %86, %cst_48 [1] : vector<8x32xf32> to vector<8xf32>
    %88 = vector.shape_cast %87 : vector<8xf32> to vector<8x1xf32>
    %cst_49 = arith.constant 3.200000e+01 : f32
    %89 = vector.broadcast %cst_49 : f32 to vector<8x1xf32>
    %90 = arith.divf %88, %89 : vector<8x1xf32>
    %cst_50 = arith.constant 9.99999974E-6 : f32
    %91 = vector.broadcast %cst_50 : f32 to vector<8x1xf32>
    %92 = arith.addf %90, %91 : vector<8x1xf32>
    %93 = math.rsqrt %92 : vector<8x1xf32>
    %94 = vector.broadcast %83 : vector<8x1xf32> to vector<8x32xf32>
    %95 = arith.subf %77, %94 : vector<8x32xf32>
    %96 = vector.broadcast %93 : vector<8x1xf32> to vector<8x32xf32>
    %97 = arith.mulf %95, %96 : vector<8x32xf32>
    %98 = vector.broadcast %78 : vector<1x32xf32> to vector<8x32xf32>
    %99 = arith.mulf %98, %97 : vector<8x32xf32>
    %100 = vector.broadcast %79 : vector<1x32xf32> to vector<8x32xf32>
    %101 = arith.addf %99, %100 : vector<8x32xf32>
    %c0_51 = arith.constant 0 : index
    %c0_52 = arith.constant 0 : index
    %c0_53 = arith.constant 0 : index
    %102 = vector.load %arg16[%c0_51, %c0_52, %c0_53] : memref<1x8x32xf32, #tpu.memory_space<vmem>>, vector<1x8x32xf32>
    %103 = vector.shape_cast %102 : vector<1x8x32xf32> to vector<8x32xf32>
    %104 = vector.shape_cast %101 : vector<8x32xf32> to vector<1x8x32xf32>
    tpu.vector_store %arg16[%c0_51, %c0_52, %c0_53], %104 {strides = array<i32>} : memref<1x8x32xf32, #tpu.memory_space<vmem>>, vector<1x8x32xf32>,
    return
  }
  func.func @transform_0(%arg0: i32, %arg1: i32) -> (i32, i32, i32) {
    %c0_i32 = arith.constant 0 : i32
    %c0_i32_0 = arith.constant 0 : i32
    %c0_i32_1 = arith.constant 0 : i32
    return %arg0, %c0_i32, %c0_i32_0 : i32, i32, i32
  }
  func.func @transform_1(%arg0: i32, %arg1: i32) -> (i32, i32) {
    %c0_i32 = arith.constant 0 : i32
    %c0_i32_0 = arith.constant 0 : i32
    %c0_i32_1 = arith.constant 0 : i32
    return %c0_i32, %c0_i32_0 : i32, i32
  }
  func.func @transform_2(%arg0: i32, %arg1: i32) -> (i32, i32) {
    %c0_i32 = arith.constant 0 : i32
    %c0_i32_0 = arith.constant 0 : i32
    %c0_i32_1 = arith.constant 0 : i32
    return %c0_i32, %c0_i32_0 : i32, i32
  }
  func.func @transform_3(%arg0: i32, %arg1: i32) -> (i32, i32) {
    %c0_i32 = arith.constant 0 : i32
    %c0_i32_0 = arith.constant 0 : i32
    %c0_i32_1 = arith.constant 0 : i32
    return %c0_i32, %c0_i32_0 : i32, i32
  }
  func.func @transform_4(%arg0: i32, %arg1: i32) -> (i32, i32) {
    %c0_i32 = arith.constant 0 : i32
    %c0_i32_0 = arith.constant 0 : i32
    %c0_i32_1 = arith.constant 0 : i32
    return %c0_i32, %c0_i32_0 : i32, i32
  }
  func.func @transform_5(%arg0: i32, %arg1: i32) -> (i32, i32) {
    %c0_i32 = arith.constant 0 : i32
    %c0_i32_0 = arith.constant 0 : i32
    %c0_i32_1 = arith.constant 0 : i32
    return %c0_i32, %c0_i32_0 : i32, i32
  }
  func.func @transform_6(%arg0: i32, %arg1: i32) -> (i32, i32) {
    %c0_i32 = arith.constant 0 : i32
    %c0_i32_0 = arith.constant 0 : i32
    %c0_i32_1 = arith.constant 0 : i32
    return %c0_i32, %c0_i32_0 : i32, i32
  }
  func.func @transform_7(%arg0: i32, %arg1: i32) -> (i32, i32) {
    %c0_i32 = arith.constant 0 : i32
    %c0_i32_0 = arith.constant 0 : i32
    %c0_i32_1 = arith.constant 0 : i32
    return %c0_i32, %c0_i32_0 : i32, i32
  }
  func.func @transform_8(%arg0: i32, %arg1: i32) -> (i32, i32) {
    %c0_i32 = arith.constant 0 : i32
    %c0_i32_0 = arith.constant 0 : i32
    %c0_i32_1 = arith.constant 0 : i32
    return %c0_i32, %c0_i32_0 : i32, i32
  }
  func.func @transform_9(%arg0: i32, %arg1: i32) -> (i32, i32) {
    %c0_i32 = arith.constant 0 : i32
    %c0_i32_0 = arith.constant 0 : i32
    %c0_i32_1 = arith.constant 0 : i32
    return %c0_i32, %c0_i32_0 : i32, i32
  }
  func.func @transform_10(%arg0: i32, %arg1: i32) -> (i32, i32) {
    %c0_i32 = arith.constant 0 : i32
    %c0_i32_0 = arith.constant 0 : i32
    %c0_i32_1 = arith.constant 0 : i32
    return %c0_i32, %c0_i32_0 : i32, i32
  }
  func.func @transform_11(%arg0: i32, %arg1: i32) -> (i32, i32) {
    %c0_i32 = arith.constant 0 : i32
    %c0_i32_0 = arith.constant 0 : i32
    %c0_i32_1 = arith.constant 0 : i32
    return %c0_i32, %c0_i32_0 : i32, i32
  }
  func.func @transform_12(%arg0: i32, %arg1: i32) -> (i32, i32) {
    %c0_i32 = arith.constant 0 : i32
    %c0_i32_0 = arith.constant 0 : i32
    %c0_i32_1 = arith.constant 0 : i32
    return %c0_i32, %c0_i32_0 : i32, i32
  }
  func.func @transform_13(%arg0: i32, %arg1: i32) -> (i32, i32) {
    %c0_i32 = arith.constant 0 : i32
    %c0_i32_0 = arith.constant 0 : i32
    %c0_i32_1 = arith.constant 0 : i32
    return %c0_i32, %c0_i32_0 : i32, i32
  }
  func.func @transform_14(%arg0: i32, %arg1: i32) -> (i32, i32, i32) {
    %c0_i32 = arith.constant 0 : i32
    %c0_i32_0 = arith.constant 0 : i32
    return %arg0, %arg1, %c0_i32 : i32, i32, i32
  }
}

module attributes {stable_mosaic.version = 11 : i64} {
  func.func @_transformer_block_kernel(%arg0: i32, %arg1: i32, %arg2: memref<1x8x32xf32, #tpu.memory_space<vmem>>, %arg3: memref<32x32xf32, #tpu.memory_space<vmem>>, %arg4: memref<32x32xf32, #tpu.memory_space<vmem>>, %arg5: memref<32x32xf32, #tpu.memory_space<vmem>>, %arg6: memref<32x32xf32, #tpu.memory_space<vmem>>, %arg7: memref<1x32xf32, #tpu.memory_space<vmem>>, %arg8: memref<32x64xf32, #tpu.memory_space<vmem>>, %arg9: memref<1x64xf32, #tpu.memory_space<vmem>>, %arg10: memref<64x32xf32, #tpu.memory_space<vmem>>, %arg11: memref<1x32xf32, #tpu.memory_space<vmem>>, %arg12: memref<1x32xf32, #tpu.memory_space<vmem>>, %arg13: memref<1x32xf32, #tpu.memory_space<vmem>>, %arg14: memref<1x32xf32, #tpu.memory_space<vmem>>, %arg15: memref<1x32xf32, #tpu.memory_space<vmem>>, %arg16: memref<1x8x32xf32, #tpu.memory_space<vmem>>) attributes {dimension_semantics = [#tpu.dimension_semantics<parallel>, #tpu.dimension_semantics<parallel>], iteration_bounds = array<i64: 2, 1>, scalar_prefetch = 0 : i64, scratch_operands = 0 : i64, tpu.core_type = #tpu.core_type<tc>, window_params = [{transform_indices = @transform_0, window_bounds = array<i64: 1, 8, 32>}, {pipeline_mode = #tpu.pipeline_mode<synchronous>, transform_indices = @transform_1, window_bounds = array<i64: 32, 32>}, {pipeline_mode = #tpu.pipeline_mode<synchronous>, transform_indices = @transform_2, window_bounds = array<i64: 32, 32>}, {pipeline_mode = #tpu.pipeline_mode<synchronous>, transform_indices = @transform_3, window_bounds = array<i64: 32, 32>}, {pipeline_mode = #tpu.pipeline_mode<synchronous>, transform_indices = @transform_4, window_bounds = array<i64: 32, 32>}, {pipeline_mode = #tpu.pipeline_mode<synchronous>, transform_indices = @transform_5, window_bounds = array<i64: 1, 32>}, {pipeline_mode = #tpu.pipeline_mode<synchronous>, transform_indices = @transform_6, window_bounds = array<i64: 32, 64>}, {pipeline_mode = #tpu.pipeline_mode<synchronous>, transform_indices = @transform_7, window_bounds = array<i64: 1, 64>}, {pipeline_mode = #tpu.pipeline_mode<synchronous>, transform_indices = @transform_8, window_bounds = array<i64: 64, 32>}, {pipeline_mode = #tpu.pipeline_mode<synchronous>, transform_indices = @transform_9, window_bounds = array<i64: 1, 32>}, {pipeline_mode = #tpu.pipeline_mode<synchronous>, transform_indices = @transform_10, window_bounds = array<i64: 1, 32>}, {pipeline_mode = #tpu.pipeline_mode<synchronous>, transform_indices = @transform_11, window_bounds = array<i64: 1, 32>}, {pipeline_mode = #tpu.pipeline_mode<synchronous>, transform_indices = @transform_12, window_bounds = array<i64: 1, 32>}, {pipeline_mode = #tpu.pipeline_mode<synchronous>, transform_indices = @transform_13, window_bounds = array<i64: 1, 32>}, {transform_indices = @transform_14, window_bounds = array<i64: 1, 8, 32>}]} {
    %c8_i32 = arith.constant 8 : i32
    %0 = arith.muli %arg1, %c8_i32 : i32
    %1 = tpu.assume_multiple %0, 8 : i32
    %c0 = arith.constant 0 : index
    %c0_0 = arith.constant 0 : index
    %c0_1 = arith.constant 0 : index
    %2 = vector.load %arg2[%c0, %c0_0, %c0_1] : memref<1x8x32xf32, #tpu.memory_space<vmem>>, vector<1x8x32xf32>
    %3 = vector.shape_cast %2 : vector<1x8x32xf32> to vector<8x32xf32>
    %c0_2 = arith.constant 0 : index
    %4 = arith.index_cast %1 : i32 to index
    %c0_3 = arith.constant 0 : index
    %5 = vector.load %arg2[%c0_2, %4, %c0_3] : memref<1x8x32xf32, #tpu.memory_space<vmem>>, vector<1x8x32xf32>
    %6 = vector.shape_cast %5 : vector<1x8x32xf32> to vector<8x32xf32>
    %c0_4 = arith.constant 0 : index
    %c0_5 = arith.constant 0 : index
    %7 = vector.load %arg3[%c0_4, %c0_5] : memref<32x32xf32, #tpu.memory_space<vmem>>, vector<32x32xf32>
    %cst = arith.constant dense<0.000000e+00> : vector<8x32xf32>
    %8 = tpu.matmul %6, %7, %cst {dimension_numbers = #tpu.dot_dimension_numbers<[1], [0], [0], [1], [0, 0, 1, 1], [], []>} : vector<8x32xf32>, vector<32x32xf32>, vector<8x32xf32> -> vector<8x32xf32>
    %c0_6 = arith.constant 0 : index
    %c0_7 = arith.constant 0 : index
    %9 = vector.load %arg4[%c0_6, %c0_7] : memref<32x32xf32, #tpu.memory_space<vmem>>, vector<32x32xf32>
    %cst_8 = arith.constant dense<0.000000e+00> : vector<8x32xf32>
    %10 = tpu.matmul %3, %9, %cst_8 {dimension_numbers = #tpu.dot_dimension_numbers<[1], [0], [0], [1], [0, 0, 1, 1], [], []>} : vector<8x32xf32>, vector<32x32xf32>, vector<8x32xf32> -> vector<8x32xf32>
    %c0_9 = arith.constant 0 : index
    %c0_10 = arith.constant 0 : index
    %11 = vector.load %arg5[%c0_9, %c0_10] : memref<32x32xf32, #tpu.memory_space<vmem>>, vector<32x32xf32>
    %cst_11 = arith.constant dense<0.000000e+00> : vector<8x32xf32>
    %12 = tpu.matmul %3, %11, %cst_11 {dimension_numbers = #tpu.dot_dimension_numbers<[1], [0], [0], [1], [0, 0, 1, 1], [], []>} : vector<8x32xf32>, vector<32x32xf32>, vector<8x32xf32> -> vector<8x32xf32>
    %13 = vector.shape_cast %8 : vector<8x32xf32> to vector<8x8x4xf32>
    %14 = tpu.transpose %13, [1, 0, 2] : vector<8x8x4xf32> -> vector<8x8x4xf32>
    %15 = vector.shape_cast %10 : vector<8x32xf32> to vector<8x8x4xf32>
    %16 = tpu.transpose %15, [1, 0, 2] : vector<8x8x4xf32> -> vector<8x8x4xf32>
    %17 = vector.shape_cast %12 : vector<8x32xf32> to vector<8x8x4xf32>
    %18 = tpu.transpose %17, [1, 0, 2] : vector<8x8x4xf32> -> vector<8x8x4xf32>
    "tpu.trace_start"() <{level = 10 : i32, message = "hqd,hkd->hqk"}> : () -> ()
    %cst_12 = arith.constant dense<0.000000e+00> : vector<8x8x8xf32>
    %19 = tpu.matmul %14, %16, %cst_12 {dimension_numbers = #tpu.dot_dimension_numbers<[2], [2], [1], [1], [0, 0, 0, 1, 1, 1], [0], [0]>} : vector<8x8x4xf32>, vector<8x8x4xf32>, vector<8x8x8xf32> -> vector<8x8x8xf32>
    "tpu.trace_stop"() : () -> ()
    %cst_13 = arith.constant 5.000000e-01 : f32
    %20 = vector.broadcast %cst_13 : f32 to vector<8x8x8xf32>
    %21 = arith.mulf %19, %20 : vector<8x8x8xf32>
    %cst_14 = arith.constant dense<0xFF800000> : vector<8x8xf32>
    %22 = vector.multi_reduction <maximumf>, %21, %cst_14 [2] : vector<8x8x8xf32> to vector<8x8xf32>
    %23 = vector.shape_cast %22 : vector<8x8xf32> to vector<8x8x1xf32>
    %24 = vector.broadcast %23 : vector<8x8x1xf32> to vector<8x8x8xf32>
    %25 = arith.subf %21, %24 : vector<8x8x8xf32>
    %26 = math.exp %25 : vector<8x8x8xf32>
    %cst_15 = arith.constant dense<0.000000e+00> : vector<8x8xf32>
    %27 = vector.multi_reduction <add>, %26, %cst_15 [2] : vector<8x8x8xf32> to vector<8x8xf32>
    %28 = vector.shape_cast %27 : vector<8x8xf32> to vector<8x8x1xf32>
    %29 = tpu.reciprocal %28 {approx = true} : vector<8x8x1xf32> -> vector<8x8x1xf32>
    %30 = vector.broadcast %29 : vector<8x8x1xf32> to vector<8x8x8xf32>
    %31 = arith.mulf %26, %30 : vector<8x8x8xf32>
    "tpu.trace_start"() <{level = 10 : i32, message = "hqk,hkd->hqd"}> : () -> ()
    %cst_16 = arith.constant dense<0.000000e+00> : vector<8x8x4xf32>
    %32 = tpu.matmul %31, %18, %cst_16 {dimension_numbers = #tpu.dot_dimension_numbers<[2], [1], [1], [2], [0, 0, 0, 1, 1, 2], [0], [0]>} : vector<8x8x8xf32>, vector<8x8x4xf32>, vector<8x8x4xf32> -> vector<8x8x4xf32>
    "tpu.trace_stop"() : () -> ()
    %33 = tpu.transpose %32, [1, 0, 2] : vector<8x8x4xf32> -> vector<8x8x4xf32>
    %34 = vector.shape_cast %33 : vector<8x8x4xf32> to vector<8x32xf32>
    %c0_17 = arith.constant 0 : index
    %c0_18 = arith.constant 0 : index
    %35 = vector.load %arg6[%c0_17, %c0_18] : memref<32x32xf32, #tpu.memory_space<vmem>>, vector<32x32xf32>
    %cst_19 = arith.constant dense<0.000000e+00> : vector<8x32xf32>
    %36 = tpu.matmul %34, %35, %cst_19 {dimension_numbers = #tpu.dot_dimension_numbers<[1], [0], [0], [1], [0, 0, 1, 1], [], []>} : vector<8x32xf32>, vector<32x32xf32>, vector<8x32xf32> -> vector<8x32xf32>
    %c0_20 = arith.constant 0 : index
    %c0_21 = arith.constant 0 : index
    %37 = vector.load %arg7[%c0_20, %c0_21] : memref<1x32xf32, #tpu.memory_space<vmem>>, vector<1x32xf32>
    %38 = vector.broadcast %37 : vector<1x32xf32> to vector<8x32xf32>
    %39 = arith.addf %36, %38 : vector<8x32xf32>
    %40 = arith.addf %6, %39 : vector<8x32xf32>
    %c0_22 = arith.constant 0 : index
    %c0_23 = arith.constant 0 : index
    %41 = vector.load %arg12[%c0_22, %c0_23] : memref<1x32xf32, #tpu.memory_space<vmem>>, vector<1x32xf32>
    %c0_24 = arith.constant 0 : index
    %c0_25 = arith.constant 0 : index
    %42 = vector.load %arg13[%c0_24, %c0_25] : memref<1x32xf32, #tpu.memory_space<vmem>>, vector<1x32xf32>
    %cst_26 = arith.constant dense<0.000000e+00> : vector<8xf32>
    %43 = vector.multi_reduction <add>, %40, %cst_26 [1] : vector<8x32xf32> to vector<8xf32>
    %44 = vector.shape_cast %43 : vector<8xf32> to vector<8x1xf32>
    %cst_27 = arith.constant 3.200000e+01 : f32
    %45 = vector.broadcast %cst_27 : f32 to vector<8x1xf32>
    %46 = arith.divf %44, %45 : vector<8x1xf32>
    %47 = vector.broadcast %46 : vector<8x1xf32> to vector<8x32xf32>
    %48 = arith.subf %40, %47 : vector<8x32xf32>
    %49 = arith.mulf %48, %48 : vector<8x32xf32>
    %cst_28 = arith.constant dense<0.000000e+00> : vector<8xf32>
    %50 = vector.multi_reduction <add>, %49, %cst_28 [1] : vector<8x32xf32> to vector<8xf32>
    %51 = vector.shape_cast %50 : vector<8xf32> to vector<8x1xf32>
    %cst_29 = arith.constant 3.200000e+01 : f32
    %52 = vector.broadcast %cst_29 : f32 to vector<8x1xf32>
    %53 = arith.divf %51, %52 : vector<8x1xf32>
    %cst_30 = arith.constant 9.99999974E-6 : f32
    %54 = vector.broadcast %cst_30 : f32 to vector<8x1xf32>
    %55 = arith.addf %53, %54 : vector<8x1xf32>
    %56 = math.rsqrt %55 : vector<8x1xf32>
    %57 = vector.broadcast %46 : vector<8x1xf32> to vector<8x32xf32>
    %58 = arith.subf %40, %57 : vector<8x32xf32>
    %59 = vector.broadcast %56 : vector<8x1xf32> to vector<8x32xf32>
    %60 = arith.mulf %58, %59 : vector<8x32xf32>
    %61 = vector.broadcast %41 : vector<1x32xf32> to vector<8x32xf32>
    %62 = arith.mulf %61, %60 : vector<8x32xf32>
    %63 = vector.broadcast %42 : vector<1x32xf32> to vector<8x32xf32>
    %64 = arith.addf %62, %63 : vector<8x32xf32>
    %c0_31 = arith.constant 0 : index
    %c0_32 = arith.constant 0 : index
    %65 = vector.load %arg8[%c0_31, %c0_32] : memref<32x64xf32, #tpu.memory_space<vmem>>, vector<32x64xf32>
    %cst_33 = arith.constant dense<0.000000e+00> : vector<8x64xf32>
    %66 = tpu.matmul %64, %65, %cst_33 {dimension_numbers = #tpu.dot_dimension_numbers<[1], [0], [0], [1], [0, 0, 1, 1], [], []>} : vector<8x32xf32>, vector<32x64xf32>, vector<8x64xf32> -> vector<8x64xf32>
    %c0_34 = arith.constant 0 : index
    %c0_35 = arith.constant 0 : index
    %67 = vector.load %arg9[%c0_34, %c0_35] : memref<1x64xf32, #tpu.memory_space<vmem>>, vector<1x64xf32>
    %68 = vector.broadcast %67 : vector<1x64xf32> to vector<8x64xf32>
    %69 = arith.addf %66, %68 : vector<8x64xf32>
    %cst_36 = arith.constant 0.000000e+00 : f32
    %70 = vector.broadcast %cst_36 : f32 to vector<8x64xf32>
    %71 = arith.maximumf %69, %70 : vector<8x64xf32>
    %c0_37 = arith.constant 0 : index
    %c0_38 = arith.constant 0 : index
    %72 = vector.load %arg10[%c0_37, %c0_38] : memref<64x32xf32, #tpu.memory_space<vmem>>, vector<64x32xf32>
    %cst_39 = arith.constant dense<0.000000e+00> : vector<8x32xf32>
    %73 = tpu.matmul %71, %72, %cst_39 {dimension_numbers = #tpu.dot_dimension_numbers<[1], [0], [0], [1], [0, 0, 1, 1], [], []>} : vector<8x64xf32>, vector<64x32xf32>, vector<8x32xf32> -> vector<8x32xf32>
    %c0_40 = arith.constant 0 : index
    %c0_41 = arith.constant 0 : index
    %74 = vector.load %arg11[%c0_40, %c0_41] : memref<1x32xf32, #tpu.memory_space<vmem>>, vector<1x32xf32>
    %75 = vector.broadcast %74 : vector<1x32xf32> to vector<8x32xf32>
    %76 = arith.addf %73, %75 : vector<8x32xf32>
    %77 = arith.addf %64, %76 : vector<8x32xf32>
    %c0_42 = arith.constant 0 : index
    %c0_43 = arith.constant 0 : index
    %78 = vector.load %arg14[%c0_42, %c0_43] : memref<1x32xf32, #tpu.memory_space<vmem>>, vector<1x32xf32>
    %c0_44 = arith.constant 0 : index
    %c0_45 = arith.constant 0 : index
    %79 = vector.load %arg15[%c0_44, %c0_45] : memref<1x32xf32, #tpu.memory_space<vmem>>, vector<1x32xf32>
    %cst_46 = arith.constant dense<0.000000e+00> : vector<8xf32>
    %80 = vector.multi_reduction <add>, %77, %cst_46 [1] : vector<8x32xf32> to vector<8xf32>
    %81 = vector.shape_cast %80 : vector<8xf32> to vector<8x1xf32>
    %cst_47 = arith.constant 3.200000e+01 : f32
    %82 = vector.broadcast %cst_47 : f32 to vector<8x1xf32>
    %83 = arith.divf %81, %82 : vector<8x1xf32>
    %84 = vector.broadcast %83 : vector<8x1xf32> to vector<8x32xf32>
    %85 = arith.subf %77, %84 : vector<8x32xf32>
    %86 = arith.mulf %85, %85 : vector<8x32xf32>
    %cst_48 = arith.constant dense<0.000000e+00> : vector<8xf32>
    %87 = vector.multi_reduction <add>, %86, %cst_48 [1] : vector<8x32xf32> to vector<8xf32>
    %88 = vector.shape_cast %87 : vector<8xf32> to vector<8x1xf32>
    %cst_49 = arith.constant 3.200000e+01 : f32
    %89 = vector.broadcast %cst_49 : f32 to vector<8x1xf32>
    %90 = arith.divf %88, %89 : vector<8x1xf32>
    %cst_50 = arith.constant 9.99999974E-6 : f32
    %91 = vector.broadcast %cst_50 : f32 to vector<8x1xf32>
    %92 = arith.addf %90, %91 : vector<8x1xf32>
    %93 = math.rsqrt %92 : vector<8x1xf32>
    %94 = vector.broadcast %83 : vector<8x1xf32> to vector<8x32xf32>
    %95 = arith.subf %77, %94 : vector<8x32xf32>
    %96 = vector.broadcast %93 : vector<8x1xf32> to vector<8x32xf32>
    %97 = arith.mulf %95, %96 : vector<8x32xf32>
    %98 = vector.broadcast %78 : vector<1x32xf32> to vector<8x32xf32>
    %99 = arith.mulf %98, %97 : vector<8x32xf32>
    %100 = vector.broadcast %79 : vector<1x32xf32> to vector<8x32xf32>
    %101 = arith.addf %99, %100 : vector<8x32xf32>
    %c0_51 = arith.constant 0 : index
    %c0_52 = arith.constant 0 : index
    %c0_53 = arith.constant 0 : index
    %102 = vector.load %arg16[%c0_51, %c0_52, %c0_53] : memref<1x8x32xf32, #tpu.memory_space<vmem>>, vector<1x8x32xf32>
    %103 = vector.shape_cast %102 : vector<1x8x32xf32> to vector<8x32xf32>
    %104 = vector.shape_cast %101 : vector<8x32xf32> to vector<1x8x32xf32>
    tpu.vector_store %arg16[%c0_51, %c0_52, %c0_53], %104 {strides = array<i32>} : memref<1x8x32xf32, #tpu.memory_space<vmem>>, vector<1x8x32xf32>,
    return
  }
  func.func @transform_0(%arg0: i32, %arg1: i32) -> (i32, i32, i32) {
    %c0_i32 = arith.constant 0 : i32
    %c0_i32_0 = arith.constant 0 : i32
    %c0_i32_1 = arith.constant 0 : i32
    return %arg0, %c0_i32, %c0_i32_0 : i32, i32, i32
  }
  func.func @transform_1(%arg0: i32, %arg1: i32) -> (i32, i32) {
    %c0_i32 = arith.constant 0 : i32
    %c0_i32_0 = arith.constant 0 : i32
    %c0_i32_1 = arith.constant 0 : i32
    return %c0_i32, %c0_i32_0 : i32, i32
  }
  func.func @transform_2(%arg0: i32, %arg1: i32) -> (i32, i32) {
    %c0_i32 = arith.constant 0 : i32
    %c0_i32_0 = arith.constant 0 : i32
    %c0_i32_1 = arith.constant 0 : i32
    return %c0_i32, %c0_i32_0 : i32, i32
  }
  func.func @transform_3(%arg0: i32, %arg1: i32) -> (i32, i32) {
    %c0_i32 = arith.constant 0 : i32
    %c0_i32_0 = arith.constant 0 : i32
    %c0_i32_1 = arith.constant 0 : i32
    return %c0_i32, %c0_i32_0 : i32, i32
  }
  func.func @transform_4(%arg0: i32, %arg1: i32) -> (i32, i32) {
    %c0_i32 = arith.constant 0 : i32
    %c0_i32_0 = arith.constant 0 : i32
    %c0_i32_1 = arith.constant 0 : i32
    return %c0_i32, %c0_i32_0 : i32, i32
  }
  func.func @transform_5(%arg0: i32, %arg1: i32) -> (i32, i32) {
    %c0_i32 = arith.constant 0 : i32
    %c0_i32_0 = arith.constant 0 : i32
    %c0_i32_1 = arith.constant 0 : i32
    return %c0_i32, %c0_i32_0 : i32, i32
  }
  func.func @transform_6(%arg0: i32, %arg1: i32) -> (i32, i32) {
    %c0_i32 = arith.constant 0 : i32
    %c0_i32_0 = arith.constant 0 : i32
    %c0_i32_1 = arith.constant 0 : i32
    return %c0_i32, %c0_i32_0 : i32, i32
  }
  func.func @transform_7(%arg0: i32, %arg1: i32) -> (i32, i32) {
    %c0_i32 = arith.constant 0 : i32
    %c0_i32_0 = arith.constant 0 : i32
    %c0_i32_1 = arith.constant 0 : i32
    return %c0_i32, %c0_i32_0 : i32, i32
  }
  func.func @transform_8(%arg0: i32, %arg1: i32) -> (i32, i32) {
    %c0_i32 = arith.constant 0 : i32
    %c0_i32_0 = arith.constant 0 : i32
    %c0_i32_1 = arith.constant 0 : i32
    return %c0_i32, %c0_i32_0 : i32, i32
  }
  func.func @transform_9(%arg0: i32, %arg1: i32) -> (i32, i32) {
    %c0_i32 = arith.constant 0 : i32
    %c0_i32_0 = arith.constant 0 : i32
    %c0_i32_1 = arith.constant 0 : i32
    return %c0_i32, %c0_i32_0 : i32, i32
  }
  func.func @transform_10(%arg0: i32, %arg1: i32) -> (i32, i32) {
    %c0_i32 = arith.constant 0 : i32
    %c0_i32_0 = arith.constant 0 : i32
    %c0_i32_1 = arith.constant 0 : i32
    return %c0_i32, %c0_i32_0 : i32, i32
  }
  func.func @transform_11(%arg0: i32, %arg1: i32) -> (i32, i32) {
    %c0_i32 = arith.constant 0 : i32
    %c0_i32_0 = arith.constant 0 : i32
    %c0_i32_1 = arith.constant 0 : i32
    return %c0_i32, %c0_i32_0 : i32, i32
  }
  func.func @transform_12(%arg0: i32, %arg1: i32) -> (i32, i32) {
    %c0_i32 = arith.constant 0 : i32
    %c0_i32_0 = arith.constant 0 : i32
    %c0_i32_1 = arith.constant 0 : i32
    return %c0_i32, %c0_i32_0 : i32, i32
  }
  func.func @transform_13(%arg0: i32, %arg1: i32) -> (i32, i32) {
    %c0_i32 = arith.constant 0 : i32
    %c0_i32_0 = arith.constant 0 : i32
    %c0_i32_1 = arith.constant 0 : i32
    return %c0_i32, %c0_i32_0 : i32, i32
  }
  func.func @transform_14(%arg0: i32, %arg1: i32) -> (i32, i32, i32) {
    %c0_i32 = arith.constant 0 : i32
    %c0_i32_0 = arith.constant 0 : i32
    return %arg0, %arg1, %c0_i32 : i32, i32, i32
  }
}

</mosaic_0001>

<bundles_post_ra>
// kernel: tpu_custom_call.1
= control target key start
LH: loop header
LB: loop body
LE: loop exit
PB: predicated region body
PF: predicated region fallthrough
CT: control target
= control target key end

     0   :  { %s5029_s0 = inlined_call_operand.hbm [shape: f32[2,8,32], index: 0, kind: input, shape index: {}]   ;;  %s5030_s1 = inlined_call_operand.vmem [shape: f32[32,32], index: 1, kind: input, shape index: {}]   ;;  %s5031_s2 = inlined_call_operand.vmem [shape: f32[32,32], index: 2, kind: input, shape index: {}]   ;;  %s5032_s3 = inlined_call_operand.vmem [shape: f32[32,32], index: 3, kind: input, shape index: {}]   ;;  %s5033_s4 = inlined_call_operand.hbm [shape: f32[32,32], index: 4, kind: input, shape index: {}]   ;;  %s5034_s5 = inlined_call_operand.vmem [shape: f32[1,32], index: 5, kind: input, shape index: {}]   ;;  %s5035_s6 = inlined_call_operand.hbm [shape: f32[32,64], index: 6, kind: input, shape index: {}]   ;;  %s5036_s7 = inlined_call_operand.vmem [shape: f32[1,64], index: 7, kind: input, shape index: {}]   ;;  %s5037_s8 = inlined_call_operand.vmem [shape: f32[64,32], index: 8, kind: input, shape index: {}]   ;;  %s5038_s9 = inlined_call_operand.vmem [shape: f32[1,32], index: 9, kind: input, shape index: {}]   ;;  %s5039_s10 = inlined_call_operand.vmem [shape: f32[1,32], index: 10, kind: input, shape index: {}]   ;;  %s5040_s11 = inlined_call_operand.vmem [shape: f32[1,32], index: 11, kind: input, shape index: {}]   ;;  %s5041_s12 = inlined_call_operand.vmem [shape: f32[1,32], index: 12, kind: input, shape index: {}]   ;;  %s5042_s13 = inlined_call_operand.vmem [shape: f32[1,32], index: 13, kind: input, shape index: {}]   ;;  %s5043_s14 = inlined_call_operand.hbm [shape: f32[2,8,32], index: 14, kind: output, shape index: {}]  }
   0x1   :  { %5052 = sst [smem:[#allocation17_spill]] %s5033_s4 }
   0x2   :  { %5053 = sst [smem:[#allocation18_spill]] %s5035_s6 }
   0x3   :  { %5054 = sst [smem:[#allocation19_spill]] %s5041_s12 }
   0x4   :  { %5055 = sst [smem:[#allocation20_spill]] %s5042_s13 }
   0x5   :  { %5056 = sst [smem:[#allocation21_spill]] %s5043_s14 }
   0x6   :  { %19 = vsyncpa [#allocation3], 0 }
   0x7   :  { %21 = vsyncpa [#allocation3 + $0x1], 0 }
   0x8   :  { %22 = vsyncpa [#allocation6], 0 }
   0x9   :  { %23 = vsyncpa [#allocation4], 0 }
   0xa   :  { %25 = vsyncpa [#allocation4 + $0x1], 0  ;;  %s4389_s29 = smov 0   ;;  %s4391_s30 = smov 0  }
   0xb   :  { %s4393_s15 = smov 0   ;;  %s4395_s16 = smov 0  }
   0xc   :  { %s4397_s17 = smov 0   ;;  %s4399_s18 = smov 0  }
   0xd LB: > { %5057 = sst [smem:[#allocation12_spill]] %s4268_s29  ;;  %s3678_s19 = sadd.s32 4294967295, %s4288_s18   ;;  %s4288_s18 = sphi %s4399_s18, %s31_s18   ;;  %s4284_s17 = sphi %s4397_s17, %s5083_s17   ;;  %s4280_s16 = sphi %s4395_s16, %s5082_s16   ;;  %s4276_s15 = sphi %s4393_s15, %s5086_s15   ;;  %s4272_s30 = sphi %s4391_s30, %s5085_s30   ;;  %s4268_s29 = sphi %s4389_s29, %s5084_s29  }
   0xe   : > { %5058 = sst [smem:[#allocation13_spill]] %s4280_s16  ;;  %s3679_s20 = sadd.s32 4294967294, %s4288_s18  }
   0xf   : > { %5059 = sst [smem:[#allocation14_spill]] %s4284_s17  ;;  %p63_p0 = scmp.ne.s32.totalorder %s4272_s30, %s4268_s29 }
  0x10   : > { %p4423_p1 = scmp.eq.s32.totalorder %s3678_s19, 0  ;;  %p4427_p2 = scmp.eq.s32.totalorder %s3678_s19, 1 }
  0x11   : > { %p368_p3 = scmp.eq.s32.totalorder %s3679_s20, 1  ;;  %p3680_p5 = scmp.ge.s32.totalorder %s4288_s18, 1 }
  0x12   : > { %s5060_s21 = scalar_select %p4423_p1, 1, 0 }
  0x13   : > { %p4433_p4 = por %p4423_p1, %p63_p0  ;;  %p4438_p6 = por %p368_p3, %p63_p0 }
  0x14   : > { %p375_p7 = scmp.lt.s32.totalorder %s4288_s18, 3  ;;  %s4290_s26 = smov [#allocation5]  }
  0x15   : > { %s5062_s23 = scalar_select %p4433_p4, 1, 0 }
  0x16   : > { %s5063_s24 = scalar_select %p4438_p6, 1, 0 }
  0x17   : > { %p4443_p8 = pnand %p3680_p5, %p375_p7  ;;  %s396_s27 = sshll.u32 %s4290_s26, 4  ;;  %s397_s27 = int_to_ptr.vmem [resolvable:$true] %s396_s27 }
  0x18   : > { %5064 = sst [smem:[#allocation15_spill]] %s5063_s24  ;;  %s4291_s19 = smov [#allocation7]  }
  0x19   : > { %p3996_p9 = pneg %p4443_p8  ;;  %s412_s20 = sshll.u32 %s4291_s19, 4  ;;  %s413_s20 = int_to_ptr.vmem [resolvable:$true] %s412_s20 }
  0x1a   : > { %s4135_s24 = scalar_lea.vmem %s397_s27, 512  ;;  %p4143_p5 = scmp.lt.s32.totalorder %s397_s27, %s397_s27 }
  0x1b   : > { %p4452_p11 = pnand %p3996_p9, %p4423_p1  ;;  %p4136_p13 = scmp.ne.s32.totalorder %s397_s27, %s4135_s24 }
  0x1c   : > { %p4144_p7 = scmp.lt.s32.totalorder %s4135_s24, %s4135_s24 }
  0x1d   : > { %p4126_p12 = pneg %p4452_p11 }
  0x1e   : > { %p4145_p10 = por %p4144_p7, %p4143_p5 }
  0x1f   : > { %p4138_p0 = pnand %p4136_p13, %p4126_p12 }
  0x21   : > { %p4139_p3 = pneg %p4138_p0 }
  0x23   : > { %p4146_p9 = pnand %p4145_p10, %p4139_p3 }
  0x25   : > { %4149 = shalt.err (!%p4146_p9)
}
  0x26   : > { %s4292_s26 = smov 128   ;;  %s4293_s29 = smov 8  }
  0x27   : > { %s5067_s4 = sld [smem:[#allocation17_spill]]  ;;  %s4161_s13 = scalar_lea.vmem %s413_s20, 512 }
  0x28   : > { %p4162_p6 = scmp.ne.s32.totalorder %s413_s20, %s4161_s13  ;;  %p4169_p1 = scmp.lt.s32.totalorder %s413_s20, %s413_s20 }
  0x29   : > { %p4170_p4 = scmp.lt.s32.totalorder %s4161_s13, %s4161_s13 }
  0x2a   : > { %p4164_p13 = pnand %p4162_p6, %p4126_p12 }
  0x2b   : > { %p4171_p5 = por %p4170_p4, %p4169_p1 }
  0x2c   : > { %p4165_p0 = pneg %p4164_p13 }
  0x2d   : > { %3999 = dma.hbm_to_vmem [thread:$0]  (!%p4452_p11), %s5067_s4, 512, %s397_s27, [#allocation6], %s4292_s26, %s4292_s26, %s4293_s29  }
  0x2e   : > { %p4172_p10 = pnand %p4171_p5, %p4165_p0 }
  0x30   : > { %4175 = shalt.err (!%p4172_p10)
}
  0x31   : > { %s5068_s6 = sld [smem:[#allocation18_spill]]  ;;  %s43_s13 = sadd.s32 1, %s4284_s17 }
  0x32   : > { %s50_s14 = sadd.s32 1, %s4276_s15  ;;  %p45_p1 = scmp.ge.s32.totalorder %s43_s13, 2 }
  0x33   : > { %p57_p4 = scmp.ne.s32.totalorder %s4276_s15, %s4272_s30  ;;  %p58_p6 = scmp.eq.s32.totalorder %s4288_s18, 0 }
  0x34   : > { %p4013_p12 = scmp.lt.s32.totalorder %s4288_s18, 2  ;;  %s5088_s13 = smov (%p45_p1, %s43_s13), 0 }
  0x35   : > { %5069 = sst [smem:[#allocation16_spill]] %s5088_s13  ;;  %p59_p3 = por %p58_p6, %p57_p4 }
  0x36   : > { %p4484_p7 = por %p4427_p2, %p57_p4  ;;  %s47_s27 = ssub.s32 %s4284_s17, %s5088_s13 }
  0x37   : > { %4002 = dma.hbm_to_vmem [thread:$0]  (!%p4452_p11), %s5068_s6, 512, %s413_s20, [#allocation6], %s4292_s26, %s4292_s26, %s4293_s29  }
  0x38   : > { %s447_s28 = sand.u32 1, %s4276_s15   ;;  %p48_p9 = scmp.eq.s32.totalorder %s47_s27, 0 }
  0x39   : > { %s3684_s29 = sshll.u32 %s447_s28, 3  ;;  %s3685_s20 = sshll.u32 %s4284_s17, 7 }
  0x3a   : > { %s4493_s26 = scalar_select %p48_p9, %s4276_s15, %s50_s14  }
  0x3b   : > { %s456_s4 = scalar_lea.hbm %s5029_s0, %s3685_s20  ;;  %s451_s6 = scalar_lea.vmem [#allocation2], %s3684_s29 }
  0x3c   : > { %s458_s16 = sshll.u32 %s451_s6, 4  ;;  %p4500_p11 = pnand %p4013_p12, %p59_p3  ;;  %s459_s16 = int_to_ptr.vmem [resolvable:$true] %s458_s16 }
  0x3d   : > { %s448_s13 = scalar_lea.sflag [#allocation3], %s447_s28  ;;  %s4189_s27 = scalar_lea.vmem %s459_s16, 128 }
  0x3e   : > { %p4178_p2 = pneg %p4500_p11  ;;  %p4190_p13 = scmp.ne.s32.totalorder %s459_s16, %s4189_s27 }
  0x3f   : > { %s4294_s14 = smov [#allocation2]  }
  0x40   : > { %p4192_p0 = pnand %p4190_p13, %p4178_p2  ;;  %s4194_s17 = sshll.u32 %s4294_s14, 4  ;;  %s4195_s17 = int_to_ptr.vmem [resolvable:$false] %s4194_s17 }
  0x41   : > { %s4196_s20 = scalar_lea.vmem %s4195_s17, 256  ;;  %p4197_p10 = scmp.lt.s32.totalorder %s459_s16, %s4195_s17 }
  0x42   : > { %p4193_p5 = pneg %p4192_p0  ;;  %p4198_p1 = scmp.lt.s32.totalorder %s4196_s20, %s4189_s27 }
  0x44   : > { %p4199_p4 = por %p4198_p1, %p4197_p10 }
  0x46   : > { %p4200_p6 = pnand %p4199_p4, %p4193_p5 }
  0x48   : > { %4203 = shalt.err (!%p4200_p6)
}
  0x49   : > { %4006 = dma.hbm_to_vmem [thread:$0]  (!%p4500_p11), %s456_s4, 128, %s459_s16, %s448_s13  }
  0x4a   : > { %467 = sbr.rel (%p4443_p8) target bundleno = 2523 (0x9db), region = 76  ;;  %s4511_s6 = sand.u32 (!%p4443_p8), 1, %s4272_s30  }
  0x4b   : > { %s3687_s28 = sshll.u32 (!%p4443_p8), %s4511_s6, 3  ;;  %s470_s29 = scalar_lea.sflag (!%p4443_p8), [#allocation3], %s4511_s6 }
  0x4c   : > { %s4517_s17 = scalar_lea.vmem (!%p4443_p8), [#allocation2], %s3687_s28  ;;  %p5072_p12 = scmp.ne.s32.totalorder (!%p4443_p8), %s5062_s23, 0 }
  0x4f   : > { %4255 = dma.done.wait (%p5072_p12), %s470_s29, 128  }
  0x50   : > { %4257 = vsyncadd (%p5072_p12), %s470_s29, 4294967168  ;;  %p5073_p3 = scmp.ne.s32.totalorder %s5060_s21, 0 }
  0x52   : > { %4259 = dma.done.wait (%p5073_p3), [#allocation6], 1024  }
  0x53   : > { %4261 = vsyncadd (%p5073_p3), [#allocation6], 4294966272  ;;  %v4295_v0 = vmov 0.0   ;;  %vm4296_vm0 = vmmov 0   ;;  %v533_v1 = vld [vmem:[%s5030_s1 + $0x18] sm:$0xff]  ;;  %v532_v2 = vld [vmem:[%s5030_s1 + $0x10] sm:$0xff]  ;;  %v786_v22 = vlaneseq }
  0x54   : > { %3830 = vmatprep.subr.mxu1 %v4295_v0  ;;  %3838 = vmatprep.mubr.msk.f32.mxu1 %vm4296_vm0, %v4295_v0  ;;  %v531_v3 = vld [vmem:[%s5030_s1 + $0x8] sm:$0xff]  ;;  %v688_v4 = vld [vmem:[%s5032_s3 + $0x18] sm:$0xff]  ;;  %v687_v5 = vld [vmem:[%s5032_s3 + $0x10] sm:$0xff]  ;;  %vm534_vm1 = vcmask 261120   ;;  %s4297_s20 = smov 120   ;;  %s4298_s29 = smov 124  }
  0x55   : > { %3852 = vmatprep.subr.mxu0 %v4295_v0  ;;  %3860 = vmatprep.mubr.msk.f32.mxu0 %vm4296_vm0, %v4295_v0  ;;  %v530_v6 = vld [vmem:[%s5030_s1] sm:$0xff]  ;;  %v611_v8 = vld [vmem:[%s5031_s2 + $0x18] sm:$0xff]  ;;  %v686_v9 = vld [vmem:[%s5032_s3 + $0x8] sm:$0xff]  ;;  %s4299_s4 = smov 116   ;;  %s4300_s16 = smov 108   ;;  %v787_v26 = vshrl.u32 %v786_v22, 7 }
  0x56   : > { %3831 = vmatpush3.msra.mxu1 %v533_v1  ;;  %3853 = vmatpush3.msra.mxu0 %v688_v4  ;;  %v529_v7 = vld [vmem:[%s4517_s17] sm:$0xff]  ;;  %v610_v10 = vld [vmem:[%s5031_s2 + $0x10] sm:$0xff]  ;;  %s4301_s23 = smov 112   ;;  %s4302_s21 = smov 100   ;;  %v4304_v20 = vmov 1983009808  }
  0x57   : > { %3832 = vmatprep.subr.mxu1 %v4295_v0  ;;  %3854 = vmatprep.subr.mxu0 %v4295_v0  ;;  %v685_v11 = vld [vmem:[%s5032_s3] sm:$0xff]  ;;  %v609_v12 = vld [vmem:[%s5031_s2 + $0x8] sm:$0xff]  ;;  %s4303_s25 = smov 104   ;;  %v784_v21 = vunpack.c.l.s4 %v4304_v20  ;;  %v4305_v23 = vmov 1934713408   ;;  %vm1641_vm2 = vcmask 31744  }
  0x58   : > { %3833 = vmatpush3.msra.mxu1 %v532_v2  ;;  %3855 = vmatpush3.msra.mxu0 %v687_v5  ;;  %v608_v13 = vld [vmem:[%s5031_s2] sm:$0xff]  ;;  %v848_v24 = vunpack.c.l.s4 %v4305_v23  ;;  %vm2258_vm3 = vcmask 64512   ;;  %s4306_s13 = smov 8   ;;  %s4307_s19 = smov 4   ;;  %vm3233_vm4 = vcmask 97280   ;;  %vm3235_vm5 = vcmask 130048  }
  0x59   : > { %3834 = vmatprep.subr.mxu1 %v4295_v0  ;;  %3856 = vmatprep.subr.mxu0 %v4295_v0  ;;  %v785_v25 = vunpack.c.0.s8 %v784_v21  ;;  %s4308_s24 = smov 12   ;;  %s4309_s22 = smov 20   ;;  %vm3237_vm6 = vcmask 162816   ;;  %vm3239_vm7 = vcmask 195584   ;;  %vm3241_vm8 = vcmask 228352  }
  0x5a   : > { %3835 = vmatpush3.msra.mxu1 %v531_v3  ;;  %3857 = vmatpush3.msra.mxu0 %v686_v9  ;;  %v849_v29 = vunpack.c.0.s8 %v848_v24  ;;  %s4310_s27 = smov 16   ;;  %s4311_s14 = smov 28   ;;  %vm3458_vm9 = vcmask 523264  }
  0x5b   : > { %3836 = vmatprep.subr.mxu1 %v4295_v0  ;;  %3858 = vmatprep.subr.mxu0 %v4295_v0  ;;  %v4613_v30 = vsub.s32 %v785_v25, %v787_v26 }
  0x5c   : > { %3837 = vmatpush3.msra.mxu1 %v530_v6  ;;  %3859 = vmatpush3.msra.mxu0 %v685_v11  ;;  %v4615_v36 = vsub.s32 %v849_v29, %v787_v26 }
  0x5d   : > { %3839 = vmatmul.mubr.msk.f32.vlgmr.msra.gmra.mxu1 %vm534_vm1, %v529_v7  ;;  %3841 = vmatprep.subr.mxu1 %v4295_v0 }
  0x5e   : > { %3842 = vmatpush3.msra.mxu1 %v611_v8  ;;  %3849 = vmatprep.mubr.msk.f32.mxu1 %vm4296_vm0, %v4295_v0 }
  0x5f   : > { %3843 = vmatprep.subr.mxu1 %v4295_v0  ;;  %3861 = vmatmul.mubr.msk.f32.vlgmr.msra.gmra.mxu0 %vm534_vm1, %v529_v7 }
  0x60   : > { %3844 = vmatpush3.msra.mxu1 %v610_v10  ;;  %3873 = vmatprep.subr.mxu0 %v4295_v0 }
  0x61   : > { %3845 = vmatprep.subr.mxu1 %v4295_v0  ;;  %3875 = vmatprep.mubr.msk.f32.mxu0 %vm4296_vm0, %v4295_v0 }
  0x62   : > { %3846 = vmatpush3.msra.mxu1 %v609_v12 }
  0x63   : > { %3847 = vmatprep.subr.mxu1 %v4295_v0 }
  0x64   : > { %3848 = vmatpush3.msra.mxu1 %v608_v13 }
  0x65   : > { %3850 = vmatmul.mubr.msk.f32.vlgmr.msra.gmra.mxu1 %vm534_vm1, %v529_v7  ;;  %3863 = vmatprep.subr.mxu1 %v4295_v0 }
  0x66   : > { %3865 = vmatprep.mubr.msk.f32.mxu1 %vm4296_vm0, %v4295_v0 }
 0x11d   : > { %v604_v14 = vpop.f32.mrf.mxu1 }
 0x11e   : > { %763 = vrot.lane.b32.xlu0 %v604_v14, %s4297_s20  ;;  %760 = vrot.lane.b32.xlu1 %v604_v14, %s4298_s29 }
 0x11f   : > { %v3840_v15 = vpop.f32.mrf.mxu1  ;;  %v4608_v18 = vpop.f32.mrf.mxu0 }
 0x121   : > { %v3862_v19 = vpop.f32.mrf.mxu0 }
 0x122   : > { %766 = vrot.lane.b32.xlu1 %v604_v14, %s4299_s4 }
 0x125   : > { %v4591_v16 = vpop.f32.mrf.mxu1 }
 0x126   : > { %1060 = vrot.lane.b32.xlu1 %v4591_v16, %s4299_s4  ;;  %1054 = vrot.lane.b32.xlu0 %v4591_v16, %s4298_s29 }
 0x127   : > { %v3851_v17 = vpop.f32.mrf.mxu1 }
 0x12a   : > { %772 = vrot.lane.b32.xlu1 %v604_v14, %s4300_s16  ;;  %1057 = vrot.lane.b32.xlu0 %v4591_v16, %s4297_s20 }
 0x12e   : > { %1066 = vrot.lane.b32.xlu1 %v4591_v16, %s4300_s16  ;;  %769 = vrot.lane.b32.xlu0 %v604_v14, %s4301_s23 }
 0x132   : > { %1072 = vrot.lane.b32.xlu1 %v4591_v16, %s4302_s21  ;;  %1063 = vrot.lane.b32.xlu0 %v4591_v16, %s4301_s23 }
 0x136   : > { %778 = vrot.lane.b32.xlu1 %v604_v14, %s4302_s21  ;;  %1069 = vrot.lane.b32.xlu0 %v4591_v16, %s4303_s25 }
 0x13a   : > { %775 = vrot.lane.b32.xlu0 %v604_v14, %s4303_s25  ;;  %1348 = vrot.lane.b32.xlu1 %v4608_v18, %s4298_s29 }
 0x13e   : > { %1351 = vrot.lane.b32.xlu0 %v4608_v18, %s4297_s20  ;;  %1354 = vrot.lane.b32.xlu1 %v4608_v18, %s4299_s4  ;;  %s4312_s20 = smov 24   ;;  %s5075_s4 = sld [smem:[#allocation19_spill]] }
 0x190   : > { %v764_v27 = vpop.permute.xlu0 %763  ;;  %v761_v28 = vpop.permute.xlu1 %760 }
 0x191   : > { %v781_v31 = vcombine.low %v604_v14, %v764_v27  ;;  %v782_v32 = vcombine.high %v604_v14, %v764_v27 }
 0x193   : > { %v789_v37 = vrot.slane %v781_v31, %v4613_v30  ;;  %v796_v38 = vrot.slane %v782_v32, %v4613_v30 }
 0x194   : > { %v767_v33 = vpop.permute.xlu1 %766 }
 0x195   : > { %v797_v34 = vcombine.low %v761_v28, %v767_v33  ;;  %v798_v35 = vcombine.high %v761_v28, %v767_v33 }
 0x197   : > { %v805_v39 = vrot.slane %v797_v34, %v4613_v30  ;;  %v812_v40 = vrot.slane %v798_v35, %v4613_v30 }
 0x198   : > { %v1061_v41 = vpop.permute.xlu1 %1060  ;;  %v1055_v42 = vpop.permute.xlu0 %1054 }
 0x199   : > { %v845_v43 = vcombine.low %v789_v37, %v805_v39  ;;  %v846_v44 = vcombine.high %v789_v37, %v805_v39  ;;  %v861_v45 = vcombine.low %v796_v38, %v812_v40  ;;  %v862_v46 = vcombine.high %v796_v38, %v812_v40 }
 0x19a   : > { %v1091_v51 = vcombine.low %v1055_v42, %v1061_v41  ;;  %v1092_v52 = vcombine.high %v1055_v42, %v1061_v41 }
 0x19b   : > { %v853_v47 = vrot.slane %v845_v43, %v4615_v36  ;;  %v860_v48 = vrot.slane %v846_v44, %v4615_v36  ;;  %v869_v49 = vrot.slane %v861_v45, %v4615_v36  ;;  %v876_v50 = vrot.slane %v862_v46, %v4615_v36 }
 0x19c   : > { %v4625_v53 = vpop.permute.xlu1 %772  ;;  %v1058_v54 = vpop.permute.xlu0 %1057  ;;  %v1099_v2 = vrot.slane %v1091_v51, %v4613_v30  ;;  %v1106_v3 = vrot.slane %v1092_v52, %v4613_v30 }
 0x19d   : > { %v3694_v55 = vcombine.low %v853_v47, %v860_v48  ;;  %v3696_v56 = vcombine.high %v853_v47, %v860_v48  ;;  %v3698_v57 = vcombine.low %v869_v49, %v876_v50  ;;  %v3700_v58 = vcombine.high %v869_v49, %v876_v50 }
 0x19e   : > { %v1075_v59 = vcombine.low %v4591_v16, %v1058_v54  ;;  %v1076_v60 = vcombine.high %v4591_v16, %v1058_v54 }
 0x19f   : > { %v925_v61 = vrot.slane %v3694_v55, %v4613_v30  ;;  %v941_v62 = vrot.slane %v3696_v56, %v4613_v30  ;;  %v957_v63 = vrot.slane %v3698_v57, %v4613_v30  ;;  %v973_v1 = vrot.slane %v3700_v58, %v4613_v30 }
 0x1a0   : > { %v1083_v4 = vrot.slane %v1075_v59, %v4613_v30  ;;  %v1090_v5 = vrot.slane %v1076_v60, %v4613_v30  ;;  %v1067_v6 = vpop.permute.xlu1 %1066  ;;  %v4637_v7 = vpop.permute.xlu0 %769 }
 0x1a1   : > { %v981_v8 = vcombine.low %v925_v61, %v941_v62  ;;  %v982_v9 = vcombine.high %v925_v61, %v941_v62  ;;  %v1013_v10 = vcombine.low %v957_v63, %v973_v1  ;;  %v1014_v11 = vcombine.high %v957_v63, %v973_v1 }
 0x1a2   : > { %v1139_v12 = vcombine.low %v1083_v4, %v1099_v2  ;;  %v1140_v13 = vcombine.high %v1083_v4, %v1099_v2  ;;  %v1155_v14 = vcombine.low %v1090_v5, %v1106_v3  ;;  %v1156_v15 = vcombine.high %v1090_v5, %v1106_v3 }
 0x1a3   : > { %v4640_v16 = vrot.slane %v981_v8, %v4615_v36  ;;  %v4643_v17 = vrot.slane %v1013_v10, %v4615_v36  ;;  %v4646_v19 = vrot.slane %v982_v9, %v4615_v36  ;;  %v4649_v20 = vrot.slane %v1014_v11, %v4615_v36 }
 0x1a4   : > { %v1147_v21 = vrot.slane %v1139_v12, %v4615_v36  ;;  %v1154_v22 = vrot.slane %v1140_v13, %v4615_v36  ;;  %v1163_v23 = vrot.slane %v1155_v14, %v4615_v36  ;;  %v1170_v24 = vrot.slane %v1156_v15, %v4615_v36  ;;  %v1073_v25 = vpop.permute.xlu1 %1072  ;;  %v1064_v26 = vpop.permute.xlu0 %1063 }
 0x1a5   : > { %v1123_v27 = vcombine.low %v1067_v6, %v1073_v25  ;;  %v1124_v28 = vcombine.high %v1067_v6, %v1073_v25  ;;  %v1045_v29 = vcombine.low %v4640_v16, %v4643_v17  ;;  %v1047_v38 = vcombine.low %v4646_v19, %v4649_v20 }
 0x1a6   : > { %v3702_v31 = vcombine.low %v1147_v21, %v1154_v22  ;;  %v3704_v32 = vcombine.high %v1147_v21, %v1154_v22  ;;  %v3706_v33 = vcombine.low %v1163_v23, %v1170_v24  ;;  %v3708_v34 = vcombine.high %v1163_v23, %v1170_v24 }
 0x1a7   : > { %v1131_v35 = vrot.slane %v1123_v27, %v4613_v30  ;;  %v1138_v37 = vrot.slane %v1124_v28, %v4613_v30  ;;  %v1046_v39 = vcombine.high %v4640_v16, %v4643_v17 }
 0x1a8   : > { %v1219_v40 = vrot.slane %v3702_v31, %v4613_v30  ;;  %v1235_v41 = vrot.slane %v3704_v32, %v4613_v30  ;;  %v1251_v42 = vrot.slane %v3706_v33, %v4613_v30  ;;  %v1267_v43 = vrot.slane %v3708_v34, %v4613_v30  ;;  %v779_v44 = vpop.permute.xlu1 %778  ;;  %v1070_v45 = vpop.permute.xlu0 %1069 }
 0x1a9   : > { %v829_v46 = vcombine.low %v4625_v53, %v779_v44  ;;  %v830_v47 = vcombine.high %v4625_v53, %v779_v44  ;;  %v1107_v48 = vcombine.low %v1064_v26, %v1070_v45  ;;  %v1108_v49 = vcombine.high %v1064_v26, %v1070_v45 }
 0x1aa   : > { %v1275_v50 = vcombine.low %v1219_v40, %v1235_v41  ;;  %v1276_v51 = vcombine.high %v1219_v40, %v1235_v41  ;;  %v1307_v52 = vcombine.low %v1251_v42, %v1267_v43  ;;  %v1308_v54 = vcombine.high %v1251_v42, %v1267_v43 }
 0x1ab   : > { %v837_v55 = vrot.slane %v829_v46, %v4613_v30  ;;  %v844_v56 = vrot.slane %v830_v47, %v4613_v30  ;;  %v1115_v57 = vrot.slane %v1107_v48, %v4613_v30  ;;  %v1122_v58 = vrot.slane %v1108_v49, %v4613_v30 }
 0x1ac   : > { %v776_v59 = vpop.permute.xlu0 %775  ;;  %v1283_v60 = vrot.slane %v1275_v50, %v4615_v36  ;;  %v1315_v61 = vrot.slane %v1307_v52, %v4615_v36  ;;  %v1290_v53 = vrot.slane %v1276_v51, %v4615_v36  ;;  %v1322_v62 = vrot.slane %v1308_v54, %v4615_v36  ;;  %v1349_v50 = vpop.permute.xlu1 %1348 }
 0x1ad   : > { %v1171_v63 = vcombine.low %v1115_v57, %v1131_v35  ;;  %v1172_v1 = vcombine.high %v1115_v57, %v1131_v35  ;;  %v1187_v2 = vcombine.low %v1122_v58, %v1138_v37  ;;  %v1188_v3 = vcombine.high %v1122_v58, %v1138_v37 }
 0x1ae   : > { %v813_v4 = vcombine.low %v4637_v7, %v776_v59  ;;  %v814_v5 = vcombine.high %v4637_v7, %v776_v59  ;;  %v1339_v6 = vcombine.low %v1283_v60, %v1315_v61  ;;  %v1341_v8 = vcombine.low %v1290_v53, %v1322_v62 }
 0x1af   : > { %v1179_v9 = vrot.slane %v1171_v63, %v4615_v36  ;;  %v1186_v10 = vrot.slane %v1172_v1, %v4615_v36  ;;  %v1195_v11 = vrot.slane %v1187_v2, %v4615_v36  ;;  %v1202_v12 = vrot.slane %v1188_v3, %v4615_v36 }
 0x1b0   : > { %v821_v13 = vrot.slane %v813_v4, %v4613_v30  ;;  %v828_v14 = vrot.slane %v814_v5, %v4613_v30  ;;  %3864 = vmatpush3.xpose.msk.msra.mxu1 %vm1641_vm2, %v1339_v6  ;;  %3874 = vmatpush3.xpose.msk.msra.mxu0 %vm1641_vm2, %v1341_v8  ;;  %v1340_v15 = vcombine.high %v1283_v60, %v1315_v61 }
 0x1b1   : > { %v3703_v7 = vcombine.low %v1179_v9, %v1186_v10  ;;  %v3705_v21 = vcombine.high %v1179_v9, %v1186_v10  ;;  %v3707_v22 = vcombine.low %v1195_v11, %v1202_v12  ;;  %v3709_v23 = vcombine.high %v1195_v11, %v1202_v12  ;;  %3868 = vmatprep.subr.mxu1 %v4295_v0 }
 0x1b2   : > { %v877_v24 = vcombine.low %v821_v13, %v837_v55  ;;  %v878_v25 = vcombine.high %v821_v13, %v837_v55  ;;  %v893_v26 = vcombine.low %v828_v14, %v844_v56  ;;  %v894_v27 = vcombine.high %v828_v14, %v844_v56  ;;  %3883 = vmatprep.subr.mxu0 %v4295_v0  ;;  %v1352_v56 = vpop.permute.xlu0 %1351 }
 0x1b3   : > { %v1226_v28 = vrot.slane %v3703_v7, %v4613_v30  ;;  %v1242_v31 = vrot.slane %v3705_v21, %v4613_v30  ;;  %v1258_v32 = vrot.slane %v3707_v22, %v4613_v30  ;;  %v1274_v33 = vrot.slane %v3709_v23, %v4613_v30  ;;  %3866 = vmatmul.mubr.msk.f32.vlgmr.msra.gmra.mxu1 %vm1641_vm2, %v1045_v29 }
 0x1b4   : > { %v885_v34 = vrot.slane %v877_v24, %v4615_v36  ;;  %v892_v35 = vrot.slane %v878_v25, %v4615_v36  ;;  %v901_v37 = vrot.slane %v893_v26, %v4615_v36  ;;  %v908_v40 = vrot.slane %v894_v27, %v4615_v36  ;;  %3876 = vmatmul.mubr.msk.f32.vlgmr.msra.gmra.mxu0 %vm1641_vm2, %v1047_v38 }
 0x1b5   : > { %v1291_v41 = vcombine.low %v1226_v28, %v1242_v31  ;;  %v1292_v42 = vcombine.high %v1226_v28, %v1242_v31  ;;  %v1323_v43 = vcombine.low %v1258_v32, %v1274_v33  ;;  %v1324_v44 = vcombine.high %v1258_v32, %v1274_v33  ;;  %3869 = vmatpush3.xpose.msk.msra.mxu1 %vm1641_vm2, %v1340_v15 }
 0x1b6   : > { %v3695_v45 = vcombine.low %v885_v34, %v892_v35  ;;  %v3697_v46 = vcombine.high %v885_v34, %v892_v35  ;;  %v3699_v47 = vcombine.low %v901_v37, %v908_v40  ;;  %v3701_v29 = vcombine.high %v901_v37, %v908_v40  ;;  %3870 = vmatprep.mubr.msk.f32.mxu1 %vm4296_vm0, %v4295_v0 }
 0x1b7   : > { %3878 = vmatprep.subr.mxu1 %v4295_v0  ;;  %v1342_v48 = vcombine.high %v1290_v53, %v1322_v62  ;;  %v1299_v49 = vrot.slane %v1291_v41, %v4615_v36  ;;  %v1331_v38 = vrot.slane %v1323_v43, %v4615_v36  ;;  %3885 = vmatprep.mubr.msk.f32.mxu0 %vm4296_vm0, %v4295_v0 }
 0x1b8   : > { %v932_v51 = vrot.slane %v3695_v45, %v4613_v30  ;;  %v948_v52 = vrot.slane %v3697_v46, %v4613_v30  ;;  %v964_v54 = vrot.slane %v3699_v47, %v4613_v30  ;;  %v980_v55 = vrot.slane %v3701_v29, %v4613_v30  ;;  %3871 = vmatmul.mubr.msk.f32.vlgmr.msra.gmra.mxu1 %vm1641_vm2, %v1046_v39  ;;  %v1355_v39 = vpop.permute.xlu1 %1354 }
 0x1b9   : > { %3879 = vmatpush3.xpose.msk.msra.mxu1 %vm1641_vm2, %v1342_v48  ;;  %3880 = vmatprep.mubr.msk.f32.mxu1 %vm4296_vm0, %v4295_v0  ;;  %v1048_v57 = vcombine.high %v4646_v19, %v4649_v20  ;;  %v1343_v58 = vcombine.low %v1299_v49, %v1331_v38  ;;  %v1344_v59 = vcombine.high %v1299_v49, %v1331_v38 }
 0x1ba   : > { %v997_v60 = vcombine.low %v932_v51, %v948_v52  ;;  %v998_v61 = vcombine.high %v932_v51, %v948_v52  ;;  %v1029_v53 = vcombine.low %v964_v54, %v980_v55  ;;  %v1030_v62 = vcombine.high %v964_v54, %v980_v55  ;;  %3888 = vmatprep.subr.mxu1 %v4295_v0 }
 0x1bb   : > { %3884 = vmatpush3.xpose.msk.msra.mxu0 %vm1641_vm2, %v1343_v58  ;;  %v1306_v16 = vrot.slane %v1292_v42, %v4615_v36  ;;  %v1338_v17 = vrot.slane %v1324_v44, %v4615_v36  ;;  %v1369_v63 = vcombine.low %v4608_v18, %v1352_v56  ;;  %v1370_v1 = vcombine.high %v4608_v18, %v1352_v56 }
 0x1bc   : > { %3881 = vmatmul.mubr.msk.f32.vlgmr.msra.gmra.mxu1 %vm1641_vm2, %v1048_v57  ;;  %3893 = vmatprep.subr.mxu0 %v4295_v0  ;;  %v1005_v19 = vrot.slane %v997_v60, %v4615_v36  ;;  %v1037_v20 = vrot.slane %v1029_v53, %v4615_v36  ;;  %v1012_v2 = vrot.slane %v998_v61, %v4615_v36 }
 0x1bd   : > { %3889 = vmatpush3.xpose.msk.msra.mxu1 %vm1641_vm2, %v1344_v59  ;;  %3890 = vmatprep.mubr.msk.f32.mxu1 %vm4296_vm0, %v4295_v0  ;;  %v1044_v3 = vrot.slane %v1030_v62, %v4615_v36  ;;  %v1385_v6 = vcombine.low %v1349_v50, %v1355_v39  ;;  %v1386_v8 = vcombine.high %v1349_v50, %v1355_v39 }
 0x1be   : > { %3898 = vmatprep.subr.mxu1 %v4295_v0  ;;  %v1049_v4 = vcombine.low %v1005_v19, %v1037_v20  ;;  %v1050_v5 = vcombine.high %v1005_v19, %v1037_v20  ;;  %v1345_v9 = vcombine.low %v1306_v16, %v1338_v17  ;;  %v1346_v10 = vcombine.high %v1306_v16, %v1338_v17 }
 0x1bf   : > { %v1377_v11 = vrot.slane %v1369_v63, %v4613_v30  ;;  %v1384_v12 = vrot.slane %v1370_v1, %v4613_v30  ;;  %v1393_v13 = vrot.slane %v1385_v6, %v4613_v30  ;;  %v1400_v14 = vrot.slane %v1386_v8, %v4613_v30 }
 0x1c0   : > { %3886 = vmatmul.mubr.msk.f32.vlgmr.msra.gmra.mxu0 %vm1641_vm2, %v1049_v4  ;;  %3891 = vmatmul.mubr.msk.f32.vlgmr.msra.gmra.mxu1 %vm1641_vm2, %v1050_v5  ;;  %v1051_v15 = vcombine.low %v1012_v2, %v1044_v3  ;;  %v1052_v7 = vcombine.high %v1012_v2, %v1044_v3 }
 0x1c1   : > { %3894 = vmatpush3.xpose.msk.msra.mxu0 %vm1641_vm2, %v1345_v9  ;;  %3899 = vmatpush3.xpose.msk.msra.mxu1 %vm1641_vm2, %v1346_v10  ;;  %v1433_v21 = vcombine.low %v1377_v11, %v1393_v13  ;;  %v1434_v22 = vcombine.high %v1377_v11, %v1393_v13  ;;  %v1449_v23 = vcombine.low %v1384_v12, %v1400_v14 }
 0x1c2   : > { %3895 = vmatprep.mubr.msk.f32.mxu0 %vm4296_vm0, %v4295_v0  ;;  %3900 = vmatprep.mubr.msk.f32.mxu1 %vm4296_vm0, %v4295_v0  ;;  %v1450_v24 = vcombine.high %v1384_v12, %v1400_v14 }
 0x1c3   : > { %3903 = vmatprep.subr.mxu0 %v4295_v0  ;;  %3908 = vmatprep.subr.mxu1 %v4295_v0  ;;  %v1441_v25 = vrot.slane %v1433_v21, %v4615_v36  ;;  %v1448_v26 = vrot.slane %v1434_v22, %v4615_v36  ;;  %v1457_v27 = vrot.slane %v1449_v23, %v4615_v36 }
 0x1c4   : > { %3896 = vmatmul.mubr.msk.f32.vlgmr.msra.gmra.mxu0 %vm1641_vm2, %v1051_v15  ;;  %3901 = vmatmul.mubr.msk.f32.vlgmr.msra.gmra.mxu1 %vm1641_vm2, %v1052_v7  ;;  %v1464_v28 = vrot.slane %v1450_v24, %v4615_v36 }
 0x1c5   : > { %3905 = vmatprep.mubr.msk.f32.mxu0 %vm4296_vm0, %v4295_v0  ;;  %3910 = vmatprep.mubr.msk.f32.mxu1 %vm4296_vm0, %v4295_v0  ;;  %v3710_v31 = vcombine.low %v1441_v25, %v1448_v26  ;;  %v3712_v32 = vcombine.high %v1441_v25, %v1448_v26 }
 0x1c6   : > { %v3714_v33 = vcombine.low %v1457_v27, %v1464_v28  ;;  %v3716_v34 = vcombine.high %v1457_v27, %v1464_v28 }
 0x1c7   : > { %v1513_v35 = vrot.slane %v3710_v31, %v4613_v30  ;;  %v1529_v37 = vrot.slane %v3712_v32, %v4613_v30 }
 0x1c8   : > { %v1545_v40 = vrot.slane %v3714_v33, %v4613_v30  ;;  %v1561_v41 = vrot.slane %v3716_v34, %v4613_v30 }
 0x1c9   : > { %v1569_v42 = vcombine.low %v1513_v35, %v1529_v37  ;;  %v1570_v29 = vcombine.high %v1513_v35, %v1529_v37 }
 0x1ca   : > { %v1601_v43 = vcombine.low %v1545_v40, %v1561_v41  ;;  %v1602_v48 = vcombine.high %v1545_v40, %v1561_v41 }
 0x1cb   : > { %v1577_v44 = vrot.slane %v1569_v42, %v4615_v36  ;;  %v4772_v49 = vrot.slane %v1570_v29, %v4615_v36 }
 0x1cc   : > { %v1609_v45 = vrot.slane %v1601_v43, %v4615_v36  ;;  %v4775_v38 = vrot.slane %v1602_v48, %v4615_v36 }
 0x1ce   : > { %v1633_v46 = vcombine.low %v1577_v44, %v1609_v45  ;;  %v1634_v47 = vcombine.high %v1577_v44, %v1609_v45  ;;  %v1635_v50 = vcombine.low %v4772_v49, %v4775_v38  ;;  %v1636_v51 = vcombine.high %v4772_v49, %v4775_v38 }
 0x1d0   : > { %3904 = vmatpush3.msra.mxu0 %v1633_v46  ;;  %3909 = vmatpush3.msra.mxu1 %v1634_v47 }
 0x1d1   : > { %3913 = vmatprep.subr.mxu0 %v4295_v0  ;;  %3918 = vmatprep.subr.mxu1 %v4295_v0 }
 0x273   : > { %v1714_v52 = vpop.f32.mrf.mxu1 }
 0x274   : > { %v2250_v54 = vmul.f32 0.5, %v1714_v52  ;;  %v1866_v55 = vpop.f32.mrf.mxu0 }
 0x275   : > { %v3867_v56 = vpop.f32.mrf.mxu1  ;;  %v2252_v57 = vmul.f32 0.5, %v1866_v55 }
 0x276   : > { %v3877_v58 = vpop.f32.mrf.mxu0  ;;  %v2259_v59 = vsel %vm2258_vm3, %v2250_v54, -inf }
 0x277   : > { %2260 = vmax.xlane.f32.xlu0 %v2259_v59  ;;  %v2265_v62 = vsel %vm2258_vm3, %v2252_v57, -inf }
 0x278   : > { %v1790_v60 = vpop.f32.mrf.mxu1 }
 0x279   : > { %v2251_v61 = vmul.f32 0.5, %v1790_v60 }
 0x27a   : > { %v3872_v53 = vpop.f32.mrf.mxu1 }
 0x27b   : > { %2266 = vmax.xlane.f32.xlu0 %v2265_v62  ;;  %v2262_v16 = vsel %vm2258_vm3, %v2251_v61, -inf }
 0x27c   : > { %2263 = vmax.xlane.f32.xlu1 %v2262_v16  ;;  %v1942_v17 = vpop.f32.mrf.mxu1 }
 0x27d   : > { %v2253_v39 = vmul.f32 0.5, %v1942_v17 }
 0x27e   : > { %v3882_v63 = vpop.f32.mrf.mxu1 }
 0x27f   : > { %v2268_v1 = vsel %vm2258_vm3, %v2253_v39, -inf }
 0x280   : > { %2269 = vmax.xlane.f32.xlu0 %v2268_v1  ;;  %v2018_v19 = vpop.f32.mrf.mxu0  ;;  %v2094_v20 = vpop.f32.mrf.mxu1 }
 0x281   : > { %v2254_v2 = vmul.f32 0.5, %v2018_v19  ;;  %v2255_v3 = vmul.f32 0.5, %v2094_v20 }
 0x282   : > { %v3887_v4 = vpop.f32.mrf.mxu0  ;;  %v3892_v5 = vpop.f32.mrf.mxu1 }
 0x283   : > { %v2271_v6 = vsel %vm2258_vm3, %v2254_v2, -inf  ;;  %v2274_v8 = vsel %vm2258_vm3, %v2255_v3, -inf }
 0x284   : > { %v2170_v9 = vpop.f32.mrf.mxu0  ;;  %2272 = vmax.xlane.f32.xlu1 %v2271_v6  ;;  %2275 = vmax.xlane.f32.xlu0 %v2274_v8  ;;  %v2246_v10 = vpop.f32.mrf.mxu1 }
 0x285   : > { %v2256_v11 = vmul.f32 0.5, %v2170_v9  ;;  %v2257_v12 = vmul.f32 0.5, %v2246_v10 }
 0x286   : > { %v3897_v13 = vpop.f32.mrf.mxu0  ;;  %v3902_v14 = vpop.f32.mrf.mxu1 }
 0x287   : > { %v2277_v15 = vsel %vm2258_vm3, %v2256_v11, -inf  ;;  %v2280_v7 = vsel %vm2258_vm3, %v2257_v12, -inf }
 0x288   : > { %2278 = vmax.xlane.f32.xlu1 %v2277_v15  ;;  %2281 = vmax.xlane.f32.xlu0 %v2280_v7 }
 0x299   : > { %1360 = vrot.lane.b32.xlu1 %v4608_v18, %s4300_s16 }
 0x29e   : > { %1357 = vrot.lane.b32.xlu0 %v4608_v18, %s4301_s23  ;;  %s5076_s23 = sld [smem:[#allocation20_spill]] }
 0x300   : > { %v2261_v21 = vpop.xlane.xlu0 %2260 }
 0x301   : > { %v2283_v22 = vsub.f32 %v2250_v54, %v2261_v21 }
 0x303   : > { %v2291_v23 = vmul.f32 1.442695, %v2283_v22 }
 0x304   : > { %v2267_v24 = vpop.xlane.xlu0 %2266 }
 0x305   : > { %4087 = vpow2.f32 %v2291_v23  ;;  %v2285_v25 = vsub.f32 %v2252_v57, %v2267_v24  ;;  %v2264_v26 = vpop.xlane.xlu1 %2263 }
 0x306   : > { %v2284_v27 = vsub.f32 %v2251_v61, %v2264_v26 }
 0x307   : > { %v2295_v28 = vmul.f32 1.442695, %v2285_v25 }
 0x308   : > { %v2293_v31 = vmul.f32 1.442695, %v2284_v27 }
 0x309   : > { %4089 = vpow2.f32 %v2295_v28  ;;  %v2270_v32 = vpop.xlane.xlu0 %2269 }
 0x30a   : > { %4091 = vpow2.f32 %v2293_v31  ;;  %v2286_v33 = vsub.f32 %v2253_v39, %v2270_v32 }
 0x30c   : > { %v2297_v34 = vmul.f32 1.442695, %v2286_v33 }
 0x30d   : > { %v2273_v35 = vpop.xlane.xlu1 %2272  ;;  %v2276_v37 = vpop.xlane.xlu0 %2275 }
 0x30e   : > { %4093 = vpow2.f32 %v2297_v34  ;;  %v2287_v40 = vsub.f32 %v2254_v2, %v2273_v35  ;;  %v2288_v41 = vsub.f32 %v2255_v3, %v2276_v37 }
 0x310   : > { %v2299_v42 = vmul.f32 1.442695, %v2287_v40  ;;  %v2301_v43 = vmul.f32 1.442695, %v2288_v41 }
 0x311   : > { %v2279_v44 = vpop.xlane.xlu1 %2278  ;;  %v2282_v45 = vpop.xlane.xlu0 %2281 }
 0x312   : > { %v4088_v46 = vpop.eup %4087  ;;  %4095 = vpow2.f32 %v2299_v42  ;;  %v2289_v47 = vsub.f32 %v2256_v11, %v2279_v44  ;;  %v2290_v29 = vsub.f32 %v2257_v12, %v2282_v45 }
 0x313   : > { %4097 = vpow2.f32 %v2301_v43  ;;  %v2307_v48 = vsel %vm2258_vm3, %v4088_v46, 0.0 }
 0x314   : > { %v2303_v52 = vmul.f32 1.442695, %v2289_v47  ;;  %v2305_v54 = vmul.f32 1.442695, %v2290_v29  ;;  %2308 = vadd.xlane.f32.xlu1 %v2307_v48 }
 0x315   : > { %v1361_v19 = vpop.permute.xlu1 %1360  ;;  %v1358_v2 = vpop.permute.xlu0 %1357 }
 0x316   : > { %v4090_v55 = vpop.eup %4089  ;;  %4099 = vpow2.f32 %v2303_v52 }
 0x317   : > { %v4092_v56 = vpop.eup %4091  ;;  %4101 = vpow2.f32 %v2305_v54  ;;  %v2313_v57 = vsel %vm2258_vm3, %v4090_v55, 0.0 }
 0x318   : > { %2314 = vadd.xlane.f32.xlu1 %v2313_v57  ;;  %v2310_v58 = vsel %vm2258_vm3, %v4092_v56, 0.0 }
 0x319   : > { %2311 = vadd.xlane.f32.xlu0 %v2310_v58 }
 0x31b   : > { %v4094_v59 = vpop.eup %4093 }
 0x31c   : > { %v2316_v60 = vsel %vm2258_vm3, %v4094_v59, 0.0 }
 0x31d   : > { %2317 = vadd.xlane.f32.xlu0 %v2316_v60 }
 0x31f   : > { %v4797_v61 = vpop.eup %4095 }
 0x320   : > { %v4799_v53 = vpop.eup %4097  ;;  %v2319_v62 = vsel %vm2258_vm3, %v4797_v61, 0.0 }
 0x321   : > { %2320 = vadd.xlane.f32.xlu1 %v2319_v62  ;;  %v2322_v16 = vsel %vm2258_vm3, %v4799_v53, 0.0 }
 0x322   : > { %2323 = vadd.xlane.f32.xlu0 %v2322_v16 }
 0x323   : > { %v4805_v17 = vpop.eup %4099 }
 0x324   : > { %v4807_v39 = vpop.eup %4101  ;;  %v2325_v63 = vsel %vm2258_vm3, %v4805_v17, 0.0 }
 0x325   : > { %2326 = vadd.xlane.f32.xlu1 %v2325_v63  ;;  %v2328_v1 = vsel %vm2258_vm3, %v4807_v39, 0.0 }
 0x326   : > { %2329 = vadd.xlane.f32.xlu0 %v2328_v1 }
 0x336   : > { %1363 = vrot.lane.b32.xlu1 %v4608_v18, %s4303_s25  ;;  %s525_s25 = scalar_lea.vmem [#allocation8], %s3687_s28 }
 0x33c   : > { %1366 = vrot.lane.b32.xlu0 %v4608_v18, %s4302_s21 }
 0x39d   : > { %v2309_v20 = vpop.xlane.xlu1 %2308 }
 0x39e   : > { %4103 = vrcp.f32 %v2309_v20 }
 0x3a1   : > { %v2315_v3 = vpop.xlane.xlu1 %2314 }
 0x3a2   : > { %4105 = vrcp.f32 %v2315_v3  ;;  %v2312_v4 = vpop.xlane.xlu0 %2311 }
 0x3a3   : > { %4107 = vrcp.f32 %v2312_v4 }
 0x3a6   : > { %v2318_v5 = vpop.xlane.xlu0 %2317 }
 0x3a7   : > { %4109 = vrcp.f32 %v2318_v5 }
 0x3aa   : > { %v2321_v6 = vpop.xlane.xlu1 %2320 }
 0x3ab   : > { %v4104_v8 = vpop.eup %4103  ;;  %v2324_v9 = vpop.xlane.xlu0 %2323  ;;  %4111 = vrcp.f32 %v2321_v6 }
 0x3ac   : > { %v2339_v10 = vmul.f32 %v4104_v8, %v4088_v46  ;;  %4113 = vrcp.f32 %v2324_v9 }
 0x3ae   : > { %3906 = vmatmul.mubr.msk.f32.vlgmr.msra.gmra.mxu0 %vm2258_vm3, %v2339_v10  ;;  %v2327_v11 = vpop.xlane.xlu1 %2326 }
 0x3af   : > { %v4106_v12 = vpop.eup %4105  ;;  %3914 = vmatpush3.msra.mxu0 %v1635_v50  ;;  %v2330_v18 = vpop.xlane.xlu0 %2329  ;;  %3915 = vmatprep.mubr.msk.f32.mxu0 %vm4296_vm0, %v4295_v0  ;;  %4115 = vrcp.f32 %v2327_v11 }
 0x3b0   : > { %v4108_v13 = vpop.eup %4107  ;;  %v2341_v14 = vmul.f32 %v4106_v12, %v4090_v55  ;;  %3923 = vmatprep.subr.mxu0 %v4295_v0  ;;  %4117 = vrcp.f32 %v2330_v18 }
 0x3b1   : > { %v2340_v15 = vmul.f32 %v4108_v13, %v4092_v56 }
 0x3b2   : > { %3916 = vmatmul.mubr.msk.f32.vlgmr.msra.gmra.mxu0 %vm2258_vm3, %v2341_v14  ;;  %v1364_v7 = vpop.permute.xlu1 %1363 }
 0x3b3   : > { %v1401_v21 = vcombine.low %v1358_v2, %v1364_v7  ;;  %v1402_v22 = vcombine.high %v1358_v2, %v1364_v7  ;;  %3911 = vmatmul.mubr.msk.f32.vlgmr.msra.gmra.mxu1 %vm2258_vm3, %v2340_v15  ;;  %v1367_v23 = vpop.permute.xlu0 %1366  ;;  %3925 = vmatprep.mubr.msk.f32.mxu0 %vm4296_vm0, %v4295_v0 }
 0x3b4   : > { %v4110_v50 = vpop.eup %4109  ;;  %3919 = vmatpush3.msra.mxu1 %v1636_v51  ;;  %v1417_v24 = vcombine.low %v1361_v19, %v1367_v23  ;;  %v1418_v25 = vcombine.high %v1361_v19, %v1367_v23  ;;  %3920 = vmatprep.mubr.msk.f32.mxu1 %vm4296_vm0, %v4295_v0 }
 0x3b5   : > { %v1409_v26 = vrot.slane %v1401_v21, %v4613_v30  ;;  %v1416_v27 = vrot.slane %v1402_v22, %v4613_v30  ;;  %v2342_v28 = vmul.f32 %v4110_v50, %v4094_v59  ;;  %3928 = vmatprep.subr.mxu1 %v4295_v0 }
 0x3b6   : > { %v1425_v31 = vrot.slane %v1417_v24, %v4613_v30  ;;  %v1432_v32 = vrot.slane %v1418_v25, %v4613_v30 }
 0x3b7   : > { %3921 = vmatmul.mubr.msk.f32.vlgmr.msra.gmra.mxu1 %vm2258_vm3, %v2342_v28 }
 0x3b8   : > { %v1465_v49 = vcombine.low %v1409_v26, %v1425_v31  ;;  %v1466_v38 = vcombine.high %v1409_v26, %v1425_v31  ;;  %v1481_v51 = vcombine.low %v1416_v27, %v1432_v32  ;;  %v1482_v33 = vcombine.high %v1416_v27, %v1432_v32  ;;  %3930 = vmatprep.mubr.msk.f32.mxu1 %vm4296_vm0, %v4295_v0  ;;  %v4112_v56 = vpop.eup %4111 }
 0x3b9   : > { %v4114_v57 = vpop.eup %4113  ;;  %v2343_v19 = vmul.f32 %v4112_v56, %v4797_v61 }
 0x3ba   : > { %v1473_v34 = vrot.slane %v1465_v49, %v4615_v36  ;;  %v1480_v35 = vrot.slane %v1466_v38, %v4615_v36  ;;  %v1489_v37 = vrot.slane %v1481_v51, %v4615_v36  ;;  %v1496_v40 = vrot.slane %v1482_v33, %v4615_v36  ;;  %v3246_v33 = vld [vmem:[#allocation5 + $0x18] sm:$0xff] }
 0x3bb   : > { %v2344_v20 = vmul.f32 %v4114_v57, %v4799_v53 }
 0x3bc   : > { %v3711_v41 = vcombine.low %v1473_v34, %v1480_v35  ;;  %v3713_v42 = vcombine.high %v1473_v34, %v1480_v35  ;;  %v3715_v43 = vcombine.low %v1489_v37, %v1496_v40  ;;  %v3717_v44 = vcombine.high %v1489_v37, %v1496_v40  ;;  %v4116_v16 = vpop.eup %4115 }
 0x3bd   : > { %v4118_v2 = vpop.eup %4117  ;;  %v2345_v5 = vmul.f32 %v4116_v16, %v4805_v17 }
 0x3be   : > { %v1520_v45 = vrot.slane %v3711_v41, %v4613_v30  ;;  %v1536_v46 = vrot.slane %v3713_v42, %v4613_v30  ;;  %v1552_v47 = vrot.slane %v3715_v43, %v4613_v30  ;;  %v1568_v29 = vrot.slane %v3717_v44, %v4613_v30 }
 0x3bf   : > { %v2346_v61 = vmul.f32 %v4118_v2, %v4807_v39 }
 0x3c0   : > { %v1585_v48 = vcombine.low %v1520_v45, %v1536_v46  ;;  %v1617_v52 = vcombine.low %v1552_v47, %v1568_v29  ;;  %v1586_v54 = vcombine.high %v1520_v45, %v1536_v46  ;;  %v1618_v55 = vcombine.high %v1552_v47, %v1568_v29 }
 0x3c2   : > { %v1593_v58 = vrot.slane %v1585_v48, %v4615_v36  ;;  %v1625_v59 = vrot.slane %v1617_v52, %v4615_v36  ;;  %v1600_v60 = vrot.slane %v1586_v54, %v4615_v36  ;;  %v1632_v62 = vrot.slane %v1618_v55, %v4615_v36 }
 0x3c4   : > { %v1637_v63 = vcombine.low %v1593_v58, %v1625_v59  ;;  %v1638_v1 = vcombine.high %v1593_v58, %v1625_v59  ;;  %v1639_v3 = vcombine.low %v1600_v60, %v1632_v62  ;;  %v1640_v4 = vcombine.high %v1600_v60, %v1632_v62 }
 0x3c6   : > { %3924 = vmatpush3.msra.mxu0 %v1637_v63  ;;  %3929 = vmatpush3.msra.mxu1 %v1638_v1 }
 0x3c7   : > { %3926 = vmatmul.mubr.msk.f32.vlgmr.msra.gmra.mxu0 %vm2258_vm3, %v2343_v19  ;;  %3931 = vmatmul.mubr.msk.f32.vlgmr.msra.gmra.mxu1 %vm2258_vm3, %v2344_v20 }
 0x3c8   : > { %3933 = vmatprep.subr.mxu0 %v4295_v0  ;;  %3938 = vmatprep.subr.mxu1 %v4295_v0 }
 0x3c9   : > { %3934 = vmatpush3.msra.mxu0 %v1639_v3  ;;  %3939 = vmatpush3.msra.mxu1 %v1640_v4 }
 0x3ca   : > { %3935 = vmatprep.mubr.msk.f32.mxu0 %vm4296_vm0, %v4295_v0  ;;  %3940 = vmatprep.mubr.msk.f32.mxu1 %vm4296_vm0, %v4295_v0 }
 0x3cb   : > { %3936 = vmatmul.mubr.msk.f32.vlgmr.msra.gmra.mxu0 %vm2258_vm3, %v2345_v5  ;;  %3941 = vmatmul.mubr.msk.f32.vlgmr.msra.gmra.mxu1 %vm2258_vm3, %v2346_v61 }
 0x3cc   : > { %3943 = vmatprep.subr.mxu0 %v4295_v0  ;;  %3951 = vmatprep.mubr.msk.f32.mxu0 %vm4296_vm0, %v4295_v0 }
 0x3cd   : > { %3954 = vmatprep.subr.mxu1 %v4295_v0  ;;  %3962 = vmatprep.mubr.msk.f32.mxu1 %vm4296_vm0, %v4295_v0 }
 0x3ce   : > { %3944 = vmatpush3.msra.mxu0 %v3246_v33 }
 0x3cf   : > { %3945 = vmatprep.subr.mxu0 %v4295_v0 }
 0x46e   : > { %v2416_v53 = vpop.f32.mrf.mxu0 }
 0x470   : > { %v3907_v17 = vpop.f32.mrf.mxu0 }
 0x472   : > { %v2562_v39 = vpop.f32.mrf.mxu0 }
 0x473   : > { %v2489_v6 = vpop.f32.mrf.mxu1  ;;  %v2931_v10 = vcombine.low %v2416_v53, %v2562_v39  ;;  %v2932_v11 = vcombine.high %v2416_v53, %v2562_v39 }
 0x474   : > { %v3917_v8 = vpop.f32.mrf.mxu0 }
 0x475   : > { %v3912_v9 = vpop.f32.mrf.mxu1  ;;  %v2939_v15 = vrot.slane %v2931_v10, %v4613_v30  ;;  %v2946_v7 = vrot.slane %v2932_v11, %v4613_v30  ;;  %v3245_v8 = vld [vmem:[#allocation5 + $0x10] sm:$0xff] }
 0x476   : > { %v3244_v9 = vld [vmem:[#allocation5 + $0x8] sm:$0xff]  ;;  %3946 = vmatpush3.msra.mxu0 %v3245_v8 }
 0x477   : > { %v2635_v12 = vpop.f32.mrf.mxu1  ;;  %3947 = vmatprep.subr.mxu0 %v4295_v0 }
 0x478   : > { %v2947_v18 = vcombine.low %v2489_v6, %v2635_v12  ;;  %v2948_v13 = vcombine.high %v2489_v6, %v2635_v12  ;;  %3948 = vmatpush3.msra.mxu0 %v3244_v9 }
 0x479   : > { %v3922_v14 = vpop.f32.mrf.mxu1  ;;  %3949 = vmatprep.subr.mxu0 %v4295_v0 }
 0x47a   : > { %v2955_v21 = vrot.slane %v2947_v18, %v4613_v30  ;;  %v2962_v22 = vrot.slane %v2948_v13, %v4613_v30 }
 0x47c   : > { %v2995_v23 = vcombine.low %v2939_v15, %v2955_v21  ;;  %v2996_v50 = vcombine.high %v2939_v15, %v2955_v21  ;;  %v3011_v24 = vcombine.low %v2946_v7, %v2962_v22  ;;  %v3012_v25 = vcombine.high %v2946_v7, %v2962_v22 }
 0x47e   : > { %v3003_v26 = vrot.slane %v2995_v23, %v4615_v36  ;;  %v3010_v27 = vrot.slane %v2996_v50, %v4615_v36  ;;  %v3019_v28 = vrot.slane %v3011_v24, %v4615_v36  ;;  %v3026_v31 = vrot.slane %v3012_v25, %v4615_v36  ;;  %v3243_v24 = vld [vmem:[#allocation5] sm:$0xff] }
 0x47f   : > { %3950 = vmatpush3.msra.mxu0 %v3243_v24 }
 0x480   : > { %v3742_v32 = vcombine.low %v3003_v26, %v3010_v27  ;;  %v3744_v49 = vcombine.high %v3003_v26, %v3010_v27  ;;  %v3746_v38 = vcombine.low %v3019_v28, %v3026_v31  ;;  %v3748_v51 = vcombine.high %v3019_v28, %v3026_v31  ;;  %3965 = vmatprep.subr.mxu0 %v4295_v0 }
 0x482   : > { %v3075_v34 = vrot.slane %v3742_v32, %v4613_v30  ;;  %v3091_v35 = vrot.slane %v3744_v49, %v4613_v30  ;;  %v3107_v37 = vrot.slane %v3746_v38, %v4613_v30  ;;  %v3123_v40 = vrot.slane %v3748_v51, %v4613_v30 }
 0x484   : > { %v3132_v41 = vcombine.high %v3075_v34, %v3091_v35  ;;  %v3164_v42 = vcombine.high %v3107_v37, %v3123_v40  ;;  %v3131_v43 = vcombine.low %v3075_v34, %v3091_v35  ;;  %v3163_v44 = vcombine.low %v3107_v37, %v3123_v40 }
 0x486   : > { %v3146_v45 = vrot.slane %v3132_v41, %v4615_v36  ;;  %v3178_v46 = vrot.slane %v3164_v42, %v4615_v36  ;;  %v4889_v47 = vrot.slane %v3131_v43, %v4615_v36  ;;  %v4892_v29 = vrot.slane %v3163_v44, %v4615_v36 }
 0x487   : > { %v2708_v48 = vpop.f32.mrf.mxu0  ;;  %v2781_v52 = vpop.f32.mrf.mxu1 }
 0x488   : > { %v3197_v54 = vcombine.low %v3146_v45, %v3178_v46  ;;  %v3196_v55 = vcombine.high %v4889_v47, %v4892_v29  ;;  %v3195_v56 = vcombine.low %v4889_v47, %v4892_v29  ;;  %v3198_v62 = vcombine.high %v3146_v45, %v3178_v46  ;;  %v3750_v29 = vld [vmem:[%s5034_s5] ss:$0 sm:$0xff] }
 0x489   : > { %v3927_v57 = vpop.f32.mrf.mxu0  ;;  %v3932_v58 = vpop.f32.mrf.mxu1 }
 0x48a   : > { %3208 = vrot.lane.b32.xlu0 %v3197_v54, %s4306_s13  ;;  %3204 = vrot.lane.b32.xlu1 %v3196_v55, %s4307_s19  ;;  %v4123_v58 = vld [vmem:[%s4517_s17] sm:$0xff]  ;;  %s3578_s13 = sshll.u32 %s525_s25, 4  ;;  %s3579_s13 = int_to_ptr.vmem [resolvable:$true] %s3578_s13 }
 0x48b   : > { %v2854_v59 = vpop.f32.mrf.mxu0  ;;  %v2927_v60 = vpop.f32.mrf.mxu1  ;;  %s4204_s29 = scalar_lea.vmem %s3579_s13, 128 }
 0x48c   : > { %v2963_v16 = vcombine.low %v2708_v48, %v2854_v59  ;;  %v2964_v63 = vcombine.high %v2708_v48, %v2854_v59  ;;  %v2979_v1 = vcombine.low %v2781_v52, %v2927_v60  ;;  %v2980_v19 = vcombine.high %v2781_v52, %v2927_v60  ;;  %p4205_p8 = scmp.ne.s32.totalorder %s3579_s13, %s4204_s29 }
 0x48d   : > { %v3937_v20 = vpop.f32.mrf.mxu0  ;;  %v3942_v2 = vpop.f32.mrf.mxu1 }
 0x48e   : > { %v2971_v3 = vrot.slane %v2963_v16, %v4613_v30  ;;  %v2978_v4 = vrot.slane %v2964_v63, %v4613_v30  ;;  %v2987_v5 = vrot.slane %v2979_v1, %v4613_v30  ;;  %v2994_v61 = vrot.slane %v2980_v19, %v4613_v30  ;;  %3212 = vrot.lane.b32.xlu1 %v3198_v62, %s4308_s24  ;;  %v3361_v20 = vld [vmem:[#allocation7 + $0x18] sm:$0xff]  ;;  %v3360_v2 = vld [vmem:[#allocation7 + $0x10] sm:$0xff]  ;;  %p4206_p9 = pnand %p4205_p8, %p4484_p7 }
 0x48f   : > { %3955 = vmatpush3.msra.mxu1 %v3361_v20 }
 0x490   : > { %v3027_v53 = vcombine.low %v2971_v3, %v2987_v5  ;;  %v3028_v17 = vcombine.high %v2971_v3, %v2987_v5  ;;  %v3043_v39 = vcombine.low %v2978_v4, %v2994_v61  ;;  %v3044_v6 = vcombine.high %v2978_v4, %v2994_v61  ;;  %3956 = vmatprep.subr.mxu1 %v4295_v0  ;;  %v3359_v3 = vld [vmem:[#allocation7 + $0x8] sm:$0xff]  ;;  %v3358_v4 = vld [vmem:[#allocation7] sm:$0xff]  ;;  %p4207_p11 = pneg %p4206_p9 }
 0x491   : > { %3957 = vmatpush3.msra.mxu1 %v3360_v2  ;;  %v3450_v5 = vld [vmem:[%s5037_s8 + $0x38] sm:$0xff]  ;;  %v3449_v61 = vld [vmem:[%s5037_s8 + $0x30] sm:$0xff] }
 0x492   : > { %v3035_v10 = vrot.slane %v3027_v53, %v4615_v36  ;;  %v3042_v11 = vrot.slane %v3028_v17, %v4615_v36  ;;  %v3051_v12 = vrot.slane %v3043_v39, %v4615_v36  ;;  %v3058_v18 = vrot.slane %v3044_v6, %v4615_v36  ;;  %3958 = vmatprep.subr.mxu1 %v4295_v0  ;;  %v3448_v53 = vld [vmem:[%s5037_s8 + $0x28] sm:$0xff]  ;;  %v3447_v17 = vld [vmem:[%s5037_s8 + $0x20] sm:$0xff]  ;;  %v3446_v39 = vld [vmem:[%s5037_s8 + $0x18] sm:$0xff] }
 0x493   : > { %3959 = vmatpush3.msra.mxu1 %v3359_v3 }
 0x494   : > { %v3743_v13 = vcombine.low %v3035_v10, %v3042_v11  ;;  %v3745_v14 = vcombine.high %v3035_v10, %v3042_v11  ;;  %v3747_v15 = vcombine.low %v3051_v12, %v3058_v18  ;;  %v3749_v7 = vcombine.high %v3051_v12, %v3058_v18  ;;  %3960 = vmatprep.subr.mxu1 %v4295_v0  ;;  %v3752_v11 = vld [vmem:[%s5039_s10] ss:$0 sm:$0xff] }
 0x495   : > { %3961 = vmatpush3.msra.mxu1 %v3358_v4  ;;  %v3753_v18 = vld [vmem:[%s5040_s11] ss:$0 sm:$0xff] }
 0x496   : > { %v3082_v21 = vrot.slane %v3743_v13, %v4613_v30  ;;  %v3098_v22 = vrot.slane %v3745_v14, %v4613_v30  ;;  %v3114_v23 = vrot.slane %v3747_v15, %v4613_v30  ;;  %v3130_v50 = vrot.slane %v3749_v7, %v4613_v30  ;;  %v3445_v15 = vld [vmem:[%s5037_s8 + $0x10] sm:$0xff]  ;;  %v3444_v7 = vld [vmem:[%s5037_s8 + $0x8] sm:$0xff] }
 0x498   : > { %v3147_v25 = vcombine.low %v3082_v21, %v3098_v22  ;;  %v3179_v26 = vcombine.low %v3114_v23, %v3130_v50  ;;  %v3148_v27 = vcombine.high %v3082_v21, %v3098_v22  ;;  %v3180_v28 = vcombine.high %v3114_v23, %v3130_v50  ;;  %v3443_v21 = vld [vmem:[%s5037_s8] sm:$0xff] }
 0x499   : > { %v3754_v22 = vld [vmem:[%s5036_s7] ss:$0 sm:$0xff] }
 0x49a   : > { %v3155_v31 = vrot.slane %v3147_v25, %v4615_v36  ;;  %v3187_v32 = vrot.slane %v3179_v26, %v4615_v36  ;;  %v3162_v51 = vrot.slane %v3148_v27, %v4615_v36  ;;  %v3194_v33 = vrot.slane %v3180_v28, %v4615_v36  ;;  %v3756_v26 = vld [vmem:[%s5038_s9] ss:$0 sm:$0xff] }
 0x49c   : > { %v3200_v49 = vcombine.high %v3155_v31, %v3187_v32  ;;  %v3199_v38 = vcombine.low %v3155_v31, %v3187_v32  ;;  %v3202_v30 = vcombine.high %v3162_v51, %v3194_v33  ;;  %v3201_v34 = vcombine.low %v3162_v51, %v3194_v33 }
 0x49e   : > { %3220 = vrot.lane.b32.xlu1 %v3200_v49, %s4309_s22  ;;  %3216 = vrot.lane.b32.xlu0 %v3199_v38, %s4310_s27  ;;  %s5077_s22 = sld [smem:[#allocation21_spill]] }
 0x4a2   : > { %3228 = vrot.lane.b32.xlu1 %v3202_v30, %s4311_s14  ;;  %3224 = vrot.lane.b32.xlu0 %v3201_v34, %s4312_s20  ;;  %s5074_s14 = sld [smem:[#allocation13_spill]]  ;;  %s3564_s20 = scalar_lea.sflag [#allocation4], %s4511_s6 }
 0x4a8   : > { %s3761_s21 = sshll.u32 %s5074_s14, 7 }
 0x4a9   : > { %s3576_s27 = scalar_lea.hbm %s5077_s22, %s3761_s21 }
 0x4fc   : > { %v3205_v35 = vpop.permute.xlu1 %3204  ;;  %v3209_v37 = vpop.permute.xlu0 %3208 }
 0x4fd   : > { %v3231_v40 = vsel %vm1641_vm2, %v3195_v56, %v3205_v35 }
 0x4fe   : > { %v3232_v36 = vsel %vm2258_vm3, %v3231_v40, %v3209_v37 }
 0x500   : > { %v3213_v41 = vpop.permute.xlu1 %3212 }
 0x501   : > { %v3234_v42 = vsel %vm3233_vm4, %v3232_v36, %v3213_v41  ;;  %v3758_v41 = vld [vmem:[%s5075_s4] ss:$0 sm:$0xff]  ;;  %s4313_s4 = smov [#allocation8]  }
 0x502   : > { %s4208_s14 = sshll.u32 %s4313_s4, 4  ;;  %s4209_s14 = int_to_ptr.vmem [resolvable:$false] %s4208_s14 }
 0x503   : > { %s4210_s28 = scalar_lea.vmem %s4209_s14, 256  ;;  %p4211_p2 = scmp.lt.s32.totalorder %s3579_s13, %s4209_s14 }
 0x504   : > { %p4212_p13 = scmp.lt.s32.totalorder %s4210_s28, %s4204_s29 }
 0x506   : > { %p4213_p0 = por %p4212_p13, %p4211_p2 }
 0x508   : > { %p4214_p5 = pnand %p4213_p0, %p4207_p11 }
 0x510   : > { %v3221_v43 = vpop.permute.xlu1 %3220  ;;  %v3217_v44 = vpop.permute.xlu0 %3216 }
 0x511   : > { %v3236_v45 = vsel %vm3235_vm5, %v3234_v42, %v3217_v44  ;;  %v3759_v42 = vld [vmem:[%s5076_s23] ss:$0 sm:$0xff] }
 0x512   : > { %v3238_v48 = vsel %vm3237_vm6, %v3236_v45, %v3221_v43 }
 0x514   : > { %v3229_v46 = vpop.permute.xlu1 %3228  ;;  %v3225_v52 = vpop.permute.xlu0 %3224 }
 0x515   : > { %v3240_v54 = vsel %vm3239_vm7, %v3238_v48, %v3225_v52 }
 0x516   : > { %v3242_v47 = vsel %vm3241_vm8, %v3240_v54, %v3229_v46 }
 0x517   : > { %3952 = vmatmul.mubr.msk.f32.vlgmr.msra.gmra.mxu0 %vm534_vm1, %v3242_v47 }
 0x518   : > { %3981 = vmatprep.mubr.msk.f32.mxu0 %vm4296_vm0, %v4295_v0  ;;  %3966 = vmatpush3.msra.mxu0 %v3450_v5 }
 0x519   : > { %3967 = vmatprep.subr.mxu0 %v4295_v0 }
 0x51a   : > { %3968 = vmatpush3.msra.mxu0 %v3449_v61 }
 0x51b   : > { %3969 = vmatprep.subr.mxu0 %v4295_v0 }
 0x51c   : > { %3970 = vmatpush3.msra.mxu0 %v3448_v53 }
 0x51d   : > { %3971 = vmatprep.subr.mxu0 %v4295_v0 }
 0x51e   : > { %3972 = vmatpush3.msra.mxu0 %v3447_v17 }
 0x51f   : > { %3973 = vmatprep.subr.mxu0 %v4295_v0 }
 0x520   : > { %3974 = vmatpush3.msra.mxu0 %v3446_v39 }
 0x521   : > { %3975 = vmatprep.subr.mxu0 %v4295_v0 }
 0x522   : > { %3976 = vmatpush3.msra.mxu0 %v3445_v15 }
 0x523   : > { %3977 = vmatprep.subr.mxu0 %v4295_v0 }
 0x524   : > { %3978 = vmatpush3.msra.mxu0 %v3444_v7 }
 0x525   : > { %3979 = vmatprep.subr.mxu0 %v4295_v0 }
 0x526   : > { %3980 = vmatpush3.msra.mxu0 %v3443_v21 }
 0x5d7   : > { %v3323_v55 = vpop.f32.mrf.mxu0 }
 0x5d8   : > { %v3324_v56 = vadd.f32 %v3750_v29, %v3323_v55 }
 0x5d9   : > { %v3953_v57 = vpop.f32.mrf.mxu0 }
 0x5da   : > { %v3327_v59 = vadd.f32 %v4123_v58, %v3324_v56 }
 0x5dc   : > { %v3330_v60 = vsel %vm534_vm1, %v3327_v59, 0.0 }
 0x5dd   : > { %3331 = vadd.xlane.f32.xlu0 %v3330_v60 }
 0x666   : > { %v3332_v62 = vpop.xlane.xlu0 %3331 }
 0x667   : > { %v3334_v16 = vmul.f32 0.03125, %v3332_v62 }
 0x669   : > { %v3335_v63 = vsub.f32 %v3327_v59, %v3334_v16 }
 0x66b   : > { %v3336_v1 = vmul.f32 %v3335_v63, %v3335_v63 }
 0x66d   : > { %v3337_v19 = vsel %vm534_vm1, %v3336_v1, 0.0 }
 0x66e   : > { %3338 = vadd.xlane.f32.xlu1 %v3337_v19 }
 0x6f7   : > { %v3339_v6 = vpop.xlane.xlu1 %3338 }
 0x6f8   : > { %v3340_v8 = vmul.f32 0.03125, %v3339_v6 }
 0x6fa   : > { %v3341_v9 = vadd.f32 1e-05, %v3340_v8 }
 0x6fc   : > { %4119 = vrsqrt.f32 %v3341_v9 }
 0x709   : > { %v4120_v10 = vpop.eup %4119 }
 0x70a   : > { %v3343_v12 = vmul.f32 %v4120_v10, %v3335_v63 }
 0x70c   : > { %v3350_v13 = vmul.f32 %v3752_v11, %v3343_v12 }
 0x70e   : > { %v3357_v14 = vadd.f32 %v3753_v18, %v3350_v13 }
 0x710   : > { %3963 = vmatmul.mubr.msk.f32.vlgmr.msra.gmra.mxu1 %vm534_vm1, %v3357_v14 }
 0x7d0   : > { %v3438_v23 = vpop.f32.mrf.mxu1 }
 0x7d1   : > { %v3439_v50 = vadd.f32 %v3754_v22, %v3438_v23 }
 0x7d2   : > { %v3964_v24 = vpop.f32.mrf.mxu1 }
 0x7d3   : > { %v3442_v25 = vmax.f32 %v3439_v50, 0.0 }
 0x7d5   : > { %3982 = vmatmul.mubr.msk.f32.vlgmr.msra.gmra.mxu0 %vm3458_vm9, %v3442_v25 }
 0x895   : > { %v3528_v27 = vpop.f32.mrf.mxu0 }
 0x896   : > { %v3529_v28 = vadd.f32 %v3756_v26, %v3528_v27 }
 0x897   : > { %v3983_v31 = vpop.f32.mrf.mxu0 }
 0x898   : > { %v3532_v32 = vadd.f32 %v3529_v28, %v3357_v14 }
 0x89a   : > { %v3535_v0 = vsel %vm534_vm1, %v3532_v32, 0.0 }
 0x89b   : > { %3536 = vadd.xlane.f32.xlu0 %v3535_v0 }
 0x924   : > { %v3537_v49 = vpop.xlane.xlu0 %3536 }
 0x925   : > { %v3538_v38 = vmul.f32 0.03125, %v3537_v49 }
 0x927   : > { %v3539_v51 = vsub.f32 %v3532_v32, %v3538_v38 }
 0x929   : > { %v3540_v33 = vmul.f32 %v3539_v51, %v3539_v51 }
 0x92b   : > { %v3541_v30 = vsel %vm534_vm1, %v3540_v33, 0.0 }
 0x92c   : > { %3542 = vadd.xlane.f32.xlu0 %v3541_v30 }
 0x9b5   : > { %v3543_v34 = vpop.xlane.xlu0 %3542 }
 0x9b6   : > { %v3544_v35 = vmul.f32 0.03125, %v3543_v34 }
 0x9b8   : > { %v3545_v37 = vadd.f32 1e-05, %v3544_v35 }
 0x9ba   : > { %4121 = vrsqrt.f32 %v3545_v37 }
 0x9c7   : > { %v4122_v40 = vpop.eup %4121 }
 0x9c8   : > { %v3547_v36 = vmul.f32 %v4122_v40, %v3539_v51 }
 0x9ca   : > { %v3554_v43 = vmul.f32 %v3758_v41, %v3547_v36 }
 0x9cc   : > { %v3561_v44 = vadd.f32 %v3759_v42, %v3554_v43 }
 0x9ce   : > { %3562 = vst.msk [vmem:[%s525_s25] sm:$0xff] %vm534_vm1, %v3561_v44 }
 0x9cf   : > { %4217 = shalt.err (!%p4214_p5)
}
 0x9d0   : > { %s4218_s17 = scalar_lea.hbm %s3576_s27, 128  ;;  %s4222_s23 = scalar_lea.hbm %s5077_s22, 256 }
 0x9d1   : > { %p4219_p10 = scmp.ne.s32.totalorder %s3576_s27, %s4218_s17  ;;  %p4223_p6 = scmp.lt.s32.totalorder %s3576_s27, %s5077_s22 }
 0x9d2   : > { %p4224_p12 = scmp.lt.s32.totalorder %s4222_s23, %s4218_s17 }
 0x9d3   : > { %p4220_p1 = pnand %p4219_p10, %p4484_p7 }
 0x9d4   : > { %p4225_p3 = por %p4224_p12, %p4223_p6 }
 0x9d5   : > { %p4221_p4 = pneg %p4220_p1 }
 0x9d7   : > { %p4226_p8 = pnand %p4225_p3, %p4221_p4 }
 0x9d9   : > { %4229 = shalt.err (!%p4226_p8)
}
 0x9da   : > { %3994 = dma.vmem_to_hbm [thread:$0]  (%p4484_p7), %s3579_s13, 128, %s3576_s27, %s3564_s20  }
 0x9db PF: > { %s5078_s19 = sld [smem:[#allocation12_spill]]  ;;  %p5081_p11 = scmp.ge.s32.totalorder %s4288_s18, 2 }
 0x9dc   : > { %s5079_s24 = sld [smem:[#allocation15_spill]] }
 0x9e1   : > { %s3590_s29 = sand.u32 1, %s5078_s19  }
 0x9e2   : > { %p5080_p9 = scmp.ne.s32.totalorder %s5079_s24, 0  ;;  %s3591_s4 = scalar_lea.sflag [#allocation4], %s3590_s29 }
 0x9e4   : > { %p4008_p2 = pnand %p5081_p11, %p5080_p9 }
 0x9e6   : > { %p4009_p13 = pneg %p4008_p2 }
 0x9e8   : > { %4263 = dma.done.wait (%p4009_p13), %s3591_s4, 128  }
 0x9e9   : > { %4265 = vsyncadd (%p4009_p13), %s3591_s4, 4294967168  ;;  %s31_s18 = sadd.s32 1, %s4288_s18   ;;  %s5082_s16 = sld [smem:[#allocation14_spill]] }
 0x9ea   : > { %p28_p0 = scmp.ge.s32.totalorder %s31_s18, 4   ;;  %s5083_s17 = sld [smem:[#allocation16_spill]] }
 0x9eb   : > { %s5084_s29 = smov %s4272_s30  ;;  %s5085_s30 = smov %s4276_s15 }
 0x9ec   : > { %s5086_s15 = smov %s4493_s26  ;;  %30 = sbr.rel (!%p28_p0) target bundleno = 13 (0xd), region = 130 }
 0x9f1   :  { %3596 = vsyncpa [#allocation3], 1 }
 0x9f2   :  { %3598 = vsyncpa [#allocation3 + $0x1], 1 }
 0x9f3   :  { %3599 = vsyncpa [#allocation6], 1 }
 0x9f4   :  { %3600 = vsyncpa [#allocation4], 1 }
 0x9f5   :  { %3602 = vsyncpa [#allocation4 + $0x1], 1 }

// kernel: tpu_custom_call.1
= control target key start
LH: loop header
LB: loop body
LE: loop exit
PB: predicated region body
PF: predicated region fallthrough
CT: control target
= control target key end

     0   :  { %s5029_s0 = inlined_call_operand.hbm [shape: f32[2,8,32], index: 0, kind: input, shape index: {}]   ;;  %s5030_s1 = inlined_call_operand.vmem [shape: f32[32,32], index: 1, kind: input, shape index: {}]   ;;  %s5031_s2 = inlined_call_operand.vmem [shape: f32[32,32], index: 2, kind: input, shape index: {}]   ;;  %s5032_s3 = inlined_call_operand.vmem [shape: f32[32,32], index: 3, kind: input, shape index: {}]   ;;  %s5033_s4 = inlined_call_operand.hbm [shape: f32[32,32], index: 4, kind: input, shape index: {}]   ;;  %s5034_s5 = inlined_call_operand.vmem [shape: f32[1,32], index: 5, kind: input, shape index: {}]   ;;  %s5035_s6 = inlined_call_operand.hbm [shape: f32[32,64], index: 6, kind: input, shape index: {}]   ;;  %s5036_s7 = inlined_call_operand.vmem [shape: f32[1,64], index: 7, kind: input, shape index: {}]   ;;  %s5037_s8 = inlined_call_operand.vmem [shape: f32[64,32], index: 8, kind: input, shape index: {}]   ;;  %s5038_s9 = inlined_call_operand.vmem [shape: f32[1,32], index: 9, kind: input, shape index: {}]   ;;  %s5039_s10 = inlined_call_operand.vmem [shape: f32[1,32], index: 10, kind: input, shape index: {}]   ;;  %s5040_s11 = inlined_call_operand.vmem [shape: f32[1,32], index: 11, kind: input, shape index: {}]   ;;  %s5041_s12 = inlined_call_operand.vmem [shape: f32[1,32], index: 12, kind: input, shape index: {}]   ;;  %s5042_s13 = inlined_call_operand.vmem [shape: f32[1,32], index: 13, kind: input, shape index: {}]   ;;  %s5043_s14 = inlined_call_operand.hbm [shape: f32[2,8,32], index: 14, kind: output, shape index: {}]  }
   0x1   :  { %5052 = sst [smem:[#allocation17_spill]] %s5033_s4 }
   0x2   :  { %5053 = sst [smem:[#allocation18_spill]] %s5035_s6 }
   0x3   :  { %5054 = sst [smem:[#allocation19_spill]] %s5041_s12 }
   0x4   :  { %5055 = sst [smem:[#allocation20_spill]] %s5042_s13 }
   0x5   :  { %5056 = sst [smem:[#allocation21_spill]] %s5043_s14 }
   0x6   :  { %19 = vsyncpa [#allocation3], 0 }
   0x7   :  { %21 = vsyncpa [#allocation3 + $0x1], 0 }
   0x8   :  { %22 = vsyncpa [#allocation6], 0 }
   0x9   :  { %23 = vsyncpa [#allocation4], 0 }
   0xa   :  { %25 = vsyncpa [#allocation4 + $0x1], 0  ;;  %s4389_s29 = smov 0   ;;  %s4391_s30 = smov 0  }
   0xb   :  { %s4393_s15 = smov 0   ;;  %s4395_s16 = smov 0  }
   0xc   :  { %s4397_s17 = smov 0   ;;  %s4399_s18 = smov 0  }
   0xd LB: > { %5057 = sst [smem:[#allocation12_spill]] %s4268_s29  ;;  %s3678_s19 = sadd.s32 4294967295, %s4288_s18   ;;  %s4288_s18 = sphi %s4399_s18, %s31_s18   ;;  %s4284_s17 = sphi %s4397_s17, %s5083_s17   ;;  %s4280_s16 = sphi %s4395_s16, %s5082_s16   ;;  %s4276_s15 = sphi %s4393_s15, %s5086_s15   ;;  %s4272_s30 = sphi %s4391_s30, %s5085_s30   ;;  %s4268_s29 = sphi %s4389_s29, %s5084_s29  }
   0xe   : > { %5058 = sst [smem:[#allocation13_spill]] %s4280_s16  ;;  %s3679_s20 = sadd.s32 4294967294, %s4288_s18  }
   0xf   : > { %5059 = sst [smem:[#allocation14_spill]] %s4284_s17  ;;  %p63_p0 = scmp.ne.s32.totalorder %s4272_s30, %s4268_s29 }
  0x10   : > { %p4423_p1 = scmp.eq.s32.totalorder %s3678_s19, 0  ;;  %p4427_p2 = scmp.eq.s32.totalorder %s3678_s19, 1 }
  0x11   : > { %p368_p3 = scmp.eq.s32.totalorder %s3679_s20, 1  ;;  %p3680_p5 = scmp.ge.s32.totalorder %s4288_s18, 1 }
  0x12   : > { %s5060_s21 = scalar_select %p4423_p1, 1, 0 }
  0x13   : > { %p4433_p4 = por %p4423_p1, %p63_p0  ;;  %p4438_p6 = por %p368_p3, %p63_p0 }
  0x14   : > { %p375_p7 = scmp.lt.s32.totalorder %s4288_s18, 3  ;;  %s4290_s26 = smov [#allocation5]  }
  0x15   : > { %s5062_s23 = scalar_select %p4433_p4, 1, 0 }
  0x16   : > { %s5063_s24 = scalar_select %p4438_p6, 1, 0 }
  0x17   : > { %p4443_p8 = pnand %p3680_p5, %p375_p7  ;;  %s396_s27 = sshll.u32 %s4290_s26, 4  ;;  %s397_s27 = int_to_ptr.vmem [resolvable:$true] %s396_s27 }
  0x18   : > { %5064 = sst [smem:[#allocation15_spill]] %s5063_s24  ;;  %s4291_s19 = smov [#allocation7]  }
  0x19   : > { %p3996_p9 = pneg %p4443_p8  ;;  %s412_s20 = sshll.u32 %s4291_s19, 4  ;;  %s413_s20 = int_to_ptr.vmem [resolvable:$true] %s412_s20 }
  0x1a   : > { %s4135_s24 = scalar_lea.vmem %s397_s27, 512  ;;  %p4143_p5 = scmp.lt.s32.totalorder %s397_s27, %s397_s27 }
  0x1b   : > { %p4452_p11 = pnand %p3996_p9, %p4423_p1  ;;  %p4136_p13 = scmp.ne.s32.totalorder %s397_s27, %s4135_s24 }
  0x1c   : > { %p4144_p7 = scmp.lt.s32.totalorder %s4135_s24, %s4135_s24 }
  0x1d   : > { %p4126_p12 = pneg %p4452_p11 }
  0x1e   : > { %p4145_p10 = por %p4144_p7, %p4143_p5 }
  0x1f   : > { %p4138_p0 = pnand %p4136_p13, %p4126_p12 }
  0x21   : > { %p4139_p3 = pneg %p4138_p0 }
  0x23   : > { %p4146_p9 = pnand %p4145_p10, %p4139_p3 }
  0x25   : > { %4149 = shalt.err (!%p4146_p9)
}
  0x26   : > { %s4292_s26 = smov 128   ;;  %s4293_s29 = smov 8  }
  0x27   : > { %s5067_s4 = sld [smem:[#allocation17_spill]]  ;;  %s4161_s13 = scalar_lea.vmem %s413_s20, 512 }
  0x28   : > { %p4162_p6 = scmp.ne.s32.totalorder %s413_s20, %s4161_s13  ;;  %p4169_p1 = scmp.lt.s32.totalorder %s413_s20, %s413_s20 }
  0x29   : > { %p4170_p4 = scmp.lt.s32.totalorder %s4161_s13, %s4161_s13 }
  0x2a   : > { %p4164_p13 = pnand %p4162_p6, %p4126_p12 }
  0x2b   : > { %p4171_p5 = por %p4170_p4, %p4169_p1 }
  0x2c   : > { %p4165_p0 = pneg %p4164_p13 }
  0x2d   : > { %3999 = dma.hbm_to_vmem [thread:$0]  (!%p4452_p11), %s5067_s4, 512, %s397_s27, [#allocation6], %s4292_s26, %s4292_s26, %s4293_s29  }
  0x2e   : > { %p4172_p10 = pnand %p4171_p5, %p4165_p0 }
  0x30   : > { %4175 = shalt.err (!%p4172_p10)
}
  0x31   : > { %s5068_s6 = sld [smem:[#allocation18_spill]]  ;;  %s43_s13 = sadd.s32 1, %s4284_s17 }
  0x32   : > { %s50_s14 = sadd.s32 1, %s4276_s15  ;;  %p45_p1 = scmp.ge.s32.totalorder %s43_s13, 2 }
  0x33   : > { %p57_p4 = scmp.ne.s32.totalorder %s4276_s15, %s4272_s30  ;;  %p58_p6 = scmp.eq.s32.totalorder %s4288_s18, 0 }
  0x34   : > { %p4013_p12 = scmp.lt.s32.totalorder %s4288_s18, 2  ;;  %s5088_s13 = smov (%p45_p1, %s43_s13), 0 }
  0x35   : > { %5069 = sst [smem:[#allocation16_spill]] %s5088_s13  ;;  %p59_p3 = por %p58_p6, %p57_p4 }
  0x36   : > { %p4484_p7 = por %p4427_p2, %p57_p4  ;;  %s47_s27 = ssub.s32 %s4284_s17, %s5088_s13 }
  0x37   : > { %4002 = dma.hbm_to_vmem [thread:$0]  (!%p4452_p11), %s5068_s6, 512, %s413_s20, [#allocation6], %s4292_s26, %s4292_s26, %s4293_s29  }
  0x38   : > { %s447_s28 = sand.u32 1, %s4276_s15   ;;  %p48_p9 = scmp.eq.s32.totalorder %s47_s27, 0 }
  0x39   : > { %s3684_s29 = sshll.u32 %s447_s28, 3  ;;  %s3685_s20 = sshll.u32 %s4284_s17, 7 }
  0x3a   : > { %s4493_s26 = scalar_select %p48_p9, %s4276_s15, %s50_s14  }
  0x3b   : > { %s456_s4 = scalar_lea.hbm %s5029_s0, %s3685_s20  ;;  %s451_s6 = scalar_lea.vmem [#allocation2], %s3684_s29 }
  0x3c   : > { %s458_s16 = sshll.u32 %s451_s6, 4  ;;  %p4500_p11 = pnand %p4013_p12, %p59_p3  ;;  %s459_s16 = int_to_ptr.vmem [resolvable:$true] %s458_s16 }
  0x3d   : > { %s448_s13 = scalar_lea.sflag [#allocation3], %s447_s28  ;;  %s4189_s27 = scalar_lea.vmem %s459_s16, 128 }
  0x3e   : > { %p4178_p2 = pneg %p4500_p11  ;;  %p4190_p13 = scmp.ne.s32.totalorder %s459_s16, %s4189_s27 }
  0x3f   : > { %s4294_s14 = smov [#allocation2]  }
  0x40   : > { %p4192_p0 = pnand %p4190_p13, %p4178_p2  ;;  %s4194_s17 = sshll.u32 %s4294_s14, 4  ;;  %s4195_s17 = int_to_ptr.vmem [resolvable:$false] %s4194_s17 }
  0x41   : > { %s4196_s20 = scalar_lea.vmem %s4195_s17, 256  ;;  %p4197_p10 = scmp.lt.s32.totalorder %s459_s16, %s4195_s17 }
  0x42   : > { %p4193_p5 = pneg %p4192_p0  ;;  %p4198_p1 = scmp.lt.s32.totalorder %s4196_s20, %s4189_s27 }
  0x44   : > { %p4199_p4 = por %p4198_p1, %p4197_p10 }
  0x46   : > { %p4200_p6 = pnand %p4199_p4, %p4193_p5 }
  0x48   : > { %4203 = shalt.err (!%p4200_p6)
}
  0x49   : > { %4006 = dma.hbm_to_vmem [thread:$0]  (!%p4500_p11), %s456_s4, 128, %s459_s16, %s448_s13  }
  0x4a   : > { %467 = sbr.rel (%p4443_p8) target bundleno = 2523 (0x9db), region = 76  ;;  %s4511_s6 = sand.u32 (!%p4443_p8), 1, %s4272_s30  }
  0x4b   : > { %s3687_s28 = sshll.u32 (!%p4443_p8), %s4511_s6, 3  ;;  %s470_s29 = scalar_lea.sflag (!%p4443_p8), [#allocation3], %s4511_s6 }
  0x4c   : > { %s4517_s17 = scalar_lea.vmem (!%p4443_p8), [#allocation2], %s3687_s28  ;;  %p5072_p12 = scmp.ne.s32.totalorder (!%p4443_p8), %s5062_s23, 0 }
  0x4f   : > { %4255 = dma.done.wait (%p5072_p12), %s470_s29, 128  }
  0x50   : > { %4257 = vsyncadd (%p5072_p12), %s470_s29, 4294967168  ;;  %p5073_p3 = scmp.ne.s32.totalorder %s5060_s21, 0 }
  0x52   : > { %4259 = dma.done.wait (%p5073_p3), [#allocation6], 1024  }
  0x53   : > { %4261 = vsyncadd (%p5073_p3), [#allocation6], 4294966272  ;;  %v4295_v0 = vmov 0.0   ;;  %vm4296_vm0 = vmmov 0   ;;  %v533_v1 = vld [vmem:[%s5030_s1 + $0x18] sm:$0xff]  ;;  %v532_v2 = vld [vmem:[%s5030_s1 + $0x10] sm:$0xff]  ;;  %v786_v22 = vlaneseq }
  0x54   : > { %3830 = vmatprep.subr.mxu1 %v4295_v0  ;;  %3838 = vmatprep.mubr.msk.f32.mxu1 %vm4296_vm0, %v4295_v0  ;;  %v531_v3 = vld [vmem:[%s5030_s1 + $0x8] sm:$0xff]  ;;  %v688_v4 = vld [vmem:[%s5032_s3 + $0x18] sm:$0xff]  ;;  %v687_v5 = vld [vmem:[%s5032_s3 + $0x10] sm:$0xff]  ;;  %vm534_vm1 = vcmask 261120   ;;  %s4297_s20 = smov 120   ;;  %s4298_s29 = smov 124  }
  0x55   : > { %3852 = vmatprep.subr.mxu0 %v4295_v0  ;;  %3860 = vmatprep.mubr.msk.f32.mxu0 %vm4296_vm0, %v4295_v0  ;;  %v530_v6 = vld [vmem:[%s5030_s1] sm:$0xff]  ;;  %v611_v8 = vld [vmem:[%s5031_s2 + $0x18] sm:$0xff]  ;;  %v686_v9 = vld [vmem:[%s5032_s3 + $0x8] sm:$0xff]  ;;  %s4299_s4 = smov 116   ;;  %s4300_s16 = smov 108   ;;  %v787_v26 = vshrl.u32 %v786_v22, 7 }
  0x56   : > { %3831 = vmatpush3.msra.mxu1 %v533_v1  ;;  %3853 = vmatpush3.msra.mxu0 %v688_v4  ;;  %v529_v7 = vld [vmem:[%s4517_s17] sm:$0xff]  ;;  %v610_v10 = vld [vmem:[%s5031_s2 + $0x10] sm:$0xff]  ;;  %s4301_s23 = smov 112   ;;  %s4302_s21 = smov 100   ;;  %v4304_v20 = vmov 1983009808  }
  0x57   : > { %3832 = vmatprep.subr.mxu1 %v4295_v0  ;;  %3854 = vmatprep.subr.mxu0 %v4295_v0  ;;  %v685_v11 = vld [vmem:[%s5032_s3] sm:$0xff]  ;;  %v609_v12 = vld [vmem:[%s5031_s2 + $0x8] sm:$0xff]  ;;  %s4303_s25 = smov 104   ;;  %v784_v21 = vunpack.c.l.s4 %v4304_v20  ;;  %v4305_v23 = vmov 1934713408   ;;  %vm1641_vm2 = vcmask 31744  }
  0x58   : > { %3833 = vmatpush3.msra.mxu1 %v532_v2  ;;  %3855 = vmatpush3.msra.mxu0 %v687_v5  ;;  %v608_v13 = vld [vmem:[%s5031_s2] sm:$0xff]  ;;  %v848_v24 = vunpack.c.l.s4 %v4305_v23  ;;  %vm2258_vm3 = vcmask 64512   ;;  %s4306_s13 = smov 8   ;;  %s4307_s19 = smov 4   ;;  %vm3233_vm4 = vcmask 97280   ;;  %vm3235_vm5 = vcmask 130048  }
  0x59   : > { %3834 = vmatprep.subr.mxu1 %v4295_v0  ;;  %3856 = vmatprep.subr.mxu0 %v4295_v0  ;;  %v785_v25 = vunpack.c.0.s8 %v784_v21  ;;  %s4308_s24 = smov 12   ;;  %s4309_s22 = smov 20   ;;  %vm3237_vm6 = vcmask 162816   ;;  %vm3239_vm7 = vcmask 195584   ;;  %vm3241_vm8 = vcmask 228352  }
  0x5a   : > { %3835 = vmatpush3.msra.mxu1 %v531_v3  ;;  %3857 = vmatpush3.msra.mxu0 %v686_v9  ;;  %v849_v29 = vunpack.c.0.s8 %v848_v24  ;;  %s4310_s27 = smov 16   ;;  %s4311_s14 = smov 28   ;;  %vm3458_vm9 = vcmask 523264  }
  0x5b   : > { %3836 = vmatprep.subr.mxu1 %v4295_v0  ;;  %3858 = vmatprep.subr.mxu0 %v4295_v0  ;;  %v4613_v30 = vsub.s32 %v785_v25, %v787_v26 }
  0x5c   : > { %3837 = vmatpush3.msra.mxu1 %v530_v6  ;;  %3859 = vmatpush3.msra.mxu0 %v685_v11  ;;  %v4615_v36 = vsub.s32 %v849_v29, %v787_v26 }
  0x5d   : > { %3839 = vmatmul.mubr.msk.f32.vlgmr.msra.gmra.mxu1 %vm534_vm1, %v529_v7  ;;  %3841 = vmatprep.subr.mxu1 %v4295_v0 }
  0x5e   : > { %3842 = vmatpush3.msra.mxu1 %v611_v8  ;;  %3849 = vmatprep.mubr.msk.f32.mxu1 %vm4296_vm0, %v4295_v0 }
  0x5f   : > { %3843 = vmatprep.subr.mxu1 %v4295_v0  ;;  %3861 = vmatmul.mubr.msk.f32.vlgmr.msra.gmra.mxu0 %vm534_vm1, %v529_v7 }
  0x60   : > { %3844 = vmatpush3.msra.mxu1 %v610_v10  ;;  %3873 = vmatprep.subr.mxu0 %v4295_v0 }
  0x61   : > { %3845 = vmatprep.subr.mxu1 %v4295_v0  ;;  %3875 = vmatprep.mubr.msk.f32.mxu0 %vm4296_vm0, %v4295_v0 }
  0x62   : > { %3846 = vmatpush3.msra.mxu1 %v609_v12 }
  0x63   : > { %3847 = vmatprep.subr.mxu1 %v4295_v0 }
  0x64   : > { %3848 = vmatpush3.msra.mxu1 %v608_v13 }
  0x65   : > { %3850 = vmatmul.mubr.msk.f32.vlgmr.msra.gmra.mxu1 %vm534_vm1, %v529_v7  ;;  %3863 = vmatprep.subr.mxu1 %v4295_v0 }
  0x66   : > { %3865 = vmatprep.mubr.msk.f32.mxu1 %vm4296_vm0, %v4295_v0 }
 0x11d   : > { %v604_v14 = vpop.f32.mrf.mxu1 }
 0x11e   : > { %763 = vrot.lane.b32.xlu0 %v604_v14, %s4297_s20  ;;  %760 = vrot.lane.b32.xlu1 %v604_v14, %s4298_s29 }
 0x11f   : > { %v3840_v15 = vpop.f32.mrf.mxu1  ;;  %v4608_v18 = vpop.f32.mrf.mxu0 }
 0x121   : > { %v3862_v19 = vpop.f32.mrf.mxu0 }
 0x122   : > { %766 = vrot.lane.b32.xlu1 %v604_v14, %s4299_s4 }
 0x125   : > { %v4591_v16 = vpop.f32.mrf.mxu1 }
 0x126   : > { %1060 = vrot.lane.b32.xlu1 %v4591_v16, %s4299_s4  ;;  %1054 = vrot.lane.b32.xlu0 %v4591_v16, %s4298_s29 }
 0x127   : > { %v3851_v17 = vpop.f32.mrf.mxu1 }
 0x12a   : > { %772 = vrot.lane.b32.xlu1 %v604_v14, %s4300_s16  ;;  %1057 = vrot.lane.b32.xlu0 %v4591_v16, %s4297_s20 }
 0x12e   : > { %1066 = vrot.lane.b32.xlu1 %v4591_v16, %s4300_s16  ;;  %769 = vrot.lane.b32.xlu0 %v604_v14, %s4301_s23 }
 0x132   : > { %1072 = vrot.lane.b32.xlu1 %v4591_v16, %s4302_s21  ;;  %1063 = vrot.lane.b32.xlu0 %v4591_v16, %s4301_s23 }
 0x136   : > { %778 = vrot.lane.b32.xlu1 %v604_v14, %s4302_s21  ;;  %1069 = vrot.lane.b32.xlu0 %v4591_v16, %s4303_s25 }
 0x13a   : > { %775 = vrot.lane.b32.xlu0 %v604_v14, %s4303_s25  ;;  %1348 = vrot.lane.b32.xlu1 %v4608_v18, %s4298_s29 }
 0x13e   : > { %1351 = vrot.lane.b32.xlu0 %v4608_v18, %s4297_s20  ;;  %1354 = vrot.lane.b32.xlu1 %v4608_v18, %s4299_s4  ;;  %s4312_s20 = smov 24   ;;  %s5075_s4 = sld [smem:[#allocation19_spill]] }
 0x190   : > { %v764_v27 = vpop.permute.xlu0 %763  ;;  %v761_v28 = vpop.permute.xlu1 %760 }
 0x191   : > { %v781_v31 = vcombine.low %v604_v14, %v764_v27  ;;  %v782_v32 = vcombine.high %v604_v14, %v764_v27 }
 0x193   : > { %v789_v37 = vrot.slane %v781_v31, %v4613_v30  ;;  %v796_v38 = vrot.slane %v782_v32, %v4613_v30 }
 0x194   : > { %v767_v33 = vpop.permute.xlu1 %766 }
 0x195   : > { %v797_v34 = vcombine.low %v761_v28, %v767_v33  ;;  %v798_v35 = vcombine.high %v761_v28, %v767_v33 }
 0x197   : > { %v805_v39 = vrot.slane %v797_v34, %v4613_v30  ;;  %v812_v40 = vrot.slane %v798_v35, %v4613_v30 }
 0x198   : > { %v1061_v41 = vpop.permute.xlu1 %1060  ;;  %v1055_v42 = vpop.permute.xlu0 %1054 }
 0x199   : > { %v845_v43 = vcombine.low %v789_v37, %v805_v39  ;;  %v846_v44 = vcombine.high %v789_v37, %v805_v39  ;;  %v861_v45 = vcombine.low %v796_v38, %v812_v40  ;;  %v862_v46 = vcombine.high %v796_v38, %v812_v40 }
 0x19a   : > { %v1091_v51 = vcombine.low %v1055_v42, %v1061_v41  ;;  %v1092_v52 = vcombine.high %v1055_v42, %v1061_v41 }
 0x19b   : > { %v853_v47 = vrot.slane %v845_v43, %v4615_v36  ;;  %v860_v48 = vrot.slane %v846_v44, %v4615_v36  ;;  %v869_v49 = vrot.slane %v861_v45, %v4615_v36  ;;  %v876_v50 = vrot.slane %v862_v46, %v4615_v36 }
 0x19c   : > { %v4625_v53 = vpop.permute.xlu1 %772  ;;  %v1058_v54 = vpop.permute.xlu0 %1057  ;;  %v1099_v2 = vrot.slane %v1091_v51, %v4613_v30  ;;  %v1106_v3 = vrot.slane %v1092_v52, %v4613_v30 }
 0x19d   : > { %v3694_v55 = vcombine.low %v853_v47, %v860_v48  ;;  %v3696_v56 = vcombine.high %v853_v47, %v860_v48  ;;  %v3698_v57 = vcombine.low %v869_v49, %v876_v50  ;;  %v3700_v58 = vcombine.high %v869_v49, %v876_v50 }
 0x19e   : > { %v1075_v59 = vcombine.low %v4591_v16, %v1058_v54  ;;  %v1076_v60 = vcombine.high %v4591_v16, %v1058_v54 }
 0x19f   : > { %v925_v61 = vrot.slane %v3694_v55, %v4613_v30  ;;  %v941_v62 = vrot.slane %v3696_v56, %v4613_v30  ;;  %v957_v63 = vrot.slane %v3698_v57, %v4613_v30  ;;  %v973_v1 = vrot.slane %v3700_v58, %v4613_v30 }
 0x1a0   : > { %v1083_v4 = vrot.slane %v1075_v59, %v4613_v30  ;;  %v1090_v5 = vrot.slane %v1076_v60, %v4613_v30  ;;  %v1067_v6 = vpop.permute.xlu1 %1066  ;;  %v4637_v7 = vpop.permute.xlu0 %769 }
 0x1a1   : > { %v981_v8 = vcombine.low %v925_v61, %v941_v62  ;;  %v982_v9 = vcombine.high %v925_v61, %v941_v62  ;;  %v1013_v10 = vcombine.low %v957_v63, %v973_v1  ;;  %v1014_v11 = vcombine.high %v957_v63, %v973_v1 }
 0x1a2   : > { %v1139_v12 = vcombine.low %v1083_v4, %v1099_v2  ;;  %v1140_v13 = vcombine.high %v1083_v4, %v1099_v2  ;;  %v1155_v14 = vcombine.low %v1090_v5, %v1106_v3  ;;  %v1156_v15 = vcombine.high %v1090_v5, %v1106_v3 }
 0x1a3   : > { %v4640_v16 = vrot.slane %v981_v8, %v4615_v36  ;;  %v4643_v17 = vrot.slane %v1013_v10, %v4615_v36  ;;  %v4646_v19 = vrot.slane %v982_v9, %v4615_v36  ;;  %v4649_v20 = vrot.slane %v1014_v11, %v4615_v36 }
 0x1a4   : > { %v1147_v21 = vrot.slane %v1139_v12, %v4615_v36  ;;  %v1154_v22 = vrot.slane %v1140_v13, %v4615_v36  ;;  %v1163_v23 = vrot.slane %v1155_v14, %v4615_v36  ;;  %v1170_v24 = vrot.slane %v1156_v15, %v4615_v36  ;;  %v1073_v25 = vpop.permute.xlu1 %1072  ;;  %v1064_v26 = vpop.permute.xlu0 %1063 }
 0x1a5   : > { %v1123_v27 = vcombine.low %v1067_v6, %v1073_v25  ;;  %v1124_v28 = vcombine.high %v1067_v6, %v1073_v25  ;;  %v1045_v29 = vcombine.low %v4640_v16, %v4643_v17  ;;  %v1047_v38 = vcombine.low %v4646_v19, %v4649_v20 }
 0x1a6   : > { %v3702_v31 = vcombine.low %v1147_v21, %v1154_v22  ;;  %v3704_v32 = vcombine.high %v1147_v21, %v1154_v22  ;;  %v3706_v33 = vcombine.low %v1163_v23, %v1170_v24  ;;  %v3708_v34 = vcombine.high %v1163_v23, %v1170_v24 }
 0x1a7   : > { %v1131_v35 = vrot.slane %v1123_v27, %v4613_v30  ;;  %v1138_v37 = vrot.slane %v1124_v28, %v4613_v30  ;;  %v1046_v39 = vcombine.high %v4640_v16, %v4643_v17 }
 0x1a8   : > { %v1219_v40 = vrot.slane %v3702_v31, %v4613_v30  ;;  %v1235_v41 = vrot.slane %v3704_v32, %v4613_v30  ;;  %v1251_v42 = vrot.slane %v3706_v33, %v4613_v30  ;;  %v1267_v43 = vrot.slane %v3708_v34, %v4613_v30  ;;  %v779_v44 = vpop.permute.xlu1 %778  ;;  %v1070_v45 = vpop.permute.xlu0 %1069 }
 0x1a9   : > { %v829_v46 = vcombine.low %v4625_v53, %v779_v44  ;;  %v830_v47 = vcombine.high %v4625_v53, %v779_v44  ;;  %v1107_v48 = vcombine.low %v1064_v26, %v1070_v45  ;;  %v1108_v49 = vcombine.high %v1064_v26, %v1070_v45 }
 0x1aa   : > { %v1275_v50 = vcombine.low %v1219_v40, %v1235_v41  ;;  %v1276_v51 = vcombine.high %v1219_v40, %v1235_v41  ;;  %v1307_v52 = vcombine.low %v1251_v42, %v1267_v43  ;;  %v1308_v54 = vcombine.high %v1251_v42, %v1267_v43 }
 0x1ab   : > { %v837_v55 = vrot.slane %v829_v46, %v4613_v30  ;;  %v844_v56 = vrot.slane %v830_v47, %v4613_v30  ;;  %v1115_v57 = vrot.slane %v1107_v48, %v4613_v30  ;;  %v1122_v58 = vrot.slane %v1108_v49, %v4613_v30 }
 0x1ac   : > { %v776_v59 = vpop.permute.xlu0 %775  ;;  %v1283_v60 = vrot.slane %v1275_v50, %v4615_v36  ;;  %v1315_v61 = vrot.slane %v1307_v52, %v4615_v36  ;;  %v1290_v53 = vrot.slane %v1276_v51, %v4615_v36  ;;  %v1322_v62 = vrot.slane %v1308_v54, %v4615_v36  ;;  %v1349_v50 = vpop.permute.xlu1 %1348 }
 0x1ad   : > { %v1171_v63 = vcombine.low %v1115_v57, %v1131_v35  ;;  %v1172_v1 = vcombine.high %v1115_v57, %v1131_v35  ;;  %v1187_v2 = vcombine.low %v1122_v58, %v1138_v37  ;;  %v1188_v3 = vcombine.high %v1122_v58, %v1138_v37 }
 0x1ae   : > { %v813_v4 = vcombine.low %v4637_v7, %v776_v59  ;;  %v814_v5 = vcombine.high %v4637_v7, %v776_v59  ;;  %v1339_v6 = vcombine.low %v1283_v60, %v1315_v61  ;;  %v1341_v8 = vcombine.low %v1290_v53, %v1322_v62 }
 0x1af   : > { %v1179_v9 = vrot.slane %v1171_v63, %v4615_v36  ;;  %v1186_v10 = vrot.slane %v1172_v1, %v4615_v36  ;;  %v1195_v11 = vrot.slane %v1187_v2, %v4615_v36  ;;  %v1202_v12 = vrot.slane %v1188_v3, %v4615_v36 }
 0x1b0   : > { %v821_v13 = vrot.slane %v813_v4, %v4613_v30  ;;  %v828_v14 = vrot.slane %v814_v5, %v4613_v30  ;;  %3864 = vmatpush3.xpose.msk.msra.mxu1 %vm1641_vm2, %v1339_v6  ;;  %3874 = vmatpush3.xpose.msk.msra.mxu0 %vm1641_vm2, %v1341_v8  ;;  %v1340_v15 = vcombine.high %v1283_v60, %v1315_v61 }
 0x1b1   : > { %v3703_v7 = vcombine.low %v1179_v9, %v1186_v10  ;;  %v3705_v21 = vcombine.high %v1179_v9, %v1186_v10  ;;  %v3707_v22 = vcombine.low %v1195_v11, %v1202_v12  ;;  %v3709_v23 = vcombine.high %v1195_v11, %v1202_v12  ;;  %3868 = vmatprep.subr.mxu1 %v4295_v0 }
 0x1b2   : > { %v877_v24 = vcombine.low %v821_v13, %v837_v55  ;;  %v878_v25 = vcombine.high %v821_v13, %v837_v55  ;;  %v893_v26 = vcombine.low %v828_v14, %v844_v56  ;;  %v894_v27 = vcombine.high %v828_v14, %v844_v56  ;;  %3883 = vmatprep.subr.mxu0 %v4295_v0  ;;  %v1352_v56 = vpop.permute.xlu0 %1351 }
 0x1b3   : > { %v1226_v28 = vrot.slane %v3703_v7, %v4613_v30  ;;  %v1242_v31 = vrot.slane %v3705_v21, %v4613_v30  ;;  %v1258_v32 = vrot.slane %v3707_v22, %v4613_v30  ;;  %v1274_v33 = vrot.slane %v3709_v23, %v4613_v30  ;;  %3866 = vmatmul.mubr.msk.f32.vlgmr.msra.gmra.mxu1 %vm1641_vm2, %v1045_v29 }
 0x1b4   : > { %v885_v34 = vrot.slane %v877_v24, %v4615_v36  ;;  %v892_v35 = vrot.slane %v878_v25, %v4615_v36  ;;  %v901_v37 = vrot.slane %v893_v26, %v4615_v36  ;;  %v908_v40 = vrot.slane %v894_v27, %v4615_v36  ;;  %3876 = vmatmul.mubr.msk.f32.vlgmr.msra.gmra.mxu0 %vm1641_vm2, %v1047_v38 }
 0x1b5   : > { %v1291_v41 = vcombine.low %v1226_v28, %v1242_v31  ;;  %v1292_v42 = vcombine.high %v1226_v28, %v1242_v31  ;;  %v1323_v43 = vcombine.low %v1258_v32, %v1274_v33  ;;  %v1324_v44 = vcombine.high %v1258_v32, %v1274_v33  ;;  %3869 = vmatpush3.xpose.msk.msra.mxu1 %vm1641_vm2, %v1340_v15 }
 0x1b6   : > { %v3695_v45 = vcombine.low %v885_v34, %v892_v35  ;;  %v3697_v46 = vcombine.high %v885_v34, %v892_v35  ;;  %v3699_v47 = vcombine.low %v901_v37, %v908_v40  ;;  %v3701_v29 = vcombine.high %v901_v37, %v908_v40  ;;  %3870 = vmatprep.mubr.msk.f32.mxu1 %vm4296_vm0, %v4295_v0 }
 0x1b7   : > { %3878 = vmatprep.subr.mxu1 %v4295_v0  ;;  %v1342_v48 = vcombine.high %v1290_v53, %v1322_v62  ;;  %v1299_v49 = vrot.slane %v1291_v41, %v4615_v36  ;;  %v1331_v38 = vrot.slane %v1323_v43, %v4615_v36  ;;  %3885 = vmatprep.mubr.msk.f32.mxu0 %vm4296_vm0, %v4295_v0 }
 0x1b8   : > { %v932_v51 = vrot.slane %v3695_v45, %v4613_v30  ;;  %v948_v52 = vrot.slane %v3697_v46, %v4613_v30  ;;  %v964_v54 = vrot.slane %v3699_v47, %v4613_v30  ;;  %v980_v55 = vrot.slane %v3701_v29, %v4613_v30  ;;  %3871 = vmatmul.mubr.msk.f32.vlgmr.msra.gmra.mxu1 %vm1641_vm2, %v1046_v39  ;;  %v1355_v39 = vpop.permute.xlu1 %1354 }
 0x1b9   : > { %3879 = vmatpush3.xpose.msk.msra.mxu1 %vm1641_vm2, %v1342_v48  ;;  %3880 = vmatprep.mubr.msk.f32.mxu1 %vm4296_vm0, %v4295_v0  ;;  %v1048_v57 = vcombine.high %v4646_v19, %v4649_v20  ;;  %v1343_v58 = vcombine.low %v1299_v49, %v1331_v38  ;;  %v1344_v59 = vcombine.high %v1299_v49, %v1331_v38 }
 0x1ba   : > { %v997_v60 = vcombine.low %v932_v51, %v948_v52  ;;  %v998_v61 = vcombine.high %v932_v51, %v948_v52  ;;  %v1029_v53 = vcombine.low %v964_v54, %v980_v55  ;;  %v1030_v62 = vcombine.high %v964_v54, %v980_v55  ;;  %3888 = vmatprep.subr.mxu1 %v4295_v0 }
 0x1bb   : > { %3884 = vmatpush3.xpose.msk.msra.mxu0 %vm1641_vm2, %v1343_v58  ;;  %v1306_v16 = vrot.slane %v1292_v42, %v4615_v36  ;;  %v1338_v17 = vrot.slane %v1324_v44, %v4615_v36  ;;  %v1369_v63 = vcombine.low %v4608_v18, %v1352_v56  ;;  %v1370_v1 = vcombine.high %v4608_v18, %v1352_v56 }
 0x1bc   : > { %3881 = vmatmul.mubr.msk.f32.vlgmr.msra.gmra.mxu1 %vm1641_vm2, %v1048_v57  ;;  %3893 = vmatprep.subr.mxu0 %v4295_v0  ;;  %v1005_v19 = vrot.slane %v997_v60, %v4615_v36  ;;  %v1037_v20 = vrot.slane %v1029_v53, %v4615_v36  ;;  %v1012_v2 = vrot.slane %v998_v61, %v4615_v36 }
 0x1bd   : > { %3889 = vmatpush3.xpose.msk.msra.mxu1 %vm1641_vm2, %v1344_v59  ;;  %3890 = vmatprep.mubr.msk.f32.mxu1 %vm4296_vm0, %v4295_v0  ;;  %v1044_v3 = vrot.slane %v1030_v62, %v4615_v36  ;;  %v1385_v6 = vcombine.low %v1349_v50, %v1355_v39  ;;  %v1386_v8 = vcombine.high %v1349_v50, %v1355_v39 }
 0x1be   : > { %3898 = vmatprep.subr.mxu1 %v4295_v0  ;;  %v1049_v4 = vcombine.low %v1005_v19, %v1037_v20  ;;  %v1050_v5 = vcombine.high %v1005_v19, %v1037_v20  ;;  %v1345_v9 = vcombine.low %v1306_v16, %v1338_v17  ;;  %v1346_v10 = vcombine.high %v1306_v16, %v1338_v17 }
 0x1bf   : > { %v1377_v11 = vrot.slane %v1369_v63, %v4613_v30  ;;  %v1384_v12 = vrot.slane %v1370_v1, %v4613_v30  ;;  %v1393_v13 = vrot.slane %v1385_v6, %v4613_v30  ;;  %v1400_v14 = vrot.slane %v1386_v8, %v4613_v30 }
 0x1c0   : > { %3886 = vmatmul.mubr.msk.f32.vlgmr.msra.gmra.mxu0 %vm1641_vm2, %v1049_v4  ;;  %3891 = vmatmul.mubr.msk.f32.vlgmr.msra.gmra.mxu1 %vm1641_vm2, %v1050_v5  ;;  %v1051_v15 = vcombine.low %v1012_v2, %v1044_v3  ;;  %v1052_v7 = vcombine.high %v1012_v2, %v1044_v3 }
 0x1c1   : > { %3894 = vmatpush3.xpose.msk.msra.mxu0 %vm1641_vm2, %v1345_v9  ;;  %3899 = vmatpush3.xpose.msk.msra.mxu1 %vm1641_vm2, %v1346_v10  ;;  %v1433_v21 = vcombine.low %v1377_v11, %v1393_v13  ;;  %v1434_v22 = vcombine.high %v1377_v11, %v1393_v13  ;;  %v1449_v23 = vcombine.low %v1384_v12, %v1400_v14 }
 0x1c2   : > { %3895 = vmatprep.mubr.msk.f32.mxu0 %vm4296_vm0, %v4295_v0  ;;  %3900 = vmatprep.mubr.msk.f32.mxu1 %vm4296_vm0, %v4295_v0  ;;  %v1450_v24 = vcombine.high %v1384_v12, %v1400_v14 }
 0x1c3   : > { %3903 = vmatprep.subr.mxu0 %v4295_v0  ;;  %3908 = vmatprep.subr.mxu1 %v4295_v0  ;;  %v1441_v25 = vrot.slane %v1433_v21, %v4615_v36  ;;  %v1448_v26 = vrot.slane %v1434_v22, %v4615_v36  ;;  %v1457_v27 = vrot.slane %v1449_v23, %v4615_v36 }
 0x1c4   : > { %3896 = vmatmul.mubr.msk.f32.vlgmr.msra.gmra.mxu0 %vm1641_vm2, %v1051_v15  ;;  %3901 = vmatmul.mubr.msk.f32.vlgmr.msra.gmra.mxu1 %vm1641_vm2, %v1052_v7  ;;  %v1464_v28 = vrot.slane %v1450_v24, %v4615_v36 }
 0x1c5   : > { %3905 = vmatprep.mubr.msk.f32.mxu0 %vm4296_vm0, %v4295_v0  ;;  %3910 = vmatprep.mubr.msk.f32.mxu1 %vm4296_vm0, %v4295_v0  ;;  %v3710_v31 = vcombine.low %v1441_v25, %v1448_v26  ;;  %v3712_v32 = vcombine.high %v1441_v25, %v1448_v26 }
 0x1c6   : > { %v3714_v33 = vcombine.low %v1457_v27, %v1464_v28  ;;  %v3716_v34 = vcombine.high %v1457_v27, %v1464_v28 }
 0x1c7   : > { %v1513_v35 = vrot.slane %v3710_v31, %v4613_v30  ;;  %v1529_v37 = vrot.slane %v3712_v32, %v4613_v30 }
 0x1c8   : > { %v1545_v40 = vrot.slane %v3714_v33, %v4613_v30  ;;  %v1561_v41 = vrot.slane %v3716_v34, %v4613_v30 }
 0x1c9   : > { %v1569_v42 = vcombine.low %v1513_v35, %v1529_v37  ;;  %v1570_v29 = vcombine.high %v1513_v35, %v1529_v37 }
 0x1ca   : > { %v1601_v43 = vcombine.low %v1545_v40, %v1561_v41  ;;  %v1602_v48 = vcombine.high %v1545_v40, %v1561_v41 }
 0x1cb   : > { %v1577_v44 = vrot.slane %v1569_v42, %v4615_v36  ;;  %v4772_v49 = vrot.slane %v1570_v29, %v4615_v36 }
 0x1cc   : > { %v1609_v45 = vrot.slane %v1601_v43, %v4615_v36  ;;  %v4775_v38 = vrot.slane %v1602_v48, %v4615_v36 }
 0x1ce   : > { %v1633_v46 = vcombine.low %v1577_v44, %v1609_v45  ;;  %v1634_v47 = vcombine.high %v1577_v44, %v1609_v45  ;;  %v1635_v50 = vcombine.low %v4772_v49, %v4775_v38  ;;  %v1636_v51 = vcombine.high %v4772_v49, %v4775_v38 }
 0x1d0   : > { %3904 = vmatpush3.msra.mxu0 %v1633_v46  ;;  %3909 = vmatpush3.msra.mxu1 %v1634_v47 }
 0x1d1   : > { %3913 = vmatprep.subr.mxu0 %v4295_v0  ;;  %3918 = vmatprep.subr.mxu1 %v4295_v0 }
 0x273   : > { %v1714_v52 = vpop.f32.mrf.mxu1 }
 0x274   : > { %v2250_v54 = vmul.f32 0.5, %v1714_v52  ;;  %v1866_v55 = vpop.f32.mrf.mxu0 }
 0x275   : > { %v3867_v56 = vpop.f32.mrf.mxu1  ;;  %v2252_v57 = vmul.f32 0.5, %v1866_v55 }
 0x276   : > { %v3877_v58 = vpop.f32.mrf.mxu0  ;;  %v2259_v59 = vsel %vm2258_vm3, %v2250_v54, -inf }
 0x277   : > { %2260 = vmax.xlane.f32.xlu0 %v2259_v59  ;;  %v2265_v62 = vsel %vm2258_vm3, %v2252_v57, -inf }
 0x278   : > { %v1790_v60 = vpop.f32.mrf.mxu1 }
 0x279   : > { %v2251_v61 = vmul.f32 0.5, %v1790_v60 }
 0x27a   : > { %v3872_v53 = vpop.f32.mrf.mxu1 }
 0x27b   : > { %2266 = vmax.xlane.f32.xlu0 %v2265_v62  ;;  %v2262_v16 = vsel %vm2258_vm3, %v2251_v61, -inf }
 0x27c   : > { %2263 = vmax.xlane.f32.xlu1 %v2262_v16  ;;  %v1942_v17 = vpop.f32.mrf.mxu1 }
 0x27d   : > { %v2253_v39 = vmul.f32 0.5, %v1942_v17 }
 0x27e   : > { %v3882_v63 = vpop.f32.mrf.mxu1 }
 0x27f   : > { %v2268_v1 = vsel %vm2258_vm3, %v2253_v39, -inf }
 0x280   : > { %2269 = vmax.xlane.f32.xlu0 %v2268_v1  ;;  %v2018_v19 = vpop.f32.mrf.mxu0  ;;  %v2094_v20 = vpop.f32.mrf.mxu1 }
 0x281   : > { %v2254_v2 = vmul.f32 0.5, %v2018_v19  ;;  %v2255_v3 = vmul.f32 0.5, %v2094_v20 }
 0x282   : > { %v3887_v4 = vpop.f32.mrf.mxu0  ;;  %v3892_v5 = vpop.f32.mrf.mxu1 }
 0x283   : > { %v2271_v6 = vsel %vm2258_vm3, %v2254_v2, -inf  ;;  %v2274_v8 = vsel %vm2258_vm3, %v2255_v3, -inf }
 0x284   : > { %v2170_v9 = vpop.f32.mrf.mxu0  ;;  %2272 = vmax.xlane.f32.xlu1 %v2271_v6  ;;  %2275 = vmax.xlane.f32.xlu0 %v2274_v8  ;;  %v2246_v10 = vpop.f32.mrf.mxu1 }
 0x285   : > { %v2256_v11 = vmul.f32 0.5, %v2170_v9  ;;  %v2257_v12 = vmul.f32 0.5, %v2246_v10 }
 0x286   : > { %v3897_v13 = vpop.f32.mrf.mxu0  ;;  %v3902_v14 = vpop.f32.mrf.mxu1 }
 0x287   : > { %v2277_v15 = vsel %vm2258_vm3, %v2256_v11, -inf  ;;  %v2280_v7 = vsel %vm2258_vm3, %v2257_v12, -inf }
 0x288   : > { %2278 = vmax.xlane.f32.xlu1 %v2277_v15  ;;  %2281 = vmax.xlane.f32.xlu0 %v2280_v7 }
 0x299   : > { %1360 = vrot.lane.b32.xlu1 %v4608_v18, %s4300_s16 }
 0x29e   : > { %1357 = vrot.lane.b32.xlu0 %v4608_v18, %s4301_s23  ;;  %s5076_s23 = sld [smem:[#allocation20_spill]] }
 0x300   : > { %v2261_v21 = vpop.xlane.xlu0 %2260 }
 0x301   : > { %v2283_v22 = vsub.f32 %v2250_v54, %v2261_v21 }
 0x303   : > { %v2291_v23 = vmul.f32 1.442695, %v2283_v22 }
 0x304   : > { %v2267_v24 = vpop.xlane.xlu0 %2266 }
 0x305   : > { %4087 = vpow2.f32 %v2291_v23  ;;  %v2285_v25 = vsub.f32 %v2252_v57, %v2267_v24  ;;  %v2264_v26 = vpop.xlane.xlu1 %2263 }
 0x306   : > { %v2284_v27 = vsub.f32 %v2251_v61, %v2264_v26 }
 0x307   : > { %v2295_v28 = vmul.f32 1.442695, %v2285_v25 }
 0x308   : > { %v2293_v31 = vmul.f32 1.442695, %v2284_v27 }
 0x309   : > { %4089 = vpow2.f32 %v2295_v28  ;;  %v2270_v32 = vpop.xlane.xlu0 %2269 }
 0x30a   : > { %4091 = vpow2.f32 %v2293_v31  ;;  %v2286_v33 = vsub.f32 %v2253_v39, %v2270_v32 }
 0x30c   : > { %v2297_v34 = vmul.f32 1.442695, %v2286_v33 }
 0x30d   : > { %v2273_v35 = vpop.xlane.xlu1 %2272  ;;  %v2276_v37 = vpop.xlane.xlu0 %2275 }
 0x30e   : > { %4093 = vpow2.f32 %v2297_v34  ;;  %v2287_v40 = vsub.f32 %v2254_v2, %v2273_v35  ;;  %v2288_v41 = vsub.f32 %v2255_v3, %v2276_v37 }
 0x310   : > { %v2299_v42 = vmul.f32 1.442695, %v2287_v40  ;;  %v2301_v43 = vmul.f32 1.442695, %v2288_v41 }
 0x311   : > { %v2279_v44 = vpop.xlane.xlu1 %2278  ;;  %v2282_v45 = vpop.xlane.xlu0 %2281 }
 0x312   : > { %v4088_v46 = vpop.eup %4087  ;;  %4095 = vpow2.f32 %v2299_v42  ;;  %v2289_v47 = vsub.f32 %v2256_v11, %v2279_v44  ;;  %v2290_v29 = vsub.f32 %v2257_v12, %v2282_v45 }
 0x313   : > { %4097 = vpow2.f32 %v2301_v43  ;;  %v2307_v48 = vsel %vm2258_vm3, %v4088_v46, 0.0 }
 0x314   : > { %v2303_v52 = vmul.f32 1.442695, %v2289_v47  ;;  %v2305_v54 = vmul.f32 1.442695, %v2290_v29  ;;  %2308 = vadd.xlane.f32.xlu1 %v2307_v48 }
 0x315   : > { %v1361_v19 = vpop.permute.xlu1 %1360  ;;  %v1358_v2 = vpop.permute.xlu0 %1357 }
 0x316   : > { %v4090_v55 = vpop.eup %4089  ;;  %4099 = vpow2.f32 %v2303_v52 }
 0x317   : > { %v4092_v56 = vpop.eup %4091  ;;  %4101 = vpow2.f32 %v2305_v54  ;;  %v2313_v57 = vsel %vm2258_vm3, %v4090_v55, 0.0 }
 0x318   : > { %2314 = vadd.xlane.f32.xlu1 %v2313_v57  ;;  %v2310_v58 = vsel %vm2258_vm3, %v4092_v56, 0.0 }
 0x319   : > { %2311 = vadd.xlane.f32.xlu0 %v2310_v58 }
 0x31b   : > { %v4094_v59 = vpop.eup %4093 }
 0x31c   : > { %v2316_v60 = vsel %vm2258_vm3, %v4094_v59, 0.0 }
 0x31d   : > { %2317 = vadd.xlane.f32.xlu0 %v2316_v60 }
 0x31f   : > { %v4797_v61 = vpop.eup %4095 }
 0x320   : > { %v4799_v53 = vpop.eup %4097  ;;  %v2319_v62 = vsel %vm2258_vm3, %v4797_v61, 0.0 }
 0x321   : > { %2320 = vadd.xlane.f32.xlu1 %v2319_v62  ;;  %v2322_v16 = vsel %vm2258_vm3, %v4799_v53, 0.0 }
 0x322   : > { %2323 = vadd.xlane.f32.xlu0 %v2322_v16 }
 0x323   : > { %v4805_v17 = vpop.eup %4099 }
 0x324   : > { %v4807_v39 = vpop.eup %4101  ;;  %v2325_v63 = vsel %vm2258_vm3, %v4805_v17, 0.0 }
 0x325   : > { %2326 = vadd.xlane.f32.xlu1 %v2325_v63  ;;  %v2328_v1 = vsel %vm2258_vm3, %v4807_v39, 0.0 }
 0x326   : > { %2329 = vadd.xlane.f32.xlu0 %v2328_v1 }
 0x336   : > { %1363 = vrot.lane.b32.xlu1 %v4608_v18, %s4303_s25  ;;  %s525_s25 = scalar_lea.vmem [#allocation8], %s3687_s28 }
 0x33c   : > { %1366 = vrot.lane.b32.xlu0 %v4608_v18, %s4302_s21 }
 0x39d   : > { %v2309_v20 = vpop.xlane.xlu1 %2308 }
 0x39e   : > { %4103 = vrcp.f32 %v2309_v20 }
 0x3a1   : > { %v2315_v3 = vpop.xlane.xlu1 %2314 }
 0x3a2   : > { %4105 = vrcp.f32 %v2315_v3  ;;  %v2312_v4 = vpop.xlane.xlu0 %2311 }
 0x3a3   : > { %4107 = vrcp.f32 %v2312_v4 }
 0x3a6   : > { %v2318_v5 = vpop.xlane.xlu0 %2317 }
 0x3a7   : > { %4109 = vrcp.f32 %v2318_v5 }
 0x3aa   : > { %v2321_v6 = vpop.xlane.xlu1 %2320 }
 0x3ab   : > { %v4104_v8 = vpop.eup %4103  ;;  %v2324_v9 = vpop.xlane.xlu0 %2323  ;;  %4111 = vrcp.f32 %v2321_v6 }
 0x3ac   : > { %v2339_v10 = vmul.f32 %v4104_v8, %v4088_v46  ;;  %4113 = vrcp.f32 %v2324_v9 }
 0x3ae   : > { %3906 = vmatmul.mubr.msk.f32.vlgmr.msra.gmra.mxu0 %vm2258_vm3, %v2339_v10  ;;  %v2327_v11 = vpop.xlane.xlu1 %2326 }
 0x3af   : > { %v4106_v12 = vpop.eup %4105  ;;  %3914 = vmatpush3.msra.mxu0 %v1635_v50  ;;  %v2330_v18 = vpop.xlane.xlu0 %2329  ;;  %3915 = vmatprep.mubr.msk.f32.mxu0 %vm4296_vm0, %v4295_v0  ;;  %4115 = vrcp.f32 %v2327_v11 }
 0x3b0   : > { %v4108_v13 = vpop.eup %4107  ;;  %v2341_v14 = vmul.f32 %v4106_v12, %v4090_v55  ;;  %3923 = vmatprep.subr.mxu0 %v4295_v0  ;;  %4117 = vrcp.f32 %v2330_v18 }
 0x3b1   : > { %v2340_v15 = vmul.f32 %v4108_v13, %v4092_v56 }
 0x3b2   : > { %3916 = vmatmul.mubr.msk.f32.vlgmr.msra.gmra.mxu0 %vm2258_vm3, %v2341_v14  ;;  %v1364_v7 = vpop.permute.xlu1 %1363 }
 0x3b3   : > { %v1401_v21 = vcombine.low %v1358_v2, %v1364_v7  ;;  %v1402_v22 = vcombine.high %v1358_v2, %v1364_v7  ;;  %3911 = vmatmul.mubr.msk.f32.vlgmr.msra.gmra.mxu1 %vm2258_vm3, %v2340_v15  ;;  %v1367_v23 = vpop.permute.xlu0 %1366  ;;  %3925 = vmatprep.mubr.msk.f32.mxu0 %vm4296_vm0, %v4295_v0 }
 0x3b4   : > { %v4110_v50 = vpop.eup %4109  ;;  %3919 = vmatpush3.msra.mxu1 %v1636_v51  ;;  %v1417_v24 = vcombine.low %v1361_v19, %v1367_v23  ;;  %v1418_v25 = vcombine.high %v1361_v19, %v1367_v23  ;;  %3920 = vmatprep.mubr.msk.f32.mxu1 %vm4296_vm0, %v4295_v0 }
 0x3b5   : > { %v1409_v26 = vrot.slane %v1401_v21, %v4613_v30  ;;  %v1416_v27 = vrot.slane %v1402_v22, %v4613_v30  ;;  %v2342_v28 = vmul.f32 %v4110_v50, %v4094_v59  ;;  %3928 = vmatprep.subr.mxu1 %v4295_v0 }
 0x3b6   : > { %v1425_v31 = vrot.slane %v1417_v24, %v4613_v30  ;;  %v1432_v32 = vrot.slane %v1418_v25, %v4613_v30 }
 0x3b7   : > { %3921 = vmatmul.mubr.msk.f32.vlgmr.msra.gmra.mxu1 %vm2258_vm3, %v2342_v28 }
 0x3b8   : > { %v1465_v49 = vcombine.low %v1409_v26, %v1425_v31  ;;  %v1466_v38 = vcombine.high %v1409_v26, %v1425_v31  ;;  %v1481_v51 = vcombine.low %v1416_v27, %v1432_v32  ;;  %v1482_v33 = vcombine.high %v1416_v27, %v1432_v32  ;;  %3930 = vmatprep.mubr.msk.f32.mxu1 %vm4296_vm0, %v4295_v0  ;;  %v4112_v56 = vpop.eup %4111 }
 0x3b9   : > { %v4114_v57 = vpop.eup %4113  ;;  %v2343_v19 = vmul.f32 %v4112_v56, %v4797_v61 }
 0x3ba   : > { %v1473_v34 = vrot.slane %v1465_v49, %v4615_v36  ;;  %v1480_v35 = vrot.slane %v1466_v38, %v4615_v36  ;;  %v1489_v37 = vrot.slane %v1481_v51, %v4615_v36  ;;  %v1496_v40 = vrot.slane %v1482_v33, %v4615_v36  ;;  %v3246_v33 = vld [vmem:[#allocation5 + $0x18] sm:$0xff] }
 0x3bb   : > { %v2344_v20 = vmul.f32 %v4114_v57, %v4799_v53 }
 0x3bc   : > { %v3711_v41 = vcombine.low %v1473_v34, %v1480_v35  ;;  %v3713_v42 = vcombine.high %v1473_v34, %v1480_v35  ;;  %v3715_v43 = vcombine.low %v1489_v37, %v1496_v40  ;;  %v3717_v44 = vcombine.high %v1489_v37, %v1496_v40  ;;  %v4116_v16 = vpop.eup %4115 }
 0x3bd   : > { %v4118_v2 = vpop.eup %4117  ;;  %v2345_v5 = vmul.f32 %v4116_v16, %v4805_v17 }
 0x3be   : > { %v1520_v45 = vrot.slane %v3711_v41, %v4613_v30  ;;  %v1536_v46 = vrot.slane %v3713_v42, %v4613_v30  ;;  %v1552_v47 = vrot.slane %v3715_v43, %v4613_v30  ;;  %v1568_v29 = vrot.slane %v3717_v44, %v4613_v30 }
 0x3bf   : > { %v2346_v61 = vmul.f32 %v4118_v2, %v4807_v39 }
 0x3c0   : > { %v1585_v48 = vcombine.low %v1520_v45, %v1536_v46  ;;  %v1617_v52 = vcombine.low %v1552_v47, %v1568_v29  ;;  %v1586_v54 = vcombine.high %v1520_v45, %v1536_v46  ;;  %v1618_v55 = vcombine.high %v1552_v47, %v1568_v29 }
 0x3c2   : > { %v1593_v58 = vrot.slane %v1585_v48, %v4615_v36  ;;  %v1625_v59 = vrot.slane %v1617_v52, %v4615_v36  ;;  %v1600_v60 = vrot.slane %v1586_v54, %v4615_v36  ;;  %v1632_v62 = vrot.slane %v1618_v55, %v4615_v36 }
 0x3c4   : > { %v1637_v63 = vcombine.low %v1593_v58, %v1625_v59  ;;  %v1638_v1 = vcombine.high %v1593_v58, %v1625_v59  ;;  %v1639_v3 = vcombine.low %v1600_v60, %v1632_v62  ;;  %v1640_v4 = vcombine.high %v1600_v60, %v1632_v62 }
 0x3c6   : > { %3924 = vmatpush3.msra.mxu0 %v1637_v63  ;;  %3929 = vmatpush3.msra.mxu1 %v1638_v1 }
 0x3c7   : > { %3926 = vmatmul.mubr.msk.f32.vlgmr.msra.gmra.mxu0 %vm2258_vm3, %v2343_v19  ;;  %3931 = vmatmul.mubr.msk.f32.vlgmr.msra.gmra.mxu1 %vm2258_vm3, %v2344_v20 }
 0x3c8   : > { %3933 = vmatprep.subr.mxu0 %v4295_v0  ;;  %3938 = vmatprep.subr.mxu1 %v4295_v0 }
 0x3c9   : > { %3934 = vmatpush3.msra.mxu0 %v1639_v3  ;;  %3939 = vmatpush3.msra.mxu1 %v1640_v4 }
 0x3ca   : > { %3935 = vmatprep.mubr.msk.f32.mxu0 %vm4296_vm0, %v4295_v0  ;;  %3940 = vmatprep.mubr.msk.f32.mxu1 %vm4296_vm0, %v4295_v0 }
 0x3cb   : > { %3936 = vmatmul.mubr.msk.f32.vlgmr.msra.gmra.mxu0 %vm2258_vm3, %v2345_v5  ;;  %3941 = vmatmul.mubr.msk.f32.vlgmr.msra.gmra.mxu1 %vm2258_vm3, %v2346_v61 }
 0x3cc   : > { %3943 = vmatprep.subr.mxu0 %v4295_v0  ;;  %3951 = vmatprep.mubr.msk.f32.mxu0 %vm4296_vm0, %v4295_v0 }
 0x3cd   : > { %3954 = vmatprep.subr.mxu1 %v4295_v0  ;;  %3962 = vmatprep.mubr.msk.f32.mxu1 %vm4296_vm0, %v4295_v0 }
 0x3ce   : > { %3944 = vmatpush3.msra.mxu0 %v3246_v33 }
 0x3cf   : > { %3945 = vmatprep.subr.mxu0 %v4295_v0 }
 0x46e   : > { %v2416_v53 = vpop.f32.mrf.mxu0 }
 0x470   : > { %v3907_v17 = vpop.f32.mrf.mxu0 }
 0x472   : > { %v2562_v39 = vpop.f32.mrf.mxu0 }
 0x473   : > { %v2489_v6 = vpop.f32.mrf.mxu1  ;;  %v2931_v10 = vcombine.low %v2416_v53, %v2562_v39  ;;  %v2932_v11 = vcombine.high %v2416_v53, %v2562_v39 }
 0x474   : > { %v3917_v8 = vpop.f32.mrf.mxu0 }
 0x475   : > { %v3912_v9 = vpop.f32.mrf.mxu1  ;;  %v2939_v15 = vrot.slane %v2931_v10, %v4613_v30  ;;  %v2946_v7 = vrot.slane %v2932_v11, %v4613_v30  ;;  %v3245_v8 = vld [vmem:[#allocation5 + $0x10] sm:$0xff] }
 0x476   : > { %v3244_v9 = vld [vmem:[#allocation5 + $0x8] sm:$0xff]  ;;  %3946 = vmatpush3.msra.mxu0 %v3245_v8 }
 0x477   : > { %v2635_v12 = vpop.f32.mrf.mxu1  ;;  %3947 = vmatprep.subr.mxu0 %v4295_v0 }
 0x478   : > { %v2947_v18 = vcombine.low %v2489_v6, %v2635_v12  ;;  %v2948_v13 = vcombine.high %v2489_v6, %v2635_v12  ;;  %3948 = vmatpush3.msra.mxu0 %v3244_v9 }
 0x479   : > { %v3922_v14 = vpop.f32.mrf.mxu1  ;;  %3949 = vmatprep.subr.mxu0 %v4295_v0 }
 0x47a   : > { %v2955_v21 = vrot.slane %v2947_v18, %v4613_v30  ;;  %v2962_v22 = vrot.slane %v2948_v13, %v4613_v30 }
 0x47c   : > { %v2995_v23 = vcombine.low %v2939_v15, %v2955_v21  ;;  %v2996_v50 = vcombine.high %v2939_v15, %v2955_v21  ;;  %v3011_v24 = vcombine.low %v2946_v7, %v2962_v22  ;;  %v3012_v25 = vcombine.high %v2946_v7, %v2962_v22 }
 0x47e   : > { %v3003_v26 = vrot.slane %v2995_v23, %v4615_v36  ;;  %v3010_v27 = vrot.slane %v2996_v50, %v4615_v36  ;;  %v3019_v28 = vrot.slane %v3011_v24, %v4615_v36  ;;  %v3026_v31 = vrot.slane %v3012_v25, %v4615_v36  ;;  %v3243_v24 = vld [vmem:[#allocation5] sm:$0xff] }
 0x47f   : > { %3950 = vmatpush3.msra.mxu0 %v3243_v24 }
 0x480   : > { %v3742_v32 = vcombine.low %v3003_v26, %v3010_v27  ;;  %v3744_v49 = vcombine.high %v3003_v26, %v3010_v27  ;;  %v3746_v38 = vcombine.low %v3019_v28, %v3026_v31  ;;  %v3748_v51 = vcombine.high %v3019_v28, %v3026_v31  ;;  %3965 = vmatprep.subr.mxu0 %v4295_v0 }
 0x482   : > { %v3075_v34 = vrot.slane %v3742_v32, %v4613_v30  ;;  %v3091_v35 = vrot.slane %v3744_v49, %v4613_v30  ;;  %v3107_v37 = vrot.slane %v3746_v38, %v4613_v30  ;;  %v3123_v40 = vrot.slane %v3748_v51, %v4613_v30 }
 0x484   : > { %v3132_v41 = vcombine.high %v3075_v34, %v3091_v35  ;;  %v3164_v42 = vcombine.high %v3107_v37, %v3123_v40  ;;  %v3131_v43 = vcombine.low %v3075_v34, %v3091_v35  ;;  %v3163_v44 = vcombine.low %v3107_v37, %v3123_v40 }
 0x486   : > { %v3146_v45 = vrot.slane %v3132_v41, %v4615_v36  ;;  %v3178_v46 = vrot.slane %v3164_v42, %v4615_v36  ;;  %v4889_v47 = vrot.slane %v3131_v43, %v4615_v36  ;;  %v4892_v29 = vrot.slane %v3163_v44, %v4615_v36 }
 0x487   : > { %v2708_v48 = vpop.f32.mrf.mxu0  ;;  %v2781_v52 = vpop.f32.mrf.mxu1 }
 0x488   : > { %v3197_v54 = vcombine.low %v3146_v45, %v3178_v46  ;;  %v3196_v55 = vcombine.high %v4889_v47, %v4892_v29  ;;  %v3195_v56 = vcombine.low %v4889_v47, %v4892_v29  ;;  %v3198_v62 = vcombine.high %v3146_v45, %v3178_v46  ;;  %v3750_v29 = vld [vmem:[%s5034_s5] ss:$0 sm:$0xff] }
 0x489   : > { %v3927_v57 = vpop.f32.mrf.mxu0  ;;  %v3932_v58 = vpop.f32.mrf.mxu1 }
 0x48a   : > { %3208 = vrot.lane.b32.xlu0 %v3197_v54, %s4306_s13  ;;  %3204 = vrot.lane.b32.xlu1 %v3196_v55, %s4307_s19  ;;  %v4123_v58 = vld [vmem:[%s4517_s17] sm:$0xff]  ;;  %s3578_s13 = sshll.u32 %s525_s25, 4  ;;  %s3579_s13 = int_to_ptr.vmem [resolvable:$true] %s3578_s13 }
 0x48b   : > { %v2854_v59 = vpop.f32.mrf.mxu0  ;;  %v2927_v60 = vpop.f32.mrf.mxu1  ;;  %s4204_s29 = scalar_lea.vmem %s3579_s13, 128 }
 0x48c   : > { %v2963_v16 = vcombine.low %v2708_v48, %v2854_v59  ;;  %v2964_v63 = vcombine.high %v2708_v48, %v2854_v59  ;;  %v2979_v1 = vcombine.low %v2781_v52, %v2927_v60  ;;  %v2980_v19 = vcombine.high %v2781_v52, %v2927_v60  ;;  %p4205_p8 = scmp.ne.s32.totalorder %s3579_s13, %s4204_s29 }
 0x48d   : > { %v3937_v20 = vpop.f32.mrf.mxu0  ;;  %v3942_v2 = vpop.f32.mrf.mxu1 }
 0x48e   : > { %v2971_v3 = vrot.slane %v2963_v16, %v4613_v30  ;;  %v2978_v4 = vrot.slane %v2964_v63, %v4613_v30  ;;  %v2987_v5 = vrot.slane %v2979_v1, %v4613_v30  ;;  %v2994_v61 = vrot.slane %v2980_v19, %v4613_v30  ;;  %3212 = vrot.lane.b32.xlu1 %v3198_v62, %s4308_s24  ;;  %v3361_v20 = vld [vmem:[#allocation7 + $0x18] sm:$0xff]  ;;  %v3360_v2 = vld [vmem:[#allocation7 + $0x10] sm:$0xff]  ;;  %p4206_p9 = pnand %p4205_p8, %p4484_p7 }
 0x48f   : > { %3955 = vmatpush3.msra.mxu1 %v3361_v20 }
 0x490   : > { %v3027_v53 = vcombine.low %v2971_v3, %v2987_v5  ;;  %v3028_v17 = vcombine.high %v2971_v3, %v2987_v5  ;;  %v3043_v39 = vcombine.low %v2978_v4, %v2994_v61  ;;  %v3044_v6 = vcombine.high %v2978_v4, %v2994_v61  ;;  %3956 = vmatprep.subr.mxu1 %v4295_v0  ;;  %v3359_v3 = vld [vmem:[#allocation7 + $0x8] sm:$0xff]  ;;  %v3358_v4 = vld [vmem:[#allocation7] sm:$0xff]  ;;  %p4207_p11 = pneg %p4206_p9 }
 0x491   : > { %3957 = vmatpush3.msra.mxu1 %v3360_v2  ;;  %v3450_v5 = vld [vmem:[%s5037_s8 + $0x38] sm:$0xff]  ;;  %v3449_v61 = vld [vmem:[%s5037_s8 + $0x30] sm:$0xff] }
 0x492   : > { %v3035_v10 = vrot.slane %v3027_v53, %v4615_v36  ;;  %v3042_v11 = vrot.slane %v3028_v17, %v4615_v36  ;;  %v3051_v12 = vrot.slane %v3043_v39, %v4615_v36  ;;  %v3058_v18 = vrot.slane %v3044_v6, %v4615_v36  ;;  %3958 = vmatprep.subr.mxu1 %v4295_v0  ;;  %v3448_v53 = vld [vmem:[%s5037_s8 + $0x28] sm:$0xff]  ;;  %v3447_v17 = vld [vmem:[%s5037_s8 + $0x20] sm:$0xff]  ;;  %v3446_v39 = vld [vmem:[%s5037_s8 + $0x18] sm:$0xff] }
 0x493   : > { %3959 = vmatpush3.msra.mxu1 %v3359_v3 }
 0x494   : > { %v3743_v13 = vcombine.low %v3035_v10, %v3042_v11  ;;  %v3745_v14 = vcombine.high %v3035_v10, %v3042_v11  ;;  %v3747_v15 = vcombine.low %v3051_v12, %v3058_v18  ;;  %v3749_v7 = vcombine.high %v3051_v12, %v3058_v18  ;;  %3960 = vmatprep.subr.mxu1 %v4295_v0  ;;  %v3752_v11 = vld [vmem:[%s5039_s10] ss:$0 sm:$0xff] }
 0x495   : > { %3961 = vmatpush3.msra.mxu1 %v3358_v4  ;;  %v3753_v18 = vld [vmem:[%s5040_s11] ss:$0 sm:$0xff] }
 0x496   : > { %v3082_v21 = vrot.slane %v3743_v13, %v4613_v30  ;;  %v3098_v22 = vrot.slane %v3745_v14, %v4613_v30  ;;  %v3114_v23 = vrot.slane %v3747_v15, %v4613_v30  ;;  %v3130_v50 = vrot.slane %v3749_v7, %v4613_v30  ;;  %v3445_v15 = vld [vmem:[%s5037_s8 + $0x10] sm:$0xff]  ;;  %v3444_v7 = vld [vmem:[%s5037_s8 + $0x8] sm:$0xff] }
 0x498   : > { %v3147_v25 = vcombine.low %v3082_v21, %v3098_v22  ;;  %v3179_v26 = vcombine.low %v3114_v23, %v3130_v50  ;;  %v3148_v27 = vcombine.high %v3082_v21, %v3098_v22  ;;  %v3180_v28 = vcombine.high %v3114_v23, %v3130_v50  ;;  %v3443_v21 = vld [vmem:[%s5037_s8] sm:$0xff] }
 0x499   : > { %v3754_v22 = vld [vmem:[%s5036_s7] ss:$0 sm:$0xff] }
 0x49a   : > { %v3155_v31 = vrot.slane %v3147_v25, %v4615_v36  ;;  %v3187_v32 = vrot.slane %v3179_v26, %v4615_v36  ;;  %v3162_v51 = vrot.slane %v3148_v27, %v4615_v36  ;;  %v3194_v33 = vrot.slane %v3180_v28, %v4615_v36  ;;  %v3756_v26 = vld [vmem:[%s5038_s9] ss:$0 sm:$0xff] }
 0x49c   : > { %v3200_v49 = vcombine.high %v3155_v31, %v3187_v32  ;;  %v3199_v38 = vcombine.low %v3155_v31, %v3187_v32  ;;  %v3202_v30 = vcombine.high %v3162_v51, %v3194_v33  ;;  %v3201_v34 = vcombine.low %v3162_v51, %v3194_v33 }
 0x49e   : > { %3220 = vrot.lane.b32.xlu1 %v3200_v49, %s4309_s22  ;;  %3216 = vrot.lane.b32.xlu0 %v3199_v38, %s4310_s27  ;;  %s5077_s22 = sld [smem:[#allocation21_spill]] }
 0x4a2   : > { %3228 = vrot.lane.b32.xlu1 %v3202_v30, %s4311_s14  ;;  %3224 = vrot.lane.b32.xlu0 %v3201_v34, %s4312_s20  ;;  %s5074_s14 = sld [smem:[#allocation13_spill]]  ;;  %s3564_s20 = scalar_lea.sflag [#allocation4], %s4511_s6 }
 0x4a8   : > { %s3761_s21 = sshll.u32 %s5074_s14, 7 }
 0x4a9   : > { %s3576_s27 = scalar_lea.hbm %s5077_s22, %s3761_s21 }
 0x4fc   : > { %v3205_v35 = vpop.permute.xlu1 %3204  ;;  %v3209_v37 = vpop.permute.xlu0 %3208 }
 0x4fd   : > { %v3231_v40 = vsel %vm1641_vm2, %v3195_v56, %v3205_v35 }
 0x4fe   : > { %v3232_v36 = vsel %vm2258_vm3, %v3231_v40, %v3209_v37 }
 0x500   : > { %v3213_v41 = vpop.permute.xlu1 %3212 }
 0x501   : > { %v3234_v42 = vsel %vm3233_vm4, %v3232_v36, %v3213_v41  ;;  %v3758_v41 = vld [vmem:[%s5075_s4] ss:$0 sm:$0xff]  ;;  %s4313_s4 = smov [#allocation8]  }
 0x502   : > { %s4208_s14 = sshll.u32 %s4313_s4, 4  ;;  %s4209_s14 = int_to_ptr.vmem [resolvable:$false] %s4208_s14 }
 0x503   : > { %s4210_s28 = scalar_lea.vmem %s4209_s14, 256  ;;  %p4211_p2 = scmp.lt.s32.totalorder %s3579_s13, %s4209_s14 }
 0x504   : > { %p4212_p13 = scmp.lt.s32.totalorder %s4210_s28, %s4204_s29 }
 0x506   : > { %p4213_p0 = por %p4212_p13, %p4211_p2 }
 0x508   : > { %p4214_p5 = pnand %p4213_p0, %p4207_p11 }
 0x510   : > { %v3221_v43 = vpop.permute.xlu1 %3220  ;;  %v3217_v44 = vpop.permute.xlu0 %3216 }
 0x511   : > { %v3236_v45 = vsel %vm3235_vm5, %v3234_v42, %v3217_v44  ;;  %v3759_v42 = vld [vmem:[%s5076_s23] ss:$0 sm:$0xff] }
 0x512   : > { %v3238_v48 = vsel %vm3237_vm6, %v3236_v45, %v3221_v43 }
 0x514   : > { %v3229_v46 = vpop.permute.xlu1 %3228  ;;  %v3225_v52 = vpop.permute.xlu0 %3224 }
 0x515   : > { %v3240_v54 = vsel %vm3239_vm7, %v3238_v48, %v3225_v52 }
 0x516   : > { %v3242_v47 = vsel %vm3241_vm8, %v3240_v54, %v3229_v46 }
 0x517   : > { %3952 = vmatmul.mubr.msk.f32.vlgmr.msra.gmra.mxu0 %vm534_vm1, %v3242_v47 }
 0x518   : > { %3981 = vmatprep.mubr.msk.f32.mxu0 %vm4296_vm0, %v4295_v0  ;;  %3966 = vmatpush3.msra.mxu0 %v3450_v5 }
 0x519   : > { %3967 = vmatprep.subr.mxu0 %v4295_v0 }
 0x51a   : > { %3968 = vmatpush3.msra.mxu0 %v3449_v61 }
 0x51b   : > { %3969 = vmatprep.subr.mxu0 %v4295_v0 }
 0x51c   : > { %3970 = vmatpush3.msra.mxu0 %v3448_v53 }
 0x51d   : > { %3971 = vmatprep.subr.mxu0 %v4295_v0 }
 0x51e   : > { %3972 = vmatpush3.msra.mxu0 %v3447_v17 }
 0x51f   : > { %3973 = vmatprep.subr.mxu0 %v4295_v0 }
 0x520   : > { %3974 = vmatpush3.msra.mxu0 %v3446_v39 }
 0x521   : > { %3975 = vmatprep.subr.mxu0 %v4295_v0 }
 0x522   : > { %3976 = vmatpush3.msra.mxu0 %v3445_v15 }
 0x523   : > { %3977 = vmatprep.subr.mxu0 %v4295_v0 }
 0x524   : > { %3978 = vmatpush3.msra.mxu0 %v3444_v7 }
 0x525   : > { %3979 = vmatprep.subr.mxu0 %v4295_v0 }
 0x526   : > { %3980 = vmatpush3.msra.mxu0 %v3443_v21 }
 0x5d7   : > { %v3323_v55 = vpop.f32.mrf.mxu0 }
 0x5d8   : > { %v3324_v56 = vadd.f32 %v3750_v29, %v3323_v55 }
 0x5d9   : > { %v3953_v57 = vpop.f32.mrf.mxu0 }
 0x5da   : > { %v3327_v59 = vadd.f32 %v4123_v58, %v3324_v56 }
 0x5dc   : > { %v3330_v60 = vsel %vm534_vm1, %v3327_v59, 0.0 }
 0x5dd   : > { %3331 = vadd.xlane.f32.xlu0 %v3330_v60 }
 0x666   : > { %v3332_v62 = vpop.xlane.xlu0 %3331 }
 0x667   : > { %v3334_v16 = vmul.f32 0.03125, %v3332_v62 }
 0x669   : > { %v3335_v63 = vsub.f32 %v3327_v59, %v3334_v16 }
 0x66b   : > { %v3336_v1 = vmul.f32 %v3335_v63, %v3335_v63 }
 0x66d   : > { %v3337_v19 = vsel %vm534_vm1, %v3336_v1, 0.0 }
 0x66e   : > { %3338 = vadd.xlane.f32.xlu1 %v3337_v19 }
 0x6f7   : > { %v3339_v6 = vpop.xlane.xlu1 %3338 }
 0x6f8   : > { %v3340_v8 = vmul.f32 0.03125, %v3339_v6 }
 0x6fa   : > { %v3341_v9 = vadd.f32 1e-05, %v3340_v8 }
 0x6fc   : > { %4119 = vrsqrt.f32 %v3341_v9 }
 0x709   : > { %v4120_v10 = vpop.eup %4119 }
 0x70a   : > { %v3343_v12 = vmul.f32 %v4120_v10, %v3335_v63 }
 0x70c   : > { %v3350_v13 = vmul.f32 %v3752_v11, %v3343_v12 }
 0x70e   : > { %v3357_v14 = vadd.f32 %v3753_v18, %v3350_v13 }
 0x710   : > { %3963 = vmatmul.mubr.msk.f32.vlgmr.msra.gmra.mxu1 %vm534_vm1, %v3357_v14 }
 0x7d0   : > { %v3438_v23 = vpop.f32.mrf.mxu1 }
 0x7d1   : > { %v3439_v50 = vadd.f32 %v3754_v22, %v3438_v23 }
 0x7d2   : > { %v3964_v24 = vpop.f32.mrf.mxu1 }
 0x7d3   : > { %v3442_v25 = vmax.f32 %v3439_v50, 0.0 }
 0x7d5   : > { %3982 = vmatmul.mubr.msk.f32.vlgmr.msra.gmra.mxu0 %vm3458_vm9, %v3442_v25 }
 0x895   : > { %v3528_v27 = vpop.f32.mrf.mxu0 }
 0x896   : > { %v3529_v28 = vadd.f32 %v3756_v26, %v3528_v27 }
 0x897   : > { %v3983_v31 = vpop.f32.mrf.mxu0 }
 0x898   : > { %v3532_v32 = vadd.f32 %v3529_v28, %v3357_v14 }
 0x89a   : > { %v3535_v0 = vsel %vm534_vm1, %v3532_v32, 0.0 }
 0x89b   : > { %3536 = vadd.xlane.f32.xlu0 %v3535_v0 }
 0x924   : > { %v3537_v49 = vpop.xlane.xlu0 %3536 }
 0x925   : > { %v3538_v38 = vmul.f32 0.03125, %v3537_v49 }
 0x927   : > { %v3539_v51 = vsub.f32 %v3532_v32, %v3538_v38 }
 0x929   : > { %v3540_v33 = vmul.f32 %v3539_v51, %v3539_v51 }
 0x92b   : > { %v3541_v30 = vsel %vm534_vm1, %v3540_v33, 0.0 }
 0x92c   : > { %3542 = vadd.xlane.f32.xlu0 %v3541_v30 }
 0x9b5   : > { %v3543_v34 = vpop.xlane.xlu0 %3542 }
 0x9b6   : > { %v3544_v35 = vmul.f32 0.03125, %v3543_v34 }
 0x9b8   : > { %v3545_v37 = vadd.f32 1e-05, %v3544_v35 }
 0x9ba   : > { %4121 = vrsqrt.f32 %v3545_v37 }
 0x9c7   : > { %v4122_v40 = vpop.eup %4121 }
 0x9c8   : > { %v3547_v36 = vmul.f32 %v4122_v40, %v3539_v51 }
 0x9ca   : > { %v3554_v43 = vmul.f32 %v3758_v41, %v3547_v36 }
 0x9cc   : > { %v3561_v44 = vadd.f32 %v3759_v42, %v3554_v43 }
 0x9ce   : > { %3562 = vst.msk [vmem:[%s525_s25] sm:$0xff] %vm534_vm1, %v3561_v44 }
 0x9cf   : > { %4217 = shalt.err (!%p4214_p5)
}
 0x9d0   : > { %s4218_s17 = scalar_lea.hbm %s3576_s27, 128  ;;  %s4222_s23 = scalar_lea.hbm %s5077_s22, 256 }
 0x9d1   : > { %p4219_p10 = scmp.ne.s32.totalorder %s3576_s27, %s4218_s17  ;;  %p4223_p6 = scmp.lt.s32.totalorder %s3576_s27, %s5077_s22 }
 0x9d2   : > { %p4224_p12 = scmp.lt.s32.totalorder %s4222_s23, %s4218_s17 }
 0x9d3   : > { %p4220_p1 = pnand %p4219_p10, %p4484_p7 }
 0x9d4   : > { %p4225_p3 = por %p4224_p12, %p4223_p6 }
 0x9d5   : > { %p4221_p4 = pneg %p4220_p1 }
 0x9d7   : > { %p4226_p8 = pnand %p4225_p3, %p4221_p4 }
 0x9d9   : > { %4229 = shalt.err (!%p4226_p8)
}
 0x9da   : > { %3994 = dma.vmem_to_hbm [thread:$0]  (%p4484_p7), %s3579_s13, 128, %s3576_s27, %s3564_s20  }
 0x9db PF: > { %s5078_s19 = sld [smem:[#allocation12_spill]]  ;;  %p5081_p11 = scmp.ge.s32.totalorder %s4288_s18, 2 }
 0x9dc   : > { %s5079_s24 = sld [smem:[#allocation15_spill]] }
 0x9e1   : > { %s3590_s29 = sand.u32 1, %s5078_s19  }
 0x9e2   : > { %p5080_p9 = scmp.ne.s32.totalorder %s5079_s24, 0  ;;  %s3591_s4 = scalar_lea.sflag [#allocation4], %s3590_s29 }
 0x9e4   : > { %p4008_p2 = pnand %p5081_p11, %p5080_p9 }
 0x9e6   : > { %p4009_p13 = pneg %p4008_p2 }
 0x9e8   : > { %4263 = dma.done.wait (%p4009_p13), %s3591_s4, 128  }
 0x9e9   : > { %4265 = vsyncadd (%p4009_p13), %s3591_s4, 4294967168  ;;  %s31_s18 = sadd.s32 1, %s4288_s18   ;;  %s5082_s16 = sld [smem:[#allocation14_spill]] }
 0x9ea   : > { %p28_p0 = scmp.ge.s32.totalorder %s31_s18, 4   ;;  %s5083_s17 = sld [smem:[#allocation16_spill]] }
 0x9eb   : > { %s5084_s29 = smov %s4272_s30  ;;  %s5085_s30 = smov %s4276_s15 }
 0x9ec   : > { %s5086_s15 = smov %s4493_s26  ;;  %30 = sbr.rel (!%p28_p0) target bundleno = 13 (0xd), region = 130 }
 0x9f1   :  { %3596 = vsyncpa [#allocation3], 1 }
 0x9f2   :  { %3598 = vsyncpa [#allocation3 + $0x1], 1 }
 0x9f3   :  { %3599 = vsyncpa [#allocation6], 1 }
 0x9f4   :  { %3600 = vsyncpa [#allocation4], 1 }
 0x9f5   :  { %3602 = vsyncpa [#allocation4 + $0x1], 1 }

</bundles_post_ra>
